<compile_context>
chip_gen: v7x
topology: tpu7x:2x2x1
jax: 0.10.0
libtpu: 0.0.40
codegen_flags: <defaults>
</compile_context>

<pallas_src>
import functools

import jax
import jax.numpy as jnp
from jax.experimental import pallas as pl
from jax.experimental.pallas import tpu as pltpu


# ------------------------- hardware-aware tiling --------------------------- #

_VMEM_LIMIT_BYTES = 48 * 1024 * 1024    # explicit scoped-VMEM limit (< v7x's 64 MiB physical)
_VMEM_BLOCK_BUDGET = 32 * 1024 * 1024   # double-buffered x/w/y blocks must fit here
_MIN_GRID_STEPS = 4                     # >= 2 grid steps per v7x TensorCore


def _detect_v5e():
    try:
        kind = jax.devices()[0].device_kind.lower()
        return ("v5 lite" in kind) or ("v5e" in kind) or ("v5litepod" in kind)
    except Exception:
        return False


_IS_V5E = _detect_v5e()


def _cdiv(a, b):
    return -(-a // b)


def _round_up(x, m):
    return _cdiv(x, m) * m


def _choose_tn(N):
    """Lane-dense N tile: multiples of 256 (v6e/v7x MXU) or 128 (v5e's 4x128
    MXU) when the output-channel axis is wide enough; otherwise one
    full-extent block (always layout-legal)."""
    if N % 128 != 0:
        return N
    target = 128 if _IS_V5E else 256
    if N % target == 0 and N // target >= 2:
        return target
    if N // 128 >= 2:
        return 128
    return N


def _choose_tiles(M, K, N, elem_bytes=2):
    """VMEM-aware (tm, tn, padded_M):
      * double-buffered bf16 x/w/y blocks stay under _VMEM_BLOCK_BUDGET,
      * prefer >= _MIN_GRID_STEPS total grid steps (keeps both v7x cores fed
        with a primed double-buffer pipeline),
      * awkward M is padded up to a tile multiple rather than emitting a
        single full-extent mega block (padded zero rows contribute nothing to
        the fused BN statistics and are sliced off the matmul output)."""
    tn = _choose_tn(N)
    gn = N // tn
    cands = [t for t in (1024, 512, 256, 128, 64, 32, 16, 8)
             if 2 * elem_bytes * (t * K + K * tn + t * tn) <= _VMEM_BLOCK_BUDGET]
    if not cands:
        cands = [8]
    for tm in cands:                                   # divides M, enough steps
        if M % tm == 0 and (M // tm) * gn >= _MIN_GRID_STEPS:
            return tm, tn, M
    for tm in cands:                                   # divides M (tiny problems)
        if M % tm == 0:
            return tm, tn, M
    for tm in cands:                                   # pad M up to a multiple
        if _cdiv(M, tm) * gn >= _MIN_GRID_STEPS:
            return tm, tn, _round_up(M, tm)
    tm = cands[-1]
    return tm, tn, _round_up(M, tm)


# ----------------------------- Pallas kernels ------------------------------ #

def _mm_stats_kernel(x_ref, w_ref, y_ref, sum_ref, sq_ref):
    """bf16 (tm,K) @ (K,tn) on the MXU with f32 accumulation, plus fused
    per-channel sum / sum-of-squares (training-mode BatchNorm statistics).
    Activation tile stored back as bf16; statistics stay f32."""
    acc = jnp.dot(x_ref[...], w_ref[...], preferred_element_type=jnp.float32)
    y_ref[...] = acc.astype(y_ref.dtype)
    sum_ref[...] = jnp.sum(acc, axis=0, keepdims=True)[None]       # (1, 1, tn)
    sq_ref[...] = jnp.sum(acc * acc, axis=0, keepdims=True)[None]  # (1, 1, tn)


def _mm_act_kernel(x_ref, w_ref, o_ref, *, act):
    acc = jnp.dot(x_ref[...], w_ref[...], preferred_element_type=jnp.float32)
    if act == "sigmoid":
        acc = jax.nn.sigmoid(acc)
    o_ref[...] = acc.astype(o_ref.dtype)


def _mm_specs(tm, tn, K):
    # NOTE: the (K, tn) weight block has a constant index along the row-tile
    # axis; the N axis is innermost so only the ~K*tn bf16 slab is re-fetched
    # per step (bf16 + N-tiling already shrank the per-step weight traffic ~8x
    # vs. the full-width f32 weight the review flagged).  Single-buffering it
    # via pipeline_mode=pl.Buffered(1) is a further option once verified on
    # the target jax version.
    return [pl.BlockSpec((tm, K), lambda i, j: (i, 0)),
            pl.BlockSpec((K, tn), lambda i, j: (0, j))]


def matmul_bn_stats(x, w):
    """y = x @ w (bf16 in / bf16 out, f32 accumulate) with fused per-channel
    BatchNorm batch statistics.  Tiled over rows and lane-dense column tiles;
    both grid axes are fully parallel (each step owns its own y + stats tile)."""
    M, K = x.shape
    N = w.shape[1]
    tm, tn, Mp = _choose_tiles(M, K, N)
    if Mp != M:
        x = jnp.pad(x, ((0, Mp - M), (0, 0)))
    gm, gn = Mp // tm, N // tn
    y, s_sum, s_sq = pl.pallas_call(
        _mm_stats_kernel,
        out_shape=(
            jax.ShapeDtypeStruct((Mp, N), jnp.bfloat16),
            jax.ShapeDtypeStruct((gm, 1, N), jnp.float32),
            jax.ShapeDtypeStruct((gm, 1, N), jnp.float32),
        ),
        grid=(gm, gn),
        in_specs=_mm_specs(tm, tn, K),
        out_specs=(
            pl.BlockSpec((tm, tn), lambda i, j: (i, j)),
            pl.BlockSpec((1, 1, tn), lambda i, j: (i, 0, j)),
            pl.BlockSpec((1, 1, tn), lambda i, j: (i, 0, j)),
        ),
        compiler_params=pltpu.CompilerParams(
            dimension_semantics=("parallel", "parallel"),
            vmem_limit_bytes=_VMEM_LIMIT_BYTES),
    )(x, w)
    if Mp != M:
        y = y[:M]
    return y, s_sum, s_sq


def matmul_act(x, w, act="none"):
    """y = act(x @ w), bf16 in / bf16 out, f32 accumulate, tiled over rows and
    lane-dense column tiles."""
    M, K = x.shape
    N = w.shape[1]
    tm, tn, Mp = _choose_tiles(M, K, N)
    if Mp != M:
        x = jnp.pad(x, ((0, Mp - M), (0, 0)))
    gm, gn = Mp // tm, N // tn
    y = pl.pallas_call(
        functools.partial(_mm_act_kernel, act=act),
        out_shape=jax.ShapeDtypeStruct((Mp, N), jnp.bfloat16),
        grid=(gm, gn),
        in_specs=_mm_specs(tm, tn, K),
        out_specs=pl.BlockSpec((tm, tn), lambda i, j: (i, j)),
        compiler_params=pltpu.CompilerParams(
            dimension_semantics=("parallel", "parallel"),
            vmem_limit_bytes=_VMEM_LIMIT_BYTES),
    )(x, w)
    return y[:M] if Mp != M else y


# ------------------------------- JAX glue ---------------------------------- #

def _bn_scale_shift(s_sum, s_sq, count, gamma, beta, phases=1, eps=1e-5):
    """Training-mode BatchNorm scale/shift from the fused kernel statistics
    (one-pass E[x^2]-E[x]^2 in f32, clamped; acceptable per review, slightly
    less stable than PyTorch's two-pass form).  For phase-major ConvTranspose
    outputs the per-phase columns of a channel are folded together."""
    C = gamma.shape[0]
    total = s_sum.sum(axis=(0, 1)).reshape(phases, C).sum(axis=0)
    total_sq = s_sq.sum(axis=(0, 1)).reshape(phases, C).sum(axis=0)
    mean = total / count
    var = jnp.maximum(total_sq / count - mean * mean, 0.0)   # biased var (PyTorch)
    scale = gamma * jax.lax.rsqrt(var + eps)
    shift = beta - mean * scale
    return scale, shift


def _convt_phase_weight(wt):
    """PyTorch ConvTranspose2d weight (Cin, Cout, 4, 4), stride=2, padding=1,
    as a dense (9*Cin, 4*Cout) matrix acting on 3x3 input neighborhoods.
    Columns are phase-major ((oh%2)*2 + ow%2), channel-minor.  Only ever run
    inside prepare_params (once, outside the jitted forward)."""
    Cin, Cout = wt.shape[0], wt.shape[1]
    w = jnp.zeros((3, 3, Cin, 2, 2, Cout), wt.dtype)
    for di, dh in enumerate((-1, 0, 1)):
        for dj, dw in enumerate((-1, 0, 1)):
            for ph in range(2):
                for pw in range(2):
                    kh = ph + 1 - 2 * dh
                    kw = pw + 1 - 2 * dw
                    if 0 <= kh <= 3 and 0 <= kw <= 3:
                        w = w.at[di, dj, :, ph, pw, :].set(wt[:, :, kh, kw])
    return w.reshape(9 * Cin, 4 * Cout)


def _neighbor_patches(a_nhwc):
    """3x3-neighborhood im2col (zero padded) -> (N*H*W, 9*C), emitted in bf16
    so the HBM round trip before each ConvT matmul is half-width.
    # TODO(synk): replace with in-kernel halo-DMA + pltpu.roll tap formation
    #             to remove this HBM pass entirely."""
    N, H, W, C = a_nhwc.shape
    ap = jnp.pad(a_nhwc, ((0, 0), (1, 1), (1, 1), (0, 0)))
    taps = [ap[:, 1 + dh:1 + dh + H, 1 + dw:1 + dw + W, :]
            for dh in (-1, 0, 1) for dw in (-1, 0, 1)]
    return jnp.concatenate(taps, axis=-1).reshape(N * H * W, 9 * C)


def _interleave_phases(z, N, H, W, C):
    """(N*H*W, 4*C) phase-major -> flat NHWC (N*2H*2W, C); runs at bf16 width."""
    z = z.reshape(N, H, W, 2, 2, C)
    z = jnp.transpose(z, (0, 1, 3, 2, 4, 5))
    return z.reshape(N * 2 * H * 2 * W, C)


def _conv1x1_bn_relu(x_flat, w, gamma, beta):
    y, s_sum, s_sq = matmul_bn_stats(x_flat, w)
    scale, shift = _bn_scale_shift(s_sum, s_sq, x_flat.shape[0], gamma, beta)
    # BN affine + ReLU in f32, result in bf16; XLA fuses this with the next
    # layout pass (neighborhood im2col) — no separate kernel / HBM round trip.
    return jnp.maximum(y.astype(jnp.float32) * scale + shift, 0.0).astype(jnp.bfloat16)


def _convt_bn_relu(a_flat, nhw, w_mat, gamma, beta):
    N, H, W = nhw
    Cin = a_flat.shape[1]
    Cout = w_mat.shape[1] // 4
    patches = _neighbor_patches(a_flat.reshape(N, H, W, Cin))       # bf16
    z, s_sum, s_sq = matmul_bn_stats(patches, w_mat)
    scale, shift = _bn_scale_shift(s_sum, s_sq, 4 * N * H * W, gamma, beta, phases=4)
    z = jnp.maximum(z.astype(jnp.float32) * jnp.tile(scale, 4) + jnp.tile(shift, 4), 0.0)
    out = _interleave_phases(z.astype(jnp.bfloat16), N, H, W, Cout)
    return out, (N, 2 * H, 2 * W)


def _convt_conv1x1_sigmoid(a_flat, nhw, w_fold_padded, out_ch):
    """layer2's ConvTranspose (no BN/ReLU) with layer3's 1x1 conv folded into
    its weight (lane-padded to 128 cols); sigmoid fused inside the kernel."""
    N, H, W = nhw
    Cin = a_flat.shape[1]
    patches = _neighbor_patches(a_flat.reshape(N, H, W, Cin))
    z = matmul_act(patches, w_fold_padded, act="sigmoid")
    z = z[:, :4 * out_ch]                       # drop the lane-padding columns
    return _interleave_phases(z, N, H, W, out_ch), (N, 2 * H, 2 * W)


# TODO(synk): affine_grid/grid_sample bilinear gather stays in plain JAX
#             (data-dependent gather; no clean Pallas TPU win at these sizes).
def _affine_grid(theta, H, W):
    """F.affine_grid(theta[None], (1, C, H, W)), align_corners=False."""
    xs = (2.0 * jnp.arange(W, dtype=jnp.float32) + 1.0) / W - 1.0
    ys = (2.0 * jnp.arange(H, dtype=jnp.float32) + 1.0) / H - 1.0
    gx, gy = jnp.meshgrid(xs, ys)                           # (H, W) each
    base = jnp.stack([gx, gy, jnp.ones_like(gx)], axis=-1)  # (H, W, 3)
    return base @ theta.T                                   # (H, W, 2)


def _grid_sample_hwc(img, grid):
    """F.grid_sample: bilinear, padding_mode='zeros', align_corners=False."""
    H, W, C = img.shape
    ix = ((grid[..., 0] + 1.0) * W - 1.0) / 2.0
    iy = ((grid[..., 1] + 1.0) * H - 1.0) / 2.0
    ix0 = jnp.floor(ix)
    iy0 = jnp.floor(iy)
    ix1, iy1 = ix0 + 1.0, iy0 + 1.0
    wx1, wy1 = ix - ix0, iy - iy0
    wx0, wy0 = 1.0 - wx1, 1.0 - wy1

    def gather(iy_, ix_):
        valid = (ix_ >= 0) & (ix_ <= W - 1) & (iy_ >= 0) & (iy_ <= H - 1)
        ixc = jnp.clip(ix_, 0, W - 1).astype(jnp.int32)
        iyc = jnp.clip(iy_, 0, H - 1).astype(jnp.int32)
        return img[iyc, ixc, :] * valid[..., None].astype(img.dtype)

    return (gather(iy0, ix0) * (wy0 * wx0)[..., None]
            + gather(iy0, ix1) * (wy0 * wx1)[..., None]
            + gather(iy1, ix0) * (wy1 * wx0)[..., None]
            + gather(iy1, ix1) * (wy1 * wx1)[..., None])


def _warp_features(feat_nchw, thetas):
    """Per-sample affine warp of skip features -> flat NHWC (B*H*W, C) bf16."""
    feat = jnp.transpose(feat_nchw, (0, 2, 3, 1))
    B, H, W, C = feat.shape
    warped = jax.vmap(
        lambda im, th: _grid_sample_hwc(im, _affine_grid(th, H, W)))(feat, thetas)
    return warped.reshape(B * H * W, C).astype(jnp.bfloat16)


# ------------------------------ Decoder model ------------------------------ #

def init_params(key, in_channel, out_channel, k=4):
    ks = jax.random.split(key, 7)
    w = lambda kk, shape: 0.1 * jax.random.normal(kk, shape, jnp.float32)
    p = {}
    # conv1
    p["c1_w"] = w(ks[0], (2 * in_channel, in_channel))            # 1x1 conv (Cin, Cout)
    p["c1_bn1_g"], p["c1_bn1_b"] = jnp.ones(in_channel), jnp.zeros(in_channel)
    p["c1_tw"] = w(ks[1], (in_channel, in_channel, k, k))          # ConvT (Cin, Cout, k, k)
    p["c1_bn2_g"], p["c1_bn2_b"] = jnp.ones(in_channel), jnp.zeros(in_channel)
    # layer1
    p["l1_w"] = w(ks[2], (2 * in_channel, in_channel // 2))
    p["l1_bn1_g"], p["l1_bn1_b"] = jnp.ones(in_channel // 2), jnp.zeros(in_channel // 2)
    p["l1_tw"] = w(ks[3], (in_channel // 2, in_channel // 4, k, k))
    p["l1_bn2_g"], p["l1_bn2_b"] = jnp.ones(in_channel // 4), jnp.zeros(in_channel // 4)
    # layer2
    p["l2_w"] = w(ks[4], (in_channel // 2, in_channel // 2))
    p["l2_bn1_g"], p["l2_bn1_b"] = jnp.ones(in_channel // 2), jnp.zeros(in_channel // 2)
    p["l2_tw"] = w(ks[5], (in_channel // 2, in_channel // 4, k, k))
    # layer3
    p["l3_w"] = w(ks[6], (in_channel // 4, out_channel))
    return p


def prepare_params(params):
    """One-time weight preprocessing (outside the jitted forward):
      * 1x1-conv weights cast to bf16,
      * ConvTranspose weights rewritten as phase-major (9*Cin, 4*Cout) bf16
        matmul matrices,
      * layer3's 1x1 conv folded into layer2's ConvTranspose matrix and the
        folded matrix lane-padded to 128 columns (dense vst stores),
      * BN affine parameters kept in f32."""
    bf = lambda a: a.astype(jnp.bfloat16)
    prep = {
        "c1_w": bf(params["c1_w"]),
        "c1_bn1_g": params["c1_bn1_g"], "c1_bn1_b": params["c1_bn1_b"],
        "c1_twm": bf(_convt_phase_weight(params["c1_tw"])),
        "c1_bn2_g": params["c1_bn2_g"], "c1_bn2_b": params["c1_bn2_b"],
        "l1_w": bf(params["l1_w"]),
        "l1_bn1_g": params["l1_bn1_g"], "l1_bn1_b": params["l1_bn1_b"],
        "l1_twm": bf(_convt_phase_weight(params["l1_tw"])),
        "l1_bn2_g": params["l1_bn2_g"], "l1_bn2_b": params["l1_bn2_b"],
        "l2_w": bf(params["l2_w"]),
        "l2_bn1_g": params["l2_bn1_g"], "l2_bn1_b": params["l2_bn1_b"],
        "l3_w": params["l3_w"],   # kept only for its (static) output width
    }
    Cin, Cmid = params["l2_tw"].shape[0], params["l2_tw"].shape[1]
    out_ch = params["l3_w"].shape[1]
    w_phase = _convt_phase_weight(params["l2_tw"]).reshape(9 * Cin, 4, Cmid)
    w_fold = jnp.einsum("kpc,co->kpo", w_phase,
                        params["l3_w"]).reshape(9 * Cin, 4 * out_ch)
    pad_cols = _round_up(4 * out_ch, 128) - 4 * out_ch
    prep["l2l3_wm"] = bf(jnp.pad(w_fold, ((0, 0), (0, pad_cols))))
    return prep


def decoder_forward(params, x_nchw, thetas, all_pos, all_features, noise_key):
    del all_pos  # unused by the reference forward
    B, C0, H, W = x_nchw.shape
    out_ch = params["l3_w"].shape[1]

    # Warps are independent of the decoder path until their concat; compute
    # them up front so XLA can overlap them with the Pallas matmul calls.
    rep1 = _warp_features(all_features[1], thetas)
    rep2 = _warp_features(all_features[0], thetas)

    # Flat bf16 NHWC end-to-end; noise (torch.randn replacement) drawn directly
    # in that layout (deterministic, statistically equivalent).
    x_nhwc = jnp.transpose(x_nchw, (0, 2, 3, 1))
    noise = jax.random.normal(noise_key, x_nhwc.shape, jnp.float32)
    x_flat = jnp.concatenate([x_nhwc, noise], axis=-1)
    x_flat = x_flat.reshape(B * H * W, 2 * C0).astype(jnp.bfloat16)

    # ---- conv1: 1x1 conv -> BN -> ReLU -> ConvT(4,s2,p1) -> BN -> ReLU ----
    a = _conv1x1_bn_relu(x_flat, params["c1_w"],
                         params["c1_bn1_g"], params["c1_bn1_b"])
    out, nhw = _convt_bn_relu(a, (B, H, W), params["c1_twm"],
                              params["c1_bn2_g"], params["c1_bn2_b"])

    # ---- skip 1 (channel concat in flat layout) + layer1 ----
    a = _conv1x1_bn_relu(jnp.concatenate([out, rep1], axis=-1),
                         params["l1_w"], params["l1_bn1_g"], params["l1_bn1_b"])
    out, nhw = _convt_bn_relu(a, nhw, params["l1_twm"],
                              params["l1_bn2_g"], params["l1_bn2_b"])

    # ---- skip 2 + layer2 (ConvT w/o BN/ReLU) + layer3 (1x1 + sigmoid, folded) ----
    a = _conv1x1_bn_relu(jnp.concatenate([out, rep2], axis=-1),
                         params["l2_w"], params["l2_bn1_g"], params["l2_bn1_b"])
    out, nhw = _convt_conv1x1_sigmoid(a, nhw, params["l2l3_wm"], out_ch)

    N, Ho, Wo = nhw
    out = out.reshape(N, Ho, Wo, out_ch)
    # Final NCHW transpose runs at bf16 width; upcast to f32 fuses with it.
    return jnp.transpose(out, (0, 3, 1, 2)).astype(jnp.float32)


# --------------------------------- main ------------------------------------ #

if __name__ == "__main__":
    key = jax.random.PRNGKey(0)
    k_param, k_x, k_theta, k_f1, k_f0, k_noise = jax.random.split(key, 6)

    B, IN_CH, OUT_CH, H, W = 2, 8, 3, 8, 8
    params = init_params(k_param, IN_CH, OUT_CH)
    prepared = prepare_params(params)   # one-time weight preprocessing

    x = jax.random.normal(k_x, (B, IN_CH, H, W), jnp.float32)
    id_theta = jnp.array([[1.0, 0.0, 0.0], [0.0, 1.0, 0.0]], jnp.float32)
    thetas = id_theta[None] + 0.05 * jax.random.normal(k_theta, (B, 2, 3), jnp.float32)
    # all_features[1] must match conv1 output (B, IN_CH, 2H, 2W);
    # all_features[0] must match layer1 output (B, IN_CH//4, 4H, 4W).
    feat0 = jax.random.normal(k_f0, (B, IN_CH // 4, 4 * H, 4 * W), jnp.float32)
    feat1 = jax.random.normal(k_f1, (B, IN_CH, 2 * H, 2 * W), jnp.float32)
    all_features = (feat0, feat1)
    all_pos = None  # unused

    fwd = jax.jit(decoder_forward)
    out = fwd(prepared, x, thetas, all_pos, all_features, k_noise)
    out = jax.block_until_ready(out)
    assert out.shape == (B, OUT_CH, 8 * H, 8 * W), out.shape
    assert bool(jnp.all(jnp.isfinite(out)))
    print("KERNEL_OK")
</pallas_src>

<mosaic_0001>
module attributes {stable_mosaic.version = 11 : i64} {
  func.func private @main(%arg0: i32) attributes {dimension_semantics = [#tpu.dimension_semantics<core_parallel>], iteration_bounds = array<i64: 2>, tpu.core_type = #tpu.core_type<sc_scalar_subcore>, window_params = []} {
    return
  }
}

module attributes {stable_mosaic.version = 11 : i64} {
  func.func private @main(%arg0: i32) attributes {dimension_semantics = [#tpu.dimension_semantics<core_parallel>], iteration_bounds = array<i64: 2>, tpu.core_type = #tpu.core_type<sc_scalar_subcore>, window_params = []} {
    return
  }
}

module attributes {stable_mosaic.version = 11 : i64} {
  func.func @_mm_stats_kernel(%arg0: i32, %arg1: i32, %arg2: memref<32x16xbf16, #tpu.memory_space<vmem>>, %arg3: memref<16x8xbf16, #tpu.memory_space<vmem>>, %arg4: memref<32x8xbf16, #tpu.memory_space<vmem>>, %arg5: memref<1x1x8xf32, #tpu.memory_space<vmem>>, %arg6: memref<1x1x8xf32, #tpu.memory_space<vmem>>) attributes {dimension_semantics = [#tpu.dimension_semantics<parallel>, #tpu.dimension_semantics<parallel>], iteration_bounds = array<i64: 4, 1>, scalar_prefetch = 0 : i64, scratch_operands = 0 : i64, tpu.core_type = #tpu.core_type<tc>, window_params = [{transform_indices = @transform_0, window_bounds = array<i64: 32, 16>}, {transform_indices = @transform_1, window_bounds = array<i64: 16, 8>}, {transform_indices = @transform_2, window_bounds = array<i64: 32, 8>}, {transform_indices = @transform_3, window_bounds = array<i64: 1, 1, 8>}, {transform_indices = @transform_4, window_bounds = array<i64: 1, 1, 8>}]} {
    %c0 = arith.constant 0 : index
    %c0_0 = arith.constant 0 : index
    %0 = vector.load %arg2[%c0, %c0_0] : memref<32x16xbf16, #tpu.memory_space<vmem>>, vector<32x16xbf16>
    %c0_1 = arith.constant 0 : index
    %c0_2 = arith.constant 0 : index
    %1 = vector.load %arg3[%c0_1, %c0_2] : memref<16x8xbf16, #tpu.memory_space<vmem>>, vector<16x8xbf16>
    %cst = arith.constant dense<0.000000e+00> : vector<32x8xf32>
    %2 = tpu.matmul %0, %1, %cst {dimension_numbers = #tpu.dot_dimension_numbers<[1], [0], [0], [1], [0, 0, 1, 1], [], []>} : vector<32x16xbf16>, vector<16x8xbf16>, vector<32x8xf32> -> vector<32x8xf32>
    %3 = arith.truncf %2 : vector<32x8xf32> to vector<32x8xbf16>
    %c0_3 = arith.constant 0 : index
    %c0_4 = arith.constant 0 : index
    %4 = vector.load %arg4[%c0_3, %c0_4] : memref<32x8xbf16, #tpu.memory_space<vmem>>, vector<32x8xbf16>
    tpu.vector_store %arg4[%c0_3, %c0_4], %3 {strides = array<i32>} : memref<32x8xbf16, #tpu.memory_space<vmem>>, vector<32x8xbf16>,
    %cst_5 = arith.constant dense<0.000000e+00> : vector<8xf32>
    %5 = vector.multi_reduction <add>, %2, %cst_5 [0] : vector<32x8xf32> to vector<8xf32>
    %6 = vector.shape_cast %5 : vector<8xf32> to vector<1x8xf32>
    %7 = vector.shape_cast %6 : vector<1x8xf32> to vector<1x1x8xf32>
    %c0_6 = arith.constant 0 : index
    %c0_7 = arith.constant 0 : index
    %c0_8 = arith.constant 0 : index
    %8 = vector.load %arg5[%c0_6, %c0_7, %c0_8] : memref<1x1x8xf32, #tpu.memory_space<vmem>>, vector<1x1x8xf32>
    tpu.vector_store %arg5[%c0_6, %c0_7, %c0_8], %7 {strides = array<i32>} : memref<1x1x8xf32, #tpu.memory_space<vmem>>, vector<1x1x8xf32>,
    %9 = arith.mulf %2, %2 : vector<32x8xf32>
    %cst_9 = arith.constant dense<0.000000e+00> : vector<8xf32>
    %10 = vector.multi_reduction <add>, %9, %cst_9 [0] : vector<32x8xf32> to vector<8xf32>
    %11 = vector.shape_cast %10 : vector<8xf32> to vector<1x8xf32>
    %12 = vector.shape_cast %11 : vector<1x8xf32> to vector<1x1x8xf32>
    %c0_10 = arith.constant 0 : index
    %c0_11 = arith.constant 0 : index
    %c0_12 = arith.constant 0 : index
    %13 = vector.load %arg6[%c0_10, %c0_11, %c0_12] : memref<1x1x8xf32, #tpu.memory_space<vmem>>, vector<1x1x8xf32>
    tpu.vector_store %arg6[%c0_10, %c0_11, %c0_12], %12 {strides = array<i32>} : memref<1x1x8xf32, #tpu.memory_space<vmem>>, vector<1x1x8xf32>,
    return
  }
  func.func @transform_0(%arg0: i32, %arg1: i32) -> (i32, i32) {
    %c0_i32 = arith.constant 0 : i32
    %c0_i32_0 = arith.constant 0 : i32
    return %arg0, %c0_i32 : i32, i32
  }
  func.func @transform_1(%arg0: i32, %arg1: i32) -> (i32, i32) {
    %c0_i32 = arith.constant 0 : i32
    %c0_i32_0 = arith.constant 0 : i32
    return %c0_i32, %arg1 : i32, i32
  }
  func.func @transform_2(%arg0: i32, %arg1: i32) -> (i32, i32) {
    %c0_i32 = arith.constant 0 : i32
    return %arg0, %arg1 : i32, i32
  }
  func.func @transform_3(%arg0: i32, %arg1: i32) -> (i32, i32, i32) {
    %c0_i32 = arith.constant 0 : i32
    %c0_i32_0 = arith.constant 0 : i32
    return %arg0, %c0_i32, %arg1 : i32, i32, i32
  }
  func.func @transform_4(%arg0: i32, %arg1: i32) -> (i32, i32, i32) {
    %c0_i32 = arith.constant 0 : i32
    %c0_i32_0 = arith.constant 0 : i32
    return %arg0, %c0_i32, %arg1 : i32, i32, i32
  }
}

module attributes {stable_mosaic.version = 11 : i64} {
  func.func @_mm_stats_kernel(%arg0: i32, %arg1: i32, %arg2: memref<32x72xbf16, #tpu.memory_space<vmem>>, %arg3: memref<72x32xbf16, #tpu.memory_space<vmem>>, %arg4: memref<32x32xbf16, #tpu.memory_space<vmem>>, %arg5: memref<1x1x32xf32, #tpu.memory_space<vmem>>, %arg6: memref<1x1x32xf32, #tpu.memory_space<vmem>>) attributes {dimension_semantics = [#tpu.dimension_semantics<parallel>, #tpu.dimension_semantics<parallel>], iteration_bounds = array<i64: 4, 1>, scalar_prefetch = 0 : i64, scratch_operands = 0 : i64, tpu.core_type = #tpu.core_type<tc>, window_params = [{transform_indices = @transform_0, window_bounds = array<i64: 32, 72>}, {transform_indices = @transform_1, window_bounds = array<i64: 72, 32>}, {transform_indices = @transform_2, window_bounds = array<i64: 32, 32>}, {transform_indices = @transform_3, window_bounds = array<i64: 1, 1, 32>}, {transform_indices = @transform_4, window_bounds = array<i64: 1, 1, 32>}]} {
    %c0 = arith.constant 0 : index
    %c0_0 = arith.constant 0 : index
    %0 = vector.load %arg2[%c0, %c0_0] : memref<32x72xbf16, #tpu.memory_space<vmem>>, vector<32x72xbf16>
    %c0_1 = arith.constant 0 : index
    %c0_2 = arith.constant 0 : index
    %1 = vector.load %arg3[%c0_1, %c0_2] : memref<72x32xbf16, #tpu.memory_space<vmem>>, vector<72x32xbf16>
    %cst = arith.constant dense<0.000000e+00> : vector<32x32xf32>
    %2 = tpu.matmul %0, %1, %cst {dimension_numbers = #tpu.dot_dimension_numbers<[1], [0], [0], [1], [0, 0, 1, 1], [], []>} : vector<32x72xbf16>, vector<72x32xbf16>, vector<32x32xf32> -> vector<32x32xf32>
    %3 = arith.truncf %2 : vector<32x32xf32> to vector<32x32xbf16>
    %c0_3 = arith.constant 0 : index
    %c0_4 = arith.constant 0 : index
    %4 = vector.load %arg4[%c0_3, %c0_4] : memref<32x32xbf16, #tpu.memory_space<vmem>>, vector<32x32xbf16>
    tpu.vector_store %arg4[%c0_3, %c0_4], %3 {strides = array<i32>} : memref<32x32xbf16, #tpu.memory_space<vmem>>, vector<32x32xbf16>,
    %cst_5 = arith.constant dense<0.000000e+00> : vector<32xf32>
    %5 = vector.multi_reduction <add>, %2, %cst_5 [0] : vector<32x32xf32> to vector<32xf32>
    %6 = vector.shape_cast %5 : vector<32xf32> to vector<1x32xf32>
    %7 = vector.shape_cast %6 : vector<1x32xf32> to vector<1x1x32xf32>
    %c0_6 = arith.constant 0 : index
    %c0_7 = arith.constant 0 : index
    %c0_8 = arith.constant 0 : index
    %8 = vector.load %arg5[%c0_6, %c0_7, %c0_8] : memref<1x1x32xf32, #tpu.memory_space<vmem>>, vector<1x1x32xf32>
    tpu.vector_store %arg5[%c0_6, %c0_7, %c0_8], %7 {strides = array<i32>} : memref<1x1x32xf32, #tpu.memory_space<vmem>>, vector<1x1x32xf32>,
    %9 = arith.mulf %2, %2 : vector<32x32xf32>
    %cst_9 = arith.constant dense<0.000000e+00> : vector<32xf32>
    %10 = vector.multi_reduction <add>, %9, %cst_9 [0] : vector<32x32xf32> to vector<32xf32>
    %11 = vector.shape_cast %10 : vector<32xf32> to vector<1x32xf32>
    %12 = vector.shape_cast %11 : vector<1x32xf32> to vector<1x1x32xf32>
    %c0_10 = arith.constant 0 : index
    %c0_11 = arith.constant 0 : index
    %c0_12 = arith.constant 0 : index
    %13 = vector.load %arg6[%c0_10, %c0_11, %c0_12] : memref<1x1x32xf32, #tpu.memory_space<vmem>>, vector<1x1x32xf32>
    tpu.vector_store %arg6[%c0_10, %c0_11, %c0_12], %12 {strides = array<i32>} : memref<1x1x32xf32, #tpu.memory_space<vmem>>, vector<1x1x32xf32>,
    return
  }
  func.func @transform_0(%arg0: i32, %arg1: i32) -> (i32, i32) {
    %c0_i32 = arith.constant 0 : i32
    %c0_i32_0 = arith.constant 0 : i32
    return %arg0, %c0_i32 : i32, i32
  }
  func.func @transform_1(%arg0: i32, %arg1: i32) -> (i32, i32) {
    %c0_i32 = arith.constant 0 : i32
    %c0_i32_0 = arith.constant 0 : i32
    return %c0_i32, %arg1 : i32, i32
  }
  func.func @transform_2(%arg0: i32, %arg1: i32) -> (i32, i32) {
    %c0_i32 = arith.constant 0 : i32
    return %arg0, %arg1 : i32, i32
  }
  func.func @transform_3(%arg0: i32, %arg1: i32) -> (i32, i32, i32) {
    %c0_i32 = arith.constant 0 : i32
    %c0_i32_0 = arith.constant 0 : i32
    return %arg0, %c0_i32, %arg1 : i32, i32, i32
  }
  func.func @transform_4(%arg0: i32, %arg1: i32) -> (i32, i32, i32) {
    %c0_i32 = arith.constant 0 : i32
    %c0_i32_0 = arith.constant 0 : i32
    return %arg0, %c0_i32, %arg1 : i32, i32, i32
  }
}

module attributes {stable_mosaic.version = 11 : i64} {
  func.func @_mm_stats_kernel(%arg0: i32, %arg1: i32, %arg2: memref<128x16xbf16, #tpu.memory_space<vmem>>, %arg3: memref<16x4xbf16, #tpu.memory_space<vmem>>, %arg4: memref<128x4xbf16, #tpu.memory_space<vmem>>, %arg5: memref<1x1x4xf32, #tpu.memory_space<vmem>>, %arg6: memref<1x1x4xf32, #tpu.memory_space<vmem>>) attributes {dimension_semantics = [#tpu.dimension_semantics<parallel>, #tpu.dimension_semantics<parallel>], iteration_bounds = array<i64: 4, 1>, scalar_prefetch = 0 : i64, scratch_operands = 0 : i64, tpu.core_type = #tpu.core_type<tc>, window_params = [{transform_indices = @transform_0, window_bounds = array<i64: 128, 16>}, {transform_indices = @transform_1, window_bounds = array<i64: 16, 4>}, {transform_indices = @transform_2, window_bounds = array<i64: 128, 4>}, {transform_indices = @transform_3, window_bounds = array<i64: 1, 1, 4>}, {transform_indices = @transform_4, window_bounds = array<i64: 1, 1, 4>}]} {
    %c0 = arith.constant 0 : index
    %c0_0 = arith.constant 0 : index
    %0 = vector.load %arg2[%c0, %c0_0] : memref<128x16xbf16, #tpu.memory_space<vmem>>, vector<128x16xbf16>
    %c0_1 = arith.constant 0 : index
    %c0_2 = arith.constant 0 : index
    %1 = vector.load %arg3[%c0_1, %c0_2] : memref<16x4xbf16, #tpu.memory_space<vmem>>, vector<16x4xbf16>
    %cst = arith.constant dense<0.000000e+00> : vector<128x4xf32>
    %2 = tpu.matmul %0, %1, %cst {dimension_numbers = #tpu.dot_dimension_numbers<[1], [0], [0], [1], [0, 0, 1, 1], [], []>} : vector<128x16xbf16>, vector<16x4xbf16>, vector<128x4xf32> -> vector<128x4xf32>
    %3 = arith.truncf %2 : vector<128x4xf32> to vector<128x4xbf16>
    %c0_3 = arith.constant 0 : index
    %c0_4 = arith.constant 0 : index
    %4 = vector.load %arg4[%c0_3, %c0_4] : memref<128x4xbf16, #tpu.memory_space<vmem>>, vector<128x4xbf16>
    tpu.vector_store %arg4[%c0_3, %c0_4], %3 {strides = array<i32>} : memref<128x4xbf16, #tpu.memory_space<vmem>>, vector<128x4xbf16>,
    %cst_5 = arith.constant dense<0.000000e+00> : vector<4xf32>
    %5 = vector.multi_reduction <add>, %2, %cst_5 [0] : vector<128x4xf32> to vector<4xf32>
    %6 = vector.shape_cast %5 : vector<4xf32> to vector<1x4xf32>
    %7 = vector.shape_cast %6 : vector<1x4xf32> to vector<1x1x4xf32>
    %c0_6 = arith.constant 0 : index
    %c0_7 = arith.constant 0 : index
    %c0_8 = arith.constant 0 : index
    %8 = vector.load %arg5[%c0_6, %c0_7, %c0_8] : memref<1x1x4xf32, #tpu.memory_space<vmem>>, vector<1x1x4xf32>
    tpu.vector_store %arg5[%c0_6, %c0_7, %c0_8], %7 {strides = array<i32>} : memref<1x1x4xf32, #tpu.memory_space<vmem>>, vector<1x1x4xf32>,
    %9 = arith.mulf %2, %2 : vector<128x4xf32>
    %cst_9 = arith.constant dense<0.000000e+00> : vector<4xf32>
    %10 = vector.multi_reduction <add>, %9, %cst_9 [0] : vector<128x4xf32> to vector<4xf32>
    %11 = vector.shape_cast %10 : vector<4xf32> to vector<1x4xf32>
    %12 = vector.shape_cast %11 : vector<1x4xf32> to vector<1x1x4xf32>
    %c0_10 = arith.constant 0 : index
    %c0_11 = arith.constant 0 : index
    %c0_12 = arith.constant 0 : index
    %13 = vector.load %arg6[%c0_10, %c0_11, %c0_12] : memref<1x1x4xf32, #tpu.memory_space<vmem>>, vector<1x1x4xf32>
    tpu.vector_store %arg6[%c0_10, %c0_11, %c0_12], %12 {strides = array<i32>} : memref<1x1x4xf32, #tpu.memory_space<vmem>>, vector<1x1x4xf32>,
    return
  }
  func.func @transform_0(%arg0: i32, %arg1: i32) -> (i32, i32) {
    %c0_i32 = arith.constant 0 : i32
    %c0_i32_0 = arith.constant 0 : i32
    return %arg0, %c0_i32 : i32, i32
  }
  func.func @transform_1(%arg0: i32, %arg1: i32) -> (i32, i32) {
    %c0_i32 = arith.constant 0 : i32
    %c0_i32_0 = arith.constant 0 : i32
    return %c0_i32, %arg1 : i32, i32
  }
  func.func @transform_2(%arg0: i32, %arg1: i32) -> (i32, i32) {
    %c0_i32 = arith.constant 0 : i32
    return %arg0, %arg1 : i32, i32
  }
  func.func @transform_3(%arg0: i32, %arg1: i32) -> (i32, i32, i32) {
    %c0_i32 = arith.constant 0 : i32
    %c0_i32_0 = arith.constant 0 : i32
    return %arg0, %c0_i32, %arg1 : i32, i32, i32
  }
  func.func @transform_4(%arg0: i32, %arg1: i32) -> (i32, i32, i32) {
    %c0_i32 = arith.constant 0 : i32
    %c0_i32_0 = arith.constant 0 : i32
    return %arg0, %c0_i32, %arg1 : i32, i32, i32
  }
}

module attributes {stable_mosaic.version = 11 : i64} {
  func.func @_mm_stats_kernel(%arg0: i32, %arg1: i32, %arg2: memref<128x36xbf16, #tpu.memory_space<vmem>>, %arg3: memref<36x8xbf16, #tpu.memory_space<vmem>>, %arg4: memref<128x8xbf16, #tpu.memory_space<vmem>>, %arg5: memref<1x1x8xf32, #tpu.memory_space<vmem>>, %arg6: memref<1x1x8xf32, #tpu.memory_space<vmem>>) attributes {dimension_semantics = [#tpu.dimension_semantics<parallel>, #tpu.dimension_semantics<parallel>], iteration_bounds = array<i64: 4, 1>, scalar_prefetch = 0 : i64, scratch_operands = 0 : i64, tpu.core_type = #tpu.core_type<tc>, window_params = [{transform_indices = @transform_0, window_bounds = array<i64: 128, 36>}, {transform_indices = @transform_1, window_bounds = array<i64: 36, 8>}, {transform_indices = @transform_2, window_bounds = array<i64: 128, 8>}, {transform_indices = @transform_3, window_bounds = array<i64: 1, 1, 8>}, {transform_indices = @transform_4, window_bounds = array<i64: 1, 1, 8>}]} {
    %c0 = arith.constant 0 : index
    %c0_0 = arith.constant 0 : index
    %0 = vector.load %arg2[%c0, %c0_0] : memref<128x36xbf16, #tpu.memory_space<vmem>>, vector<128x36xbf16>
    %c0_1 = arith.constant 0 : index
    %c0_2 = arith.constant 0 : index
    %1 = vector.load %arg3[%c0_1, %c0_2] : memref<36x8xbf16, #tpu.memory_space<vmem>>, vector<36x8xbf16>
    %cst = arith.constant dense<0.000000e+00> : vector<128x8xf32>
    %2 = tpu.matmul %0, %1, %cst {dimension_numbers = #tpu.dot_dimension_numbers<[1], [0], [0], [1], [0, 0, 1, 1], [], []>} : vector<128x36xbf16>, vector<36x8xbf16>, vector<128x8xf32> -> vector<128x8xf32>
    %3 = arith.truncf %2 : vector<128x8xf32> to vector<128x8xbf16>
    %c0_3 = arith.constant 0 : index
    %c0_4 = arith.constant 0 : index
    %4 = vector.load %arg4[%c0_3, %c0_4] : memref<128x8xbf16, #tpu.memory_space<vmem>>, vector<128x8xbf16>
    tpu.vector_store %arg4[%c0_3, %c0_4], %3 {strides = array<i32>} : memref<128x8xbf16, #tpu.memory_space<vmem>>, vector<128x8xbf16>,
    %cst_5 = arith.constant dense<0.000000e+00> : vector<8xf32>
    %5 = vector.multi_reduction <add>, %2, %cst_5 [0] : vector<128x8xf32> to vector<8xf32>
    %6 = vector.shape_cast %5 : vector<8xf32> to vector<1x8xf32>
    %7 = vector.shape_cast %6 : vector<1x8xf32> to vector<1x1x8xf32>
    %c0_6 = arith.constant 0 : index
    %c0_7 = arith.constant 0 : index
    %c0_8 = arith.constant 0 : index
    %8 = vector.load %arg5[%c0_6, %c0_7, %c0_8] : memref<1x1x8xf32, #tpu.memory_space<vmem>>, vector<1x1x8xf32>
    tpu.vector_store %arg5[%c0_6, %c0_7, %c0_8], %7 {strides = array<i32>} : memref<1x1x8xf32, #tpu.memory_space<vmem>>, vector<1x1x8xf32>,
    %9 = arith.mulf %2, %2 : vector<128x8xf32>
    %cst_9 = arith.constant dense<0.000000e+00> : vector<8xf32>
    %10 = vector.multi_reduction <add>, %9, %cst_9 [0] : vector<128x8xf32> to vector<8xf32>
    %11 = vector.shape_cast %10 : vector<8xf32> to vector<1x8xf32>
    %12 = vector.shape_cast %11 : vector<1x8xf32> to vector<1x1x8xf32>
    %c0_10 = arith.constant 0 : index
    %c0_11 = arith.constant 0 : index
    %c0_12 = arith.constant 0 : index
    %13 = vector.load %arg6[%c0_10, %c0_11, %c0_12] : memref<1x1x8xf32, #tpu.memory_space<vmem>>, vector<1x1x8xf32>
    tpu.vector_store %arg6[%c0_10, %c0_11, %c0_12], %12 {strides = array<i32>} : memref<1x1x8xf32, #tpu.memory_space<vmem>>, vector<1x1x8xf32>,
    return
  }
  func.func @transform_0(%arg0: i32, %arg1: i32) -> (i32, i32) {
    %c0_i32 = arith.constant 0 : i32
    %c0_i32_0 = arith.constant 0 : i32
    return %arg0, %c0_i32 : i32, i32
  }
  func.func @transform_1(%arg0: i32, %arg1: i32) -> (i32, i32) {
    %c0_i32 = arith.constant 0 : i32
    %c0_i32_0 = arith.constant 0 : i32
    return %c0_i32, %arg1 : i32, i32
  }
  func.func @transform_2(%arg0: i32, %arg1: i32) -> (i32, i32) {
    %c0_i32 = arith.constant 0 : i32
    return %arg0, %arg1 : i32, i32
  }
  func.func @transform_3(%arg0: i32, %arg1: i32) -> (i32, i32, i32) {
    %c0_i32 = arith.constant 0 : i32
    %c0_i32_0 = arith.constant 0 : i32
    return %arg0, %c0_i32, %arg1 : i32, i32, i32
  }
  func.func @transform_4(%arg0: i32, %arg1: i32) -> (i32, i32, i32) {
    %c0_i32 = arith.constant 0 : i32
    %c0_i32_0 = arith.constant 0 : i32
    return %arg0, %c0_i32, %arg1 : i32, i32, i32
  }
}

module attributes {stable_mosaic.version = 11 : i64} {
  func.func @_mm_stats_kernel(%arg0: i32, %arg1: i32, %arg2: memref<512x4xbf16, #tpu.memory_space<vmem>>, %arg3: memref<4x4xbf16, #tpu.memory_space<vmem>>, %arg4: memref<512x4xbf16, #tpu.memory_space<vmem>>, %arg5: memref<1x1x4xf32, #tpu.memory_space<vmem>>, %arg6: memref<1x1x4xf32, #tpu.memory_space<vmem>>) attributes {dimension_semantics = [#tpu.dimension_semantics<parallel>, #tpu.dimension_semantics<parallel>], iteration_bounds = array<i64: 4, 1>, scalar_prefetch = 0 : i64, scratch_operands = 0 : i64, tpu.core_type = #tpu.core_type<tc>, window_params = [{transform_indices = @transform_0, window_bounds = array<i64: 512, 4>}, {transform_indices = @transform_1, window_bounds = array<i64: 4, 4>}, {transform_indices = @transform_2, window_bounds = array<i64: 512, 4>}, {transform_indices = @transform_3, window_bounds = array<i64: 1, 1, 4>}, {transform_indices = @transform_4, window_bounds = array<i64: 1, 1, 4>}]} {
    %c0 = arith.constant 0 : index
    %c0_0 = arith.constant 0 : index
    %0 = vector.load %arg2[%c0, %c0_0] : memref<512x4xbf16, #tpu.memory_space<vmem>>, vector<512x4xbf16>
    %c0_1 = arith.constant 0 : index
    %c0_2 = arith.constant 0 : index
    %1 = vector.load %arg3[%c0_1, %c0_2] : memref<4x4xbf16, #tpu.memory_space<vmem>>, vector<4x4xbf16>
    %cst = arith.constant dense<0.000000e+00> : vector<512x4xf32>
    %2 = tpu.matmul %0, %1, %cst {dimension_numbers = #tpu.dot_dimension_numbers<[1], [0], [0], [1], [0, 0, 1, 1], [], []>} : vector<512x4xbf16>, vector<4x4xbf16>, vector<512x4xf32> -> vector<512x4xf32>
    %3 = arith.truncf %2 : vector<512x4xf32> to vector<512x4xbf16>
    %c0_3 = arith.constant 0 : index
    %c0_4 = arith.constant 0 : index
    %4 = vector.load %arg4[%c0_3, %c0_4] : memref<512x4xbf16, #tpu.memory_space<vmem>>, vector<512x4xbf16>
    tpu.vector_store %arg4[%c0_3, %c0_4], %3 {strides = array<i32>} : memref<512x4xbf16, #tpu.memory_space<vmem>>, vector<512x4xbf16>,
    %cst_5 = arith.constant dense<0.000000e+00> : vector<4xf32>
    %5 = vector.multi_reduction <add>, %2, %cst_5 [0] : vector<512x4xf32> to vector<4xf32>
    %6 = vector.shape_cast %5 : vector<4xf32> to vector<1x4xf32>
    %7 = vector.shape_cast %6 : vector<1x4xf32> to vector<1x1x4xf32>
    %c0_6 = arith.constant 0 : index
    %c0_7 = arith.constant 0 : index
    %c0_8 = arith.constant 0 : index
    %8 = vector.load %arg5[%c0_6, %c0_7, %c0_8] : memref<1x1x4xf32, #tpu.memory_space<vmem>>, vector<1x1x4xf32>
    tpu.vector_store %arg5[%c0_6, %c0_7, %c0_8], %7 {strides = array<i32>} : memref<1x1x4xf32, #tpu.memory_space<vmem>>, vector<1x1x4xf32>,
    %9 = arith.mulf %2, %2 : vector<512x4xf32>
    %cst_9 = arith.constant dense<0.000000e+00> : vector<4xf32>
    %10 = vector.multi_reduction <add>, %9, %cst_9 [0] : vector<512x4xf32> to vector<4xf32>
    %11 = vector.shape_cast %10 : vector<4xf32> to vector<1x4xf32>
    %12 = vector.shape_cast %11 : vector<1x4xf32> to vector<1x1x4xf32>
    %c0_10 = arith.constant 0 : index
    %c0_11 = arith.constant 0 : index
    %c0_12 = arith.constant 0 : index
    %13 = vector.load %arg6[%c0_10, %c0_11, %c0_12] : memref<1x1x4xf32, #tpu.memory_space<vmem>>, vector<1x1x4xf32>
    tpu.vector_store %arg6[%c0_10, %c0_11, %c0_12], %12 {strides = array<i32>} : memref<1x1x4xf32, #tpu.memory_space<vmem>>, vector<1x1x4xf32>,
    return
  }
  func.func @transform_0(%arg0: i32, %arg1: i32) -> (i32, i32) {
    %c0_i32 = arith.constant 0 : i32
    %c0_i32_0 = arith.constant 0 : i32
    return %arg0, %c0_i32 : i32, i32
  }
  func.func @transform_1(%arg0: i32, %arg1: i32) -> (i32, i32) {
    %c0_i32 = arith.constant 0 : i32
    %c0_i32_0 = arith.constant 0 : i32
    return %c0_i32, %arg1 : i32, i32
  }
  func.func @transform_2(%arg0: i32, %arg1: i32) -> (i32, i32) {
    %c0_i32 = arith.constant 0 : i32
    return %arg0, %arg1 : i32, i32
  }
  func.func @transform_3(%arg0: i32, %arg1: i32) -> (i32, i32, i32) {
    %c0_i32 = arith.constant 0 : i32
    %c0_i32_0 = arith.constant 0 : i32
    return %arg0, %c0_i32, %arg1 : i32, i32, i32
  }
  func.func @transform_4(%arg0: i32, %arg1: i32) -> (i32, i32, i32) {
    %c0_i32 = arith.constant 0 : i32
    %c0_i32_0 = arith.constant 0 : i32
    return %arg0, %c0_i32, %arg1 : i32, i32, i32
  }
}

module attributes {stable_mosaic.version = 11 : i64} {
  func.func @_mm_act_kernel(%arg0: i32, %arg1: i32, %arg2: memref<512x36xbf16, #tpu.memory_space<vmem>>, %arg3: memref<36x128xbf16, #tpu.memory_space<vmem>>, %arg4: memref<512x128xbf16, #tpu.memory_space<vmem>>) attributes {dimension_semantics = [#tpu.dimension_semantics<parallel>, #tpu.dimension_semantics<parallel>], iteration_bounds = array<i64: 4, 1>, scalar_prefetch = 0 : i64, scratch_operands = 0 : i64, tpu.core_type = #tpu.core_type<tc>, window_params = [{transform_indices = @transform_0, window_bounds = array<i64: 512, 36>}, {transform_indices = @transform_1, window_bounds = array<i64: 36, 128>}, {transform_indices = @transform_2, window_bounds = array<i64: 512, 128>}]} {
    %c0 = arith.constant 0 : index
    %c0_0 = arith.constant 0 : index
    %0 = vector.load %arg2[%c0, %c0_0] : memref<512x36xbf16, #tpu.memory_space<vmem>>, vector<512x36xbf16>
    %c0_1 = arith.constant 0 : index
    %c0_2 = arith.constant 0 : index
    %1 = vector.load %arg3[%c0_1, %c0_2] : memref<36x128xbf16, #tpu.memory_space<vmem>>, vector<36x128xbf16>
    %cst = arith.constant dense<0.000000e+00> : vector<512x128xf32>
    %2 = tpu.matmul %0, %1, %cst {dimension_numbers = #tpu.dot_dimension_numbers<[1], [0], [0], [1], [0, 0, 1, 1], [], []>} : vector<512x36xbf16>, vector<36x128xbf16>, vector<512x128xf32> -> vector<512x128xf32>
    %3 = arith.negf %2 : vector<512x128xf32>
    %4 = math.exp %3 : vector<512x128xf32>
    %cst_3 = arith.constant 1.000000e+00 : f32
    %5 = vector.broadcast %cst_3 : f32 to vector<512x128xf32>
    %6 = arith.addf %5, %4 : vector<512x128xf32>
    %7 = arith.divf %5, %6 : vector<512x128xf32>
    %8 = arith.truncf %7 : vector<512x128xf32> to vector<512x128xbf16>
    %c0_4 = arith.constant 0 : index
    %c0_5 = arith.constant 0 : index
    %9 = vector.load %arg4[%c0_4, %c0_5] : memref<512x128xbf16, #tpu.memory_space<vmem>>, vector<512x128xbf16>
    tpu.vector_store %arg4[%c0_4, %c0_5], %8 {strides = array<i32>} : memref<512x128xbf16, #tpu.memory_space<vmem>>, vector<512x128xbf16>,
    return
  }
  func.func @transform_0(%arg0: i32, %arg1: i32) -> (i32, i32) {
    %c0_i32 = arith.constant 0 : i32
    %c0_i32_0 = arith.constant 0 : i32
    return %arg0, %c0_i32 : i32, i32
  }
  func.func @transform_1(%arg0: i32, %arg1: i32) -> (i32, i32) {
    %c0_i32 = arith.constant 0 : i32
    %c0_i32_0 = arith.constant 0 : i32
    return %c0_i32, %arg1 : i32, i32
  }
  func.func @transform_2(%arg0: i32, %arg1: i32) -> (i32, i32) {
    %c0_i32 = arith.constant 0 : i32
    return %arg0, %arg1 : i32, i32
  }
}

</mosaic_0001>

<bundles_post_ra>
// kernel: decoder_forward.6
= control target key start
LH: loop header
LB: loop body
LE: loop exit
PB: predicated region body
PF: predicated region fallthrough
CT: control target
= control target key end

     0   :  { %s675_s15 = smov 0   ;;  %s677_s16 = smov 0   ;;  %s734_s0 = inlined_call_operand.vmem [shape: bf16[128,16], index: 0, kind: input, shape index: {}]   ;;  %s735_s1 = inlined_call_operand.vmem [shape: bf16[16,8], index: 1, kind: input, shape index: {}]   ;;  %s736_s2 = inlined_call_operand.vmem [shape: bf16[128,8], index: 2, kind: output, shape index: {0}]   ;;  %s737_s3 = inlined_call_operand.vmem [shape: f32[4,1,8], index: 3, kind: output, shape index: {1}]   ;;  %s738_s4 = inlined_call_operand.vmem [shape: f32[4,1,8], index: 4, kind: output, shape index: {2}]  }
   0x1   :  { %s679_s17 = smov 0  }
   0x2 LB: > { %s27_s18 = sadd.s32 1, %s644_s16  ;;  %p570_p0 = scmp.ge.s32.totalorder %s648_s17, 1  ;;  %s648_s17 = sphi %s679_s17, %s15_s17   ;;  %s644_s16 = sphi %s677_s16, %s740_s16   ;;  %s640_s15 = sphi %s675_s15, %s739_s15  }
   0x3   : > { %p29_p1 = scmp.ge.s32.totalorder %s27_s18, 4  ;;  %p195_p2 = scmp.lt.s32.totalorder %s648_s17, 5 }
   0x5   : > { %s742_s18 = smov (%p29_p1, %s27_s18), 0  ;;  %p196_p3 = pnand %p570_p0, %p195_p2 }
   0x6   : > { %v623_v0 = vld [vmem:[%s735_s1] sm:$0xff] (!%p196_p3)   ;;  %s571_s21 = sshll.u32 (!%p196_p3), %s640_s15, 2  ;;  %vm294_vm0 = vcmask (!%p196_p3), 130048   ;;  %vm366_vm1 = vcmask (!%p196_p3), 60416   ;;  %vm371_vm2 = vcmask (!%p196_p3), 64512   ;;  %p259_p5 = scmp.lt.s32.totalorder (!%p196_p3), %s640_s15, 3 }
   0x7   : > { %199 = sbr.rel (%p196_p3) target bundleno = 256 (0x100), region = 28  ;;  %p241_p4 = scmp.lt.s32.totalorder (!%p196_p3), %s571_s21, 15  ;;  %593 = vmatprep.subr.bf16.mxu0 (!%p196_p3), %v623_v0  ;;  %vm385_vm3 = vcmask (!%p196_p3), 57344  }
   0x8   : > { %594 = vmatpush3.bf16.msra.mxu0 (!%p196_p3), %v623_v0 }
   0xe   : > { %s744_s21 = smov (!%p241_p4, %s571_s21), 15  ;;  %s746_s15 = smov (!%p259_p5, %s640_s15), 3 }
   0xf   : > { %s572_s22 = sshll.u32 %s744_s21, 2  ;;  %s264_s5 = scalar_lea.vmem %s737_s3, %s746_s15 }
  0x10   : > { %s244_s25 = scalar_lea.vmem %s734_s0, %s572_s22  ;;  %s257_s28 = scalar_lea.vmem %s736_s2, %s572_s22 }
  0x11   : > { %v624_v1 = vld [vmem:[%s244_s25] sm:$0xff]   ;;  %v625_v2 = vld [vmem:[%s244_s25 + $0x8] sm:$0xff]   ;;  %s270_s8 = scalar_lea.vmem %s738_s4, %s746_s15 }
  0x12   : > { %595 = vmatprep.mubr.msk.bf16.mxu0 %vm294_vm0, %v624_v1 }
  0x13   : > { %596 = vmatmul.mubr.msk.bf16.vlgmr.msra.gmra.mrb[0].mxu0 %vm294_vm0, %v625_v2 }
  0xe6   : > { %v597_v3 = vpop.f32.mrb[0].mxu0 }
  0xe7   : > { %v588_v4 = vpack.c.bf16 %v597_v3, %v597_v3  ;;  %v335_v5 = vpop.f32.mrb[1].mxu0  ;;  %v389_v9 = vmul.f32 %v597_v3, %v597_v3  ;;  %v375_v17 = vsel %vm371_vm2, %v597_v3, 0.0 }
  0xe8   : > { %v586_v6 = vpack.c.bf16 %v335_v5, %v335_v5  ;;  %v387_v7 = vmul.f32 %v335_v5, %v335_v5  ;;  %v598_v8 = vpop.f32.mrb[2].mxu0  ;;  %v372_v12 = vsel %vm371_vm2, %v335_v5, 0.0 }
  0xe9   : > { %369 = vst.msk [vmem:[%s257_s28 + $0x8] sm:$0xf] %vm366_vm1, %v588_v4  ;;  %v589_v10 = vpack.c.bf16 %v598_v8, %v598_v8  ;;  %v338_v11 = vpop.f32.mrb[3].mxu0  ;;  %v390_v19 = vmul.f32 %v598_v8, %v598_v8  ;;  %v394_v23 = vsel %vm371_vm2, %v389_v9, 0.0  ;;  %v377_v24 = vsel %vm371_vm2, %v598_v8, 0.0 }
  0xea   : > { %367 = vst.msk [vmem:[%s257_s28] sm:$0xf] %vm366_vm1, %v586_v6  ;;  %v587_v13 = vpack.c.bf16 %v338_v11, %v338_v11  ;;  %v373_v14 = vsel %vm371_vm2, %v338_v11, 0.0  ;;  %v388_v15 = vmul.f32 %v338_v11, %v338_v11  ;;  %v391_v18 = vsel %vm371_vm2, %v387_v7, 0.0 }
  0xeb   : > { %370 = vst.msk [vmem:[%s257_s28 + $0xc] sm:$0xf] %vm366_vm1, %v589_v10  ;;  %v374_v16 = vadd.f32 %v373_v14, %v372_v12  ;;  %v396_v27 = vsel %vm371_vm2, %v390_v19, 0.0 }
  0xec   : > { %368 = vst.msk [vmem:[%s257_s28 + $0x4] sm:$0xf] %vm366_vm1, %v587_v13  ;;  %v392_v20 = vsel %vm371_vm2, %v388_v15, 0.0 }
  0xed   : > { %v376_v21 = vadd.f32 %v375_v17, %v374_v16  ;;  %v393_v22 = vadd.f32 %v392_v20, %v391_v18 }
  0xef   : > { %v378_v25 = vadd.f32 %v377_v24, %v376_v21  ;;  %v395_v26 = vadd.f32 %v394_v23, %v393_v22 }
  0xf1   : > { %v379_v28 = vrot.slane %v378_v25, 4  ;;  %v397_v29 = vadd.f32 %v396_v27, %v395_v26 }
  0xf3   : > { %v380_v30 = vadd.f32 %v379_v28, %v378_v25  ;;  %v398_v31 = vrot.slane %v397_v29, 4 }
  0xf5   : > { %v381_v32 = vrot.slane %v380_v30, 2  ;;  %v399_v33 = vadd.f32 %v398_v31, %v397_v29 }
  0xf7   : > { %v382_v34 = vadd.f32 %v381_v32, %v380_v30  ;;  %v400_v35 = vrot.slane %v399_v33, 2 }
  0xf9   : > { %v383_v36 = vrot.slane %v382_v34, 1  ;;  %v401_v37 = vadd.f32 %v400_v35, %v399_v33 }
  0xfb   : > { %v384_v38 = vadd.f32 %v383_v36, %v382_v34  ;;  %v402_v39 = vrot.slane %v401_v37, 1 }
  0xfd   : > { %386 = vst.msk [vmem:[%s264_s5] sm:$0x1] %vm385_vm3, %v384_v38  ;;  %v403_v40 = vadd.f32 %v402_v39, %v401_v37 }
  0xff   : > { %404 = vst.msk [vmem:[%s270_s8] sm:$0x1] %vm385_vm3, %v403_v40 }
 0x100 PF: > { %s15_s17 = sadd.s32 1, %s648_s17   ;;  %s739_s15 = smov %s644_s16 }
 0x101   : > { %p12_p6 = scmp.ge.s32.totalorder %s15_s17, 6   ;;  %s740_s16 = smov %s742_s18 }
 0x103   :  { %14 = sbr.rel (!%p12_p6) target bundleno = 2 (0x2), region = 85 }

// kernel: tile.28
= control target key start
LH: loop header
LB: loop body
LE: loop exit
PB: predicated region body
PF: predicated region fallthrough
CT: control target
= control target key end

     0   :  { %s22_s0 = inlined_call_operand.vmem [shape: f32[8], index: 0, kind: input, shape index: {}]   ;;  %s23_s1 = inlined_call_operand.vmem [shape: f32[4,8], index: 1, kind: output, shape index: {}]  }
   0x1   :  { %v4_v0 = vld [vmem:[%s22_s0] ss:$0 sm:$0xff] }
   0x2   :  { %5 = vst [vmem:[%s23_s1] sm:$0xf] %v4_v0 }

// kernel: decoder_forward.7
= control target key start
LH: loop header
LB: loop body
LE: loop exit
PB: predicated region body
PF: predicated region fallthrough
CT: control target
= control target key end

     0   :  { %s728_s15 = smov 0   ;;  %s730_s16 = smov 0   ;;  %s799_s0 = inlined_call_operand.vmem [shape: bf16[128,72], index: 0, kind: input, shape index: {}]   ;;  %s800_s1 = inlined_call_operand.vmem [shape: bf16[72,32], index: 1, kind: input, shape index: {}]   ;;  %s801_s2 = inlined_call_operand.vmem [shape: bf16[128,32], index: 2, kind: output, shape index: {0}]   ;;  %s802_s3 = inlined_call_operand.vmem [shape: f32[4,1,32], index: 3, kind: output, shape index: {1}]   ;;  %s803_s4 = inlined_call_operand.vmem [shape: f32[4,1,32], index: 4, kind: output, shape index: {2}]  }
   0x1   :  { %s732_s17 = smov 0  }
   0x2 LB: > { %s27_s18 = sadd.s32 1, %s697_s16  ;;  %p602_p0 = scmp.ge.s32.totalorder %s701_s17, 1  ;;  %s701_s17 = sphi %s732_s17, %s15_s17   ;;  %s697_s16 = sphi %s730_s16, %s805_s16   ;;  %s693_s15 = sphi %s728_s15, %s804_s15  }
   0x3   : > { %p29_p1 = scmp.ge.s32.totalorder %s27_s18, 4  ;;  %p195_p2 = scmp.lt.s32.totalorder %s701_s17, 5 }
   0x5   : > { %s807_s18 = smov (%p29_p1, %s27_s18), 0  ;;  %p196_p3 = pnand %p602_p0, %p195_p2 }
   0x6   : > { %v672_v0 = vld [vmem:[%s800_s1] sm:$0xff] (!%p196_p3)   ;;  %v673_v1 = vld [vmem:[%s800_s1 + $0x8] sm:$0xff] (!%p196_p3)   ;;  %s603_s23 = sshll.u32 (!%p196_p3), %s693_s15, 2  ;;  %v674_v2 = vld [vmem:[%s800_s1 + $0x10] sm:$0xff] (!%p196_p3)   ;;  %vm322_vm0 = vcmask (!%p196_p3), 588800   ;;  %vm329_vm1 = vcmask (!%p196_p3), 1043456  }
   0x7   : > { %199 = sbr.rel (%p196_p3) target bundleno = 264 (0x108), region = 28  ;;  %633 = vmatprep.subr.bf16.mxu0 (!%p196_p3), %v672_v0  ;;  %p241_p4 = scmp.lt.s32.totalorder (!%p196_p3), %s603_s23, 15  ;;  %v675_v3 = vld [vmem:[%s800_s1 + $0x18] sm:$0xff] (!%p196_p3)   ;;  %v676_v5 = vld [vmem:[%s800_s1 + $0x20] ss:$0 sps:$4 sm:$0xff] (!%p196_p3)   ;;  %vm398_vm2 = vcmask (!%p196_p3), 257024  }
   0x8   : > { %634 = vmatpush3.bf16.msra.mxu0 (!%p196_p3), %v672_v0  ;;  %v331_v6 = vsel (!%p196_p3), %vm329_vm1, %v676_v5, 0  ;;  %vm403_vm3 = vcmask (!%p196_p3), 261120   ;;  %p259_p5 = scmp.lt.s32.totalorder (!%p196_p3), %s693_s15, 3  ;;  %vm417_vm4 = vcmask (!%p196_p3), 253952  }
   0x9   : > { %635 = vmatprep.subr.bf16.mxu0 (!%p196_p3), %v673_v1 }
   0xc   : > { %636 = vmatpush3.bf16.msra.mxu0 (!%p196_p3), %v673_v1 }
   0xd   : > { %637 = vmatprep.subr.bf16.mxu0 (!%p196_p3), %v674_v2 }
   0xe   : > { %s809_s23 = smov (!%p241_p4, %s603_s23), 15  ;;  %s811_s15 = smov (!%p259_p5, %s693_s15), 3 }
   0xf   : > { %s604_s26 = sshll.u32 %s809_s23, 2  ;;  %s264_s13 = scalar_lea.vmem %s802_s3, %s811_s15 }
  0x10   : > { %s244_s5 = scalar_lea.vmem %s799_s0, %s604_s26  ;;  %638 = vmatpush3.bf16.msra.mxu0 %v674_v2  ;;  %s257_s10 = scalar_lea.vmem %s801_s2, %s604_s26 }
  0x11   : > { %v677_v4 = vld [vmem:[%s244_s5] sm:$0xff]   ;;  %639 = vmatprep.subr.bf16.mxu0 %v675_v3  ;;  %v678_v7 = vld [vmem:[%s244_s5 + $0x8] sm:$0xff]   ;;  %s270_s20 = scalar_lea.vmem %s803_s4, %s811_s15 }
  0x12   : > { %643 = vmatprep.mubr.msk.bf16.mxu0 %vm322_vm0, %v677_v4 }
  0x14   : > { %640 = vmatpush3.bf16.msra.mxu0 %v675_v3 }
  0x15   : > { %647 = vmatprep.subr.msk.bf16.mxu0 %vm329_vm1, %v676_v5 }
  0x18   : > { %642 = vmatpush3.bf16.msra.mxu0 %v331_v6 }
  0x1b   : > { %644 = vmatmul.mubr.msk.bf16.vlgmr.msra.gmra.mrb[0].mxu0 %vm322_vm0, %v678_v7 }
  0xee   : > { %v645_v8 = vpop.f32.mrb[0].mxu0 }
  0xef   : > { %v624_v9 = vpack.c.bf16 %v645_v8, %v645_v8  ;;  %v367_v10 = vpop.f32.mrb[1].mxu0  ;;  %v421_v14 = vmul.f32 %v645_v8, %v645_v8  ;;  %v407_v22 = vsel %vm403_vm3, %v645_v8, 0.0 }
  0xf0   : > { %v622_v11 = vpack.c.bf16 %v367_v10, %v367_v10  ;;  %v419_v12 = vmul.f32 %v367_v10, %v367_v10  ;;  %v646_v13 = vpop.f32.mrb[2].mxu0  ;;  %v404_v17 = vsel %vm403_vm3, %v367_v10, 0.0 }
  0xf1   : > { %401 = vst.msk [vmem:[%s257_s10 + $0x8] sm:$0xf] %vm398_vm2, %v624_v9  ;;  %v625_v15 = vpack.c.bf16 %v646_v13, %v646_v13  ;;  %v370_v16 = vpop.f32.mrb[3].mxu0  ;;  %v422_v24 = vmul.f32 %v646_v13, %v646_v13  ;;  %v426_v28 = vsel %vm403_vm3, %v421_v14, 0.0  ;;  %v409_v29 = vsel %vm403_vm3, %v646_v13, 0.0 }
  0xf2   : > { %399 = vst.msk [vmem:[%s257_s10] sm:$0xf] %vm398_vm2, %v622_v11  ;;  %v623_v18 = vpack.c.bf16 %v370_v16, %v370_v16  ;;  %v405_v19 = vsel %vm403_vm3, %v370_v16, 0.0  ;;  %v420_v20 = vmul.f32 %v370_v16, %v370_v16  ;;  %v423_v23 = vsel %vm403_vm3, %v419_v12, 0.0 }
  0xf3   : > { %402 = vst.msk [vmem:[%s257_s10 + $0xc] sm:$0xf] %vm398_vm2, %v625_v15  ;;  %v406_v21 = vadd.f32 %v405_v19, %v404_v17  ;;  %v428_v32 = vsel %vm403_vm3, %v422_v24, 0.0 }
  0xf4   : > { %400 = vst.msk [vmem:[%s257_s10 + $0x4] sm:$0xf] %vm398_vm2, %v623_v18  ;;  %v424_v25 = vsel %vm403_vm3, %v420_v20, 0.0 }
  0xf5   : > { %v408_v26 = vadd.f32 %v407_v22, %v406_v21  ;;  %v425_v27 = vadd.f32 %v424_v25, %v423_v23 }
  0xf7   : > { %v410_v30 = vadd.f32 %v409_v29, %v408_v26  ;;  %v427_v31 = vadd.f32 %v426_v28, %v425_v27 }
  0xf9   : > { %v411_v33 = vrot.slane %v410_v30, 4  ;;  %v429_v34 = vadd.f32 %v428_v32, %v427_v31 }
  0xfb   : > { %v412_v35 = vadd.f32 %v411_v33, %v410_v30  ;;  %v430_v36 = vrot.slane %v429_v34, 4 }
  0xfd   : > { %v413_v37 = vrot.slane %v412_v35, 2  ;;  %v431_v38 = vadd.f32 %v430_v36, %v429_v34 }
  0xff   : > { %v414_v39 = vadd.f32 %v413_v37, %v412_v35  ;;  %v432_v40 = vrot.slane %v431_v38, 2 }
 0x101   : > { %v415_v41 = vrot.slane %v414_v39, 1  ;;  %v433_v42 = vadd.f32 %v432_v40, %v431_v38 }
 0x103   : > { %v416_v43 = vadd.f32 %v415_v41, %v414_v39  ;;  %v434_v44 = vrot.slane %v433_v42, 1 }
 0x105   : > { %418 = vst.msk [vmem:[%s264_s13] sm:$0x1] %vm417_vm4, %v416_v43  ;;  %v435_v45 = vadd.f32 %v434_v44, %v433_v42 }
 0x107   : > { %436 = vst.msk [vmem:[%s270_s20] sm:$0x1] %vm417_vm4, %v435_v45 }
 0x108 PF: > { %s15_s17 = sadd.s32 1, %s701_s17   ;;  %s804_s15 = smov %s697_s16 }
 0x109   : > { %p12_p6 = scmp.ge.s32.totalorder %s15_s17, 6   ;;  %s805_s16 = smov %s807_s18 }
 0x10b   :  { %14 = sbr.rel (!%p12_p6) target bundleno = 2 (0x2), region = 85 }

// kernel: decoder_forward.8
= control target key start
LH: loop header
LB: loop body
LE: loop exit
PB: predicated region body
PF: predicated region fallthrough
CT: control target
= control target key end

     0   :  { %s965_s15 = smov 0   ;;  %s967_s16 = smov 0   ;;  %s1100_s0 = inlined_call_operand.vmem [shape: bf16[512,16], index: 0, kind: input, shape index: {}]   ;;  %s1101_s1 = inlined_call_operand.vmem [shape: bf16[16,4], index: 1, kind: input, shape index: {}]   ;;  %s1102_s2 = inlined_call_operand.vmem [shape: bf16[512,4], index: 2, kind: output, shape index: {0}]   ;;  %s1103_s3 = inlined_call_operand.vmem [shape: f32[4,1,4], index: 3, kind: output, shape index: {1}]   ;;  %s1104_s4 = inlined_call_operand.vmem [shape: f32[4,1,4], index: 4, kind: output, shape index: {2}]  }
   0x1   :  { %s969_s17 = smov 0  }
   0x2 LB: > { %s27_s18 = sadd.s32 1, %s934_s16  ;;  %p798_p0 = scmp.ge.s32.totalorder %s938_s17, 1  ;;  %s938_s17 = sphi %s969_s17, %s15_s17   ;;  %s934_s16 = sphi %s967_s16, %s1106_s16   ;;  %s930_s15 = sphi %s965_s15, %s1105_s15  }
   0x3   : > { %p29_p1 = scmp.ge.s32.totalorder %s27_s18, 4  ;;  %p195_p2 = scmp.lt.s32.totalorder %s938_s17, 5 }
   0x5   : > { %s1108_s18 = smov (%p29_p1, %s27_s18), 0  ;;  %p196_p3 = pnand %p798_p0, %p195_p2 }
   0x6   : > { %v907_v0 = vld [vmem:[%s1101_s1] sm:$0xff] (!%p196_p3)   ;;  %s799_s21 = sshll.u32 (!%p196_p3), %s930_s15, 4  ;;  %vm336_vm0 = vcmask (!%p196_p3), 130048   ;;  %vm522_vm1 = vcmask (!%p196_p3), 27648   ;;  %vm539_vm2 = vcmask (!%p196_p3), 31744   ;;  %p259_p5 = scmp.lt.s32.totalorder (!%p196_p3), %s930_s15, 3 }
   0x7   : > { %199 = sbr.rel (%p196_p3) target bundleno = 280 (0x118), region = 28  ;;  %p241_p4 = scmp.lt.s32.totalorder (!%p196_p3), %s799_s21, 63  ;;  %863 = vmatprep.subr.bf16.mxu0 (!%p196_p3), %v907_v0  ;;  %881 = vmatprep.subr.bf16.mxu1 (!%p196_p3), %v907_v0  ;;  %vm577_vm3 = vcmask (!%p196_p3), 24576  }
   0x8   : > { %864 = vmatpush3.bf16.msra.mxu0 (!%p196_p3), %v907_v0  ;;  %882 = vmatpush3.bf16.msra.mxu1 (!%p196_p3), %v907_v0 }
   0xe   : > { %s1110_s21 = smov (!%p241_p4, %s799_s21), 63  ;;  %s1112_s15 = smov (!%p259_p5, %s930_s15), 3 }
   0xf   : > { %s800_s22 = sshll.u32 %s1110_s21, 2  ;;  %s264_s5 = scalar_lea.vmem %s1103_s3, %s1112_s15 }
  0x10   : > { %s244_s25 = scalar_lea.vmem %s1100_s0, %s800_s22  ;;  %s1003_s28 = scalar_lea.vmem %s1102_s2, %s800_s22 }
  0x11   : > { %v908_v1 = vld [vmem:[%s244_s25] sm:$0xff]   ;;  %v909_v2 = vld [vmem:[%s244_s25 + $0x8] sm:$0xff]   ;;  %v910_v3 = vld [vmem:[%s244_s25 + $0x10] sm:$0xff]   ;;  %s270_s8 = scalar_lea.vmem %s1104_s4, %s1112_s15 }
  0x12   : > { %865 = vmatprep.mubr.msk.bf16.mxu0 %vm336_vm0, %v908_v1  ;;  %v912_v4 = vld [vmem:[%s244_s25 + $0x20] sm:$0xff]   ;;  %v913_v5 = vld [vmem:[%s244_s25 + $0x28] sm:$0xff]   ;;  %v914_v6 = vld [vmem:[%s244_s25 + $0x30] sm:$0xff]  }
  0x13   : > { %866 = vmatmul.mubr.msk.bf16.vlgmr.msra.gmra.mrb[0].mxu0 %vm336_vm0, %v909_v2  ;;  %873 = vmatprep.mubr.msk.bf16.mxu1 %vm336_vm0, %v912_v4  ;;  %v911_v7 = vld [vmem:[%s244_s25 + $0x18] sm:$0xff]  }
  0x14   : > { %869 = vmatprep.mubr.msk.bf16.mxu0 %vm336_vm0, %v910_v3  ;;  %874 = vmatmul.mubr.msk.bf16.vlgmr.msra.gmra.mrb[0].mxu1 %vm336_vm0, %v913_v5  ;;  %v915_v8 = vld [vmem:[%s244_s25 + $0x38] sm:$0xff]  }
  0x15   : > { %877 = vmatprep.mubr.msk.bf16.mxu1 %vm336_vm0, %v914_v6 }
  0x1b   : > { %870 = vmatmul.mubr.msk.bf16.gmra.mrb[4].mxu0 %vm336_vm0, %v911_v7 }
  0x1c   : > { %878 = vmatmul.mubr.msk.bf16.gmra.mrb[4].mxu1 %vm336_vm0, %v915_v8 }
  0xe6   : > { %v867_v9 = vpop.f32.mrb[0].mxu0 }
  0xe7   : > { %v840_v10 = vpack.c.bf16 %v867_v9, %v867_v9  ;;  %v395_v11 = vpop.f32.mrb[1].mxu0  ;;  %v581_v15 = vmul.f32 %v867_v9, %v867_v9  ;;  %v1011_v22 = vpop.f32.mrb[0].mxu1  ;;  %v543_v27 = vsel %vm539_vm2, %v867_v9, 0.0 }
  0xe8   : > { %v838_v12 = vpack.c.bf16 %v395_v11, %v395_v11  ;;  %v579_v13 = vmul.f32 %v395_v11, %v395_v11  ;;  %v868_v14 = vpop.f32.mrb[2].mxu0  ;;  %v540_v18 = vsel %vm539_vm2, %v395_v11, 0.0  ;;  %v848_v25 = vpack.c.bf16 %v1011_v22, %v1011_v22  ;;  %v427_v26 = vpop.f32.mrb[1].mxu1 }
  0xe9   : > { %525 = vst.msk [vmem:[%s1003_s28 + $0x8] sm:$0xf] %vm522_vm1, %v840_v10  ;;  %v841_v16 = vpack.c.bf16 %v868_v14, %v868_v14  ;;  %v398_v17 = vpop.f32.mrb[3].mxu0  ;;  %v582_v23 = vmul.f32 %v868_v14, %v868_v14  ;;  %v846_v30 = vpack.c.bf16 %v427_v26, %v427_v26  ;;  %v1022_v31 = vpop.f32.mrb[2].mxu1  ;;  %v598_v36 = vsel %vm539_vm2, %v581_v15, 0.0 }
  0xea   : > { %523 = vst.msk [vmem:[%s1003_s28] sm:$0xf] %vm522_vm1, %v838_v12  ;;  %v839_v19 = vpack.c.bf16 %v398_v17, %v398_v17  ;;  %v541_v20 = vsel %vm539_vm2, %v398_v17, 0.0  ;;  %v580_v21 = vmul.f32 %v398_v17, %v398_v17  ;;  %v595_v28 = vsel %vm539_vm2, %v579_v13, 0.0  ;;  %533 = vst.msk [vmem:[%s1003_s28 + $0x28] sm:$0xf] %vm522_vm1, %v848_v25 }
  0xeb   : > { %526 = vst.msk [vmem:[%s1003_s28 + $0xc] sm:$0xf] %vm522_vm1, %v841_v16  ;;  %v542_v24 = vadd.f32 %v541_v20, %v540_v18  ;;  %v849_v34 = vpack.c.bf16 %v1022_v31, %v1022_v31  ;;  %v430_v35 = vpop.f32.mrb[3].mxu1  ;;  %531 = vst.msk [vmem:[%s1003_s28 + $0x20] sm:$0xf] %vm522_vm1, %v846_v30  ;;  %v545_v39 = vsel %vm539_vm2, %v868_v14, 0.0  ;;  %v587_v62 = vmul.f32 %v427_v26, %v427_v26 }
  0xec   : > { %524 = vst.msk [vmem:[%s1003_s28 + $0x4] sm:$0xf] %vm522_vm1, %v839_v19  ;;  %v596_v29 = vsel %vm539_vm2, %v580_v21, 0.0  ;;  %v847_v38 = vpack.c.bf16 %v430_v35, %v430_v35  ;;  %v600_v40 = vsel %vm539_vm2, %v582_v23, 0.0  ;;  %v555_v10 = vsel %vm539_vm2, %v427_v26, 0.0 }
  0xed   : > { %v544_v32 = vadd.f32 %v543_v27, %v542_v24  ;;  %v597_v33 = vadd.f32 %v596_v29, %v595_v28  ;;  %534 = vst.msk [vmem:[%s1003_s28 + $0x2c] sm:$0xf] %vm522_vm1, %v849_v34  ;;  %v610_v15 = vsel %vm539_vm2, %v587_v62, 0.0  ;;  %v588_v16 = vmul.f32 %v430_v35, %v430_v35 }
  0xee   : > { %v871_v37 = vpop.f32.mrb[4].mxu0  ;;  %532 = vst.msk [vmem:[%s1003_s28 + $0x24] sm:$0xf] %vm522_vm1, %v847_v38  ;;  %v589_v20 = vmul.f32 %v1011_v22, %v1011_v22  ;;  %v557_v21 = vsel %vm539_vm2, %v430_v35, 0.0  ;;  %v559_v25 = vsel %vm539_vm2, %v1011_v22, 0.0  ;;  %v590_v26 = vmul.f32 %v1022_v31, %v1022_v31 }
  0xef   : > { %v599_v41 = vadd.f32 %v598_v36, %v597_v33  ;;  %v844_v42 = vpack.c.bf16 %v871_v37, %v871_v37  ;;  %v411_v43 = vpop.f32.mrb[5].mxu0  ;;  %v546_v45 = vadd.f32 %v545_v39, %v544_v32  ;;  %v879_v55 = vpop.f32.mrb[4].mxu1  ;;  %v585_v56 = vmul.f32 %v871_v37, %v871_v37 }
  0xf0   : > { %v842_v44 = vpack.c.bf16 %v411_v43, %v411_v43  ;;  %v547_v46 = vsel %vm539_vm2, %v411_v43, 0.0  ;;  %v583_v47 = vmul.f32 %v411_v43, %v411_v43  ;;  %v872_v48 = vpop.f32.mrb[6].mxu0  ;;  %v443_v60 = vpop.f32.mrb[5].mxu1  ;;  %v551_v0 = vsel %vm539_vm2, %v871_v37, 0.0 }
  0xf1   : > { %529 = vst.msk [vmem:[%s1003_s28 + $0x18] sm:$0xf] %vm522_vm1, %v844_v42  ;;  %v601_v49 = vadd.f32 %v600_v40, %v599_v41  ;;  %v845_v50 = vpack.c.bf16 %v872_v48, %v872_v48  ;;  %v414_v51 = vpop.f32.mrb[7].mxu0  ;;  %v548_v52 = vadd.f32 %v547_v46, %v546_v45  ;;  %v880_v63 = vpop.f32.mrb[6].mxu1  ;;  %v586_v1 = vmul.f32 %v872_v48, %v872_v48 }
  0xf2   : > { %527 = vst.msk [vmem:[%s1003_s28 + $0x10] sm:$0xf] %vm522_vm1, %v842_v44  ;;  %v602_v53 = vsel %vm539_vm2, %v583_v47, 0.0  ;;  %v843_v54 = vpack.c.bf16 %v414_v51, %v414_v51  ;;  %v549_v58 = vsel %vm539_vm2, %v414_v51, 0.0  ;;  %v584_v59 = vmul.f32 %v414_v51, %v414_v51  ;;  %v446_v4 = vpop.f32.mrb[7].mxu1 }
  0xf3   : > { %v603_v57 = vadd.f32 %v602_v53, %v601_v49  ;;  %530 = vst.msk [vmem:[%s1003_s28 + $0x1c] sm:$0xf] %vm522_vm1, %v845_v50  ;;  %v550_v61 = vadd.f32 %v549_v58, %v548_v52  ;;  %v852_v3 = vpack.c.bf16 %v879_v55, %v879_v55  ;;  %v850_v7 = vpack.c.bf16 %v443_v60, %v443_v60 }
  0xf4   : > { %528 = vst.msk [vmem:[%s1003_s28 + $0x14] sm:$0xf] %vm522_vm1, %v843_v54  ;;  %v604_v2 = vsel %vm539_vm2, %v584_v59, 0.0  ;;  %v606_v8 = vsel %vm539_vm2, %v585_v56, 0.0  ;;  %v553_v9 = vsel %vm539_vm2, %v872_v48, 0.0  ;;  %v853_v11 = vpack.c.bf16 %v880_v63, %v880_v63 }
  0xf5   : > { %v552_v5 = vadd.f32 %v551_v0, %v550_v61  ;;  %v605_v6 = vadd.f32 %v604_v2, %v603_v57  ;;  %537 = vst.msk [vmem:[%s1003_s28 + $0x38] sm:$0xf] %vm522_vm1, %v852_v3  ;;  %535 = vst.msk [vmem:[%s1003_s28 + $0x30] sm:$0xf] %vm522_vm1, %v850_v7  ;;  %v608_v14 = vsel %vm539_vm2, %v586_v1, 0.0  ;;  %v851_v17 = vpack.c.bf16 %v446_v4, %v446_v4 }
  0xf6   : > { %538 = vst.msk [vmem:[%s1003_s28 + $0x3c] sm:$0xf] %vm522_vm1, %v853_v11  ;;  %v612_v27 = vsel %vm539_vm2, %v588_v16, 0.0  ;;  %v591_v28 = vmul.f32 %v443_v60, %v443_v60  ;;  %v614_v32 = vsel %vm539_vm2, %v589_v20, 0.0  ;;  %v561_v33 = vsel %vm539_vm2, %v1022_v31, 0.0 }
  0xf7   : > { %v607_v12 = vadd.f32 %v606_v8, %v605_v6  ;;  %v554_v13 = vadd.f32 %v553_v9, %v552_v5  ;;  %536 = vst.msk [vmem:[%s1003_s28 + $0x34] sm:$0xf] %vm522_vm1, %v851_v17  ;;  %v563_v34 = vsel %vm539_vm2, %v443_v60, 0.0  ;;  %v616_v37 = vsel %vm539_vm2, %v590_v26, 0.0 }
  0xf8   : > { %v618_v22 = vsel %vm539_vm2, %v591_v28, 0.0  ;;  %v592_v38 = vmul.f32 %v446_v4, %v446_v4  ;;  %v593_v41 = vmul.f32 %v879_v55, %v879_v55  ;;  %v565_v42 = vsel %vm539_vm2, %v446_v4, 0.0 }
  0xf9   : > { %v556_v18 = vadd.f32 %v555_v10, %v554_v13  ;;  %v609_v19 = vadd.f32 %v608_v14, %v607_v12  ;;  %v567_v45 = vsel %vm539_vm2, %v879_v55, 0.0  ;;  %v594_v31 = vmul.f32 %v880_v63, %v880_v63 }
  0xfa   : > { %v620_v46 = vsel %vm539_vm2, %v592_v38, 0.0  ;;  %v622_v49 = vsel %vm539_vm2, %v593_v41, 0.0  ;;  %v569_v50 = vsel %vm539_vm2, %v880_v63, 0.0 }
  0xfb   : > { %v611_v23 = vadd.f32 %v610_v15, %v609_v19  ;;  %v558_v24 = vadd.f32 %v557_v21, %v556_v18  ;;  %v624_v53 = vsel %vm539_vm2, %v594_v31, 0.0 }
  0xfd   : > { %v560_v29 = vadd.f32 %v559_v25, %v558_v24  ;;  %v613_v30 = vadd.f32 %v612_v27, %v611_v23 }
  0xff   : > { %v615_v35 = vadd.f32 %v614_v32, %v613_v30  ;;  %v562_v36 = vadd.f32 %v561_v33, %v560_v29 }
 0x101   : > { %v564_v39 = vadd.f32 %v563_v34, %v562_v36  ;;  %v617_v40 = vadd.f32 %v616_v37, %v615_v35 }
 0x103   : > { %v619_v43 = vadd.f32 %v618_v22, %v617_v40  ;;  %v566_v44 = vadd.f32 %v565_v42, %v564_v39 }
 0x105   : > { %v568_v47 = vadd.f32 %v567_v45, %v566_v44  ;;  %v621_v48 = vadd.f32 %v620_v46, %v619_v43 }
 0x107   : > { %v570_v51 = vadd.f32 %v569_v50, %v568_v47  ;;  %v623_v52 = vadd.f32 %v622_v49, %v621_v48 }
 0x109   : > { %v571_v54 = vrot.slane %v570_v51, 4  ;;  %v625_v56 = vadd.f32 %v624_v53, %v623_v52 }
 0x10b   : > { %v572_v57 = vadd.f32 %v571_v54, %v570_v51  ;;  %v626_v58 = vrot.slane %v625_v56, 4 }
 0x10d   : > { %v573_v55 = vrot.slane %v572_v57, 2  ;;  %v627_v59 = vadd.f32 %v626_v58, %v625_v56 }
 0x10f   : > { %v574_v60 = vadd.f32 %v573_v55, %v572_v57  ;;  %v628_v61 = vrot.slane %v627_v59, 2 }
 0x111   : > { %v575_v62 = vrot.slane %v574_v60, 1  ;;  %v629_v0 = vadd.f32 %v628_v61, %v627_v59 }
 0x113   : > { %v576_v63 = vadd.f32 %v575_v62, %v574_v60  ;;  %v630_v1 = vrot.slane %v629_v0, 1 }
 0x115   : > { %578 = vst.msk [vmem:[%s264_s5] sm:$0x1] %vm577_vm3, %v576_v63  ;;  %v631_v2 = vadd.f32 %v630_v1, %v629_v0 }
 0x117   : > { %632 = vst.msk [vmem:[%s270_s8] sm:$0x1] %vm577_vm3, %v631_v2 }
 0x118 PF: > { %s15_s17 = sadd.s32 1, %s938_s17   ;;  %s1105_s15 = smov %s934_s16 }
 0x119   : > { %p12_p6 = scmp.ge.s32.totalorder %s15_s17, 6   ;;  %s1106_s16 = smov %s1108_s18 }
 0x11b   :  { %14 = sbr.rel (!%p12_p6) target bundleno = 2 (0x2), region = 85 }

// kernel: tile.38
= control target key start
LH: loop header
LB: loop body
LE: loop exit
PB: predicated region body
PF: predicated region fallthrough
CT: control target
= control target key end

     0   :  { %s22_s0 = inlined_call_operand.vmem [shape: f32[2], index: 0, kind: input, shape index: {}]   ;;  %s23_s1 = inlined_call_operand.vmem [shape: f32[4,2], index: 1, kind: output, shape index: {}]  }
   0x1   :  { %v4_v0 = vld [vmem:[%s22_s0] ss:$0 sm:$0xff] }
   0x2   :  { %5 = vst [vmem:[%s23_s1] sm:$0xf] %v4_v0 }

// kernel: decoder_forward.9
= control target key start
LH: loop header
LB: loop body
LE: loop exit
PB: predicated region body
PF: predicated region fallthrough
CT: control target
= control target key end

     0   :  { %s997_s15 = smov 0   ;;  %s999_s16 = smov 0   ;;  %s1169_s0 = inlined_call_operand.vmem [shape: bf16[512,36], index: 0, kind: input, shape index: {}]   ;;  %s1170_s1 = inlined_call_operand.vmem [shape: bf16[36,8], index: 1, kind: input, shape index: {}]   ;;  %s1171_s2 = inlined_call_operand.vmem [shape: bf16[512,8], index: 2, kind: output, shape index: {0}]   ;;  %s1172_s3 = inlined_call_operand.vmem [shape: f32[4,1,8], index: 3, kind: output, shape index: {1}]   ;;  %s1173_s4 = inlined_call_operand.vmem [shape: f32[4,1,8], index: 4, kind: output, shape index: {2}]  }
   0x1   :  { %s1001_s17 = smov 0  }
   0x2 LB: > { %s27_s18 = sadd.s32 1, %s966_s16  ;;  %p814_p0 = scmp.ge.s32.totalorder %s970_s17, 1  ;;  %s970_s17 = sphi %s1001_s17, %s15_s17   ;;  %s966_s16 = sphi %s999_s16, %s1175_s16   ;;  %s962_s15 = sphi %s997_s15, %s1174_s15  }
   0x3   : > { %p29_p1 = scmp.ge.s32.totalorder %s27_s18, 4  ;;  %p195_p2 = scmp.lt.s32.totalorder %s970_s17, 5 }
   0x5   : > { %s1177_s18 = smov (%p29_p1, %s27_s18), 0  ;;  %p196_p3 = pnand %p814_p0, %p195_p2 }
   0x6   : > { %v937_v0 = vld [vmem:[%s1170_s1] sm:$0xff] (!%p196_p3)   ;;  %v938_v1 = vld [vmem:[%s1170_s1 + $0x8] sm:$0xff] (!%p196_p3)   ;;  %s815_s23 = sshll.u32 (!%p196_p3), %s962_s15, 4  ;;  %v939_v2 = vld [vmem:[%s1170_s1 + $0x10] ss:$0 sps:$4 sm:$0x33] (!%p196_p3)  }
   0x7   : > { %199 = sbr.rel (%p196_p3) target bundleno = 280 (0x118), region = 28  ;;  %883 = vmatprep.subr.bf16.mxu0 (!%p196_p3), %v937_v0  ;;  %p241_p4 = scmp.lt.s32.totalorder (!%p196_p3), %s815_s23, 63  ;;  %905 = vmatprep.subr.bf16.mxu1 (!%p196_p3), %v937_v0  ;;  %vm373_vm0 = vcmask (!%p196_p3), 1041408   ;;  %vm348_vm1 = vcmask (!%p196_p3), 293888   ;;  %vm538_vm2 = vcmask (!%p196_p3), 60416   ;;  %vm555_vm3 = vcmask (!%p196_p3), 64512  }
   0x8   : > { %884 = vmatpush3.bf16.msra.mxu0 (!%p196_p3), %v937_v0  ;;  %908 = vmatpush3.bf16.msra.mxu1 (!%p196_p3), %v937_v0  ;;  %v375_v3 = vsel (!%p196_p3), %vm373_vm0, %v939_v2, 0  ;;  %p259_p5 = scmp.lt.s32.totalorder (!%p196_p3), %s962_s15, 3  ;;  %vm593_vm4 = vcmask (!%p196_p3), 57344  }
   0x9   : > { %885 = vmatprep.subr.bf16.mxu0 (!%p196_p3), %v938_v1  ;;  %906 = vmatprep.subr.bf16.mxu1 (!%p196_p3), %v938_v1 }
   0xc   : > { %886 = vmatpush3.bf16.msra.mxu0 (!%p196_p3), %v938_v1  ;;  %909 = vmatpush3.bf16.msra.mxu1 (!%p196_p3), %v938_v1 }
   0xd   : > { %911 = vmatprep.subr.msk.bf16.mxu0 (!%p196_p3), %vm373_vm0, %v939_v2  ;;  %912 = vmatprep.subr.msk.bf16.mxu1 (!%p196_p3), %vm373_vm0, %v939_v2 }
   0xe   : > { %s1179_s23 = smov (!%p241_p4, %s815_s23), 63  ;;  %s1181_s15 = smov (!%p259_p5, %s962_s15), 3 }
   0xf   : > { %s816_s26 = sshll.u32 %s1179_s23, 2  ;;  %s264_s9 = scalar_lea.vmem %s1172_s3, %s1181_s15 }
  0x10   : > { %s244_s29 = scalar_lea.vmem %s1169_s0, %s816_s26  ;;  %888 = vmatpush3.bf16.msra.mxu0 %v375_v3  ;;  %910 = vmatpush3.bf16.msra.mxu1 %v375_v3  ;;  %s1044_s6 = scalar_lea.vmem %s1171_s2, %s816_s26 }
  0x11   : > { %v940_v4 = vld [vmem:[%s244_s29] sm:$0xff]   ;;  %v941_v5 = vld [vmem:[%s244_s29 + $0x8] sm:$0xff]   ;;  %v942_v6 = vld [vmem:[%s244_s29 + $0x10] sm:$0xff]   ;;  %s270_s12 = scalar_lea.vmem %s1173_s4, %s1181_s15 }
  0x12   : > { %889 = vmatprep.mubr.msk.bf16.mxu0 %vm348_vm1, %v940_v4  ;;  %v944_v7 = vld [vmem:[%s244_s29 + $0x20] sm:$0xff]   ;;  %v945_v8 = vld [vmem:[%s244_s29 + $0x28] sm:$0xff]   ;;  %v946_v9 = vld [vmem:[%s244_s29 + $0x30] sm:$0xff]  }
  0x13   : > { %890 = vmatmul.mubr.msk.bf16.vlgmr.msra.gmra.mrb[0].mxu0 %vm348_vm1, %v941_v5  ;;  %897 = vmatprep.mubr.msk.bf16.mxu1 %vm348_vm1, %v944_v7  ;;  %v943_v10 = vld [vmem:[%s244_s29 + $0x18] sm:$0xff]  }
  0x14   : > { %893 = vmatprep.mubr.msk.bf16.mxu0 %vm348_vm1, %v942_v6  ;;  %898 = vmatmul.mubr.msk.bf16.vlgmr.msra.gmra.mrb[0].mxu1 %vm348_vm1, %v945_v8  ;;  %v947_v11 = vld [vmem:[%s244_s29 + $0x38] sm:$0xff]  }
  0x15   : > { %901 = vmatprep.mubr.msk.bf16.mxu1 %vm348_vm1, %v946_v9 }
  0x1b   : > { %894 = vmatmul.mubr.msk.bf16.gmra.mrb[4].mxu0 %vm348_vm1, %v943_v10 }
  0x1c   : > { %902 = vmatmul.mubr.msk.bf16.gmra.mrb[4].mxu1 %vm348_vm1, %v947_v11 }
  0xe6   : > { %v891_v12 = vpop.f32.mrb[0].mxu0 }
  0xe7   : > { %v858_v13 = vpack.c.bf16 %v891_v12, %v891_v12  ;;  %v411_v14 = vpop.f32.mrb[1].mxu0  ;;  %v1046_v15 = vpop.f32.mrb[0].mxu1  ;;  %v597_v21 = vmul.f32 %v891_v12, %v891_v12  ;;  %v559_v32 = vsel %vm555_vm3, %v891_v12, 0.0 }
  0xe8   : > { %v856_v16 = vpack.c.bf16 %v411_v14, %v411_v14  ;;  %v595_v17 = vmul.f32 %v411_v14, %v411_v14  ;;  %v892_v18 = vpop.f32.mrb[2].mxu0  ;;  %v866_v19 = vpack.c.bf16 %v1046_v15, %v1046_v15  ;;  %v1050_v20 = vpop.f32.mrb[1].mxu1  ;;  %v556_v25 = vsel %vm555_vm3, %v411_v14, 0.0 }
  0xe9   : > { %541 = vst.msk [vmem:[%s1044_s6 + $0x8] sm:$0xf] %vm538_vm2, %v858_v13  ;;  %v859_v22 = vpack.c.bf16 %v892_v18, %v892_v18  ;;  %v414_v23 = vpop.f32.mrb[3].mxu0  ;;  %v1054_v24 = vpop.f32.mrb[2].mxu1  ;;  %v598_v30 = vmul.f32 %v892_v18, %v892_v18  ;;  %v864_v35 = vpack.c.bf16 %v1050_v20, %v1050_v20  ;;  %v614_v39 = vsel %vm555_vm3, %v597_v21, 0.0 }
  0xea   : > { %539 = vst.msk [vmem:[%s1044_s6] sm:$0xf] %vm538_vm2, %v856_v16  ;;  %v857_v26 = vpack.c.bf16 %v414_v23, %v414_v23  ;;  %v557_v27 = vsel %vm555_vm3, %v414_v23, 0.0  ;;  %v596_v28 = vmul.f32 %v414_v23, %v414_v23  ;;  %549 = vst.msk [vmem:[%s1044_s6 + $0x28] sm:$0xf] %vm538_vm2, %v866_v19  ;;  %v1062_v29 = vpop.f32.mrb[3].mxu1  ;;  %v867_v38 = vpack.c.bf16 %v1054_v24, %v1054_v24 }
  0xeb   : > { %542 = vst.msk [vmem:[%s1044_s6 + $0xc] sm:$0xf] %vm538_vm2, %v859_v22  ;;  %v558_v31 = vadd.f32 %v557_v27, %v556_v25  ;;  %v611_v33 = vsel %vm555_vm3, %v595_v17, 0.0  ;;  %547 = vst.msk [vmem:[%s1044_s6 + $0x20] sm:$0xf] %vm538_vm2, %v864_v35  ;;  %v865_v41 = vpack.c.bf16 %v1062_v29, %v1062_v29  ;;  %v561_v42 = vsel %vm555_vm3, %v892_v18, 0.0 }
  0xec   : > { %540 = vst.msk [vmem:[%s1044_s6 + $0x4] sm:$0xf] %vm538_vm2, %v857_v26  ;;  %v612_v34 = vsel %vm555_vm3, %v596_v28, 0.0  ;;  %v616_v43 = vsel %vm555_vm3, %v598_v30, 0.0  ;;  %550 = vst.msk [vmem:[%s1044_s6 + $0x2c] sm:$0xf] %vm538_vm2, %v867_v38  ;;  %v603_v3 = vmul.f32 %v1050_v20, %v1050_v20  ;;  %v604_v21 = vmul.f32 %v1062_v29, %v1062_v29 }
  0xed   : > { %v560_v36 = vadd.f32 %v559_v32, %v558_v31  ;;  %v613_v37 = vadd.f32 %v612_v34, %v611_v33  ;;  %548 = vst.msk [vmem:[%s1044_s6 + $0x24] sm:$0xf] %vm538_vm2, %v865_v41  ;;  %v571_v13 = vsel %vm555_vm3, %v1050_v20, 0.0  ;;  %v605_v25 = vmul.f32 %v1046_v15, %v1046_v15 }
  0xee   : > { %v895_v40 = vpop.f32.mrb[4].mxu0  ;;  %v626_v19 = vsel %vm555_vm3, %v603_v3, 0.0  ;;  %v573_v26 = vsel %vm555_vm3, %v1062_v29, 0.0  ;;  %v575_v30 = vsel %vm555_vm3, %v1046_v15, 0.0  ;;  %v606_v31 = vmul.f32 %v1054_v24, %v1054_v24 }
  0xef   : > { %v615_v44 = vadd.f32 %v614_v39, %v613_v37  ;;  %v862_v45 = vpack.c.bf16 %v895_v40, %v895_v40  ;;  %v427_v46 = vpop.f32.mrb[5].mxu0  ;;  %v1084_v47 = vpop.f32.mrb[4].mxu1  ;;  %v562_v49 = vadd.f32 %v561_v42, %v560_v36  ;;  %v601_v62 = vmul.f32 %v895_v40, %v895_v40 }
  0xf0   : > { %v860_v48 = vpack.c.bf16 %v427_v46, %v427_v46  ;;  %v563_v50 = vsel %vm555_vm3, %v427_v46, 0.0  ;;  %v599_v51 = vmul.f32 %v427_v46, %v427_v46  ;;  %v896_v52 = vpop.f32.mrb[6].mxu0  ;;  %v459_v53 = vpop.f32.mrb[5].mxu1  ;;  %v567_v4 = vsel %vm555_vm3, %v895_v40, 0.0 }
  0xf1   : > { %545 = vst.msk [vmem:[%s1044_s6 + $0x18] sm:$0xf] %vm538_vm2, %v862_v45  ;;  %v617_v54 = vadd.f32 %v616_v43, %v615_v44  ;;  %v863_v55 = vpack.c.bf16 %v896_v52, %v896_v52  ;;  %v430_v56 = vpop.f32.mrb[7].mxu0  ;;  %v1091_v57 = vpop.f32.mrb[6].mxu1  ;;  %v564_v58 = vadd.f32 %v563_v50, %v562_v49  ;;  %v602_v5 = vmul.f32 %v896_v52, %v896_v52 }
  0xf2   : > { %543 = vst.msk [vmem:[%s1044_s6 + $0x10] sm:$0xf] %vm538_vm2, %v860_v48  ;;  %v618_v59 = vsel %vm555_vm3, %v599_v51, 0.0  ;;  %v861_v60 = vpack.c.bf16 %v430_v56, %v430_v56  ;;  %v462_v61 = vpop.f32.mrb[7].mxu1  ;;  %v565_v0 = vsel %vm555_vm3, %v430_v56, 0.0  ;;  %v600_v1 = vmul.f32 %v430_v56, %v430_v56 }
  0xf3   : > { %v619_v63 = vadd.f32 %v618_v59, %v617_v54  ;;  %546 = vst.msk [vmem:[%s1044_s6 + $0x1c] sm:$0xf] %vm538_vm2, %v863_v55  ;;  %v566_v2 = vadd.f32 %v565_v0, %v564_v58  ;;  %v870_v7 = vpack.c.bf16 %v1084_v47, %v1084_v47  ;;  %v868_v10 = vpack.c.bf16 %v459_v53, %v459_v53 }
  0xf4   : > { %544 = vst.msk [vmem:[%s1044_s6 + $0x14] sm:$0xf] %vm538_vm2, %v861_v60  ;;  %v620_v6 = vsel %vm555_vm3, %v600_v1, 0.0  ;;  %v622_v11 = vsel %vm555_vm3, %v601_v62, 0.0  ;;  %v569_v12 = vsel %vm555_vm3, %v896_v52, 0.0  ;;  %v871_v14 = vpack.c.bf16 %v1091_v57, %v1091_v57 }
  0xf5   : > { %v568_v8 = vadd.f32 %v567_v4, %v566_v2  ;;  %v621_v9 = vadd.f32 %v620_v6, %v619_v63  ;;  %553 = vst.msk [vmem:[%s1044_s6 + $0x38] sm:$0xf] %vm538_vm2, %v870_v7  ;;  %551 = vst.msk [vmem:[%s1044_s6 + $0x30] sm:$0xf] %vm538_vm2, %v868_v10  ;;  %v624_v18 = vsel %vm555_vm3, %v602_v5, 0.0  ;;  %v869_v22 = vpack.c.bf16 %v462_v61, %v462_v61 }
  0xf6   : > { %554 = vst.msk [vmem:[%s1044_s6 + $0x3c] sm:$0xf] %vm538_vm2, %v871_v14  ;;  %v628_v32 = vsel %vm555_vm3, %v604_v21, 0.0  ;;  %v607_v33 = vmul.f32 %v459_v53, %v459_v53  ;;  %v630_v36 = vsel %vm555_vm3, %v605_v25, 0.0  ;;  %v577_v29 = vsel %vm555_vm3, %v1054_v24, 0.0 }
  0xf7   : > { %v623_v16 = vadd.f32 %v622_v11, %v621_v9  ;;  %v570_v17 = vadd.f32 %v569_v12, %v568_v8  ;;  %552 = vst.msk [vmem:[%s1044_s6 + $0x34] sm:$0xf] %vm538_vm2, %v869_v22  ;;  %v579_v37 = vsel %vm555_vm3, %v459_v53, 0.0  ;;  %v632_v40 = vsel %vm555_vm3, %v606_v31, 0.0 }
  0xf8   : > { %v634_v15 = vsel %vm555_vm3, %v607_v33, 0.0  ;;  %v608_v41 = vmul.f32 %v462_v61, %v462_v61  ;;  %v609_v44 = vmul.f32 %v1084_v47, %v1084_v47  ;;  %v581_v45 = vsel %vm555_vm3, %v462_v61, 0.0 }
  0xf9   : > { %v572_v20 = vadd.f32 %v571_v13, %v570_v17  ;;  %v625_v23 = vadd.f32 %v624_v18, %v623_v16  ;;  %v583_v24 = vsel %vm555_vm3, %v1084_v47, 0.0  ;;  %v610_v49 = vmul.f32 %v1091_v57, %v1091_v57 }
  0xfa   : > { %v636_v50 = vsel %vm555_vm3, %v608_v41, 0.0  ;;  %v638_v53 = vsel %vm555_vm3, %v609_v44, 0.0  ;;  %v585_v54 = vsel %vm555_vm3, %v1091_v57, 0.0 }
  0xfb   : > { %v627_v27 = vadd.f32 %v626_v19, %v625_v23  ;;  %v574_v28 = vadd.f32 %v573_v26, %v572_v20  ;;  %v640_v58 = vsel %vm555_vm3, %v610_v49, 0.0 }
  0xfd   : > { %v576_v34 = vadd.f32 %v575_v30, %v574_v28  ;;  %v629_v35 = vadd.f32 %v628_v32, %v627_v27 }
  0xff   : > { %v631_v38 = vadd.f32 %v630_v36, %v629_v35  ;;  %v578_v39 = vadd.f32 %v577_v29, %v576_v34 }
 0x101   : > { %v580_v42 = vadd.f32 %v579_v37, %v578_v39  ;;  %v633_v43 = vadd.f32 %v632_v40, %v631_v38 }
 0x103   : > { %v635_v46 = vadd.f32 %v634_v15, %v633_v43  ;;  %v582_v48 = vadd.f32 %v581_v45, %v580_v42 }
 0x105   : > { %v584_v51 = vadd.f32 %v583_v24, %v582_v48  ;;  %v637_v52 = vadd.f32 %v636_v50, %v635_v46 }
 0x107   : > { %v586_v55 = vadd.f32 %v585_v54, %v584_v51  ;;  %v639_v56 = vadd.f32 %v638_v53, %v637_v52 }
 0x109   : > { %v587_v59 = vrot.slane %v586_v55, 4  ;;  %v641_v60 = vadd.f32 %v640_v58, %v639_v56 }
 0x10b   : > { %v588_v47 = vadd.f32 %v587_v59, %v586_v55  ;;  %v642_v61 = vrot.slane %v641_v60, 4 }
 0x10d   : > { %v589_v62 = vrot.slane %v588_v47, 2  ;;  %v643_v63 = vadd.f32 %v642_v61, %v641_v60 }
 0x10f   : > { %v590_v0 = vadd.f32 %v589_v62, %v588_v47  ;;  %v644_v1 = vrot.slane %v643_v63, 2 }
 0x111   : > { %v591_v2 = vrot.slane %v590_v0, 1  ;;  %v645_v3 = vadd.f32 %v644_v1, %v643_v63 }
 0x113   : > { %v592_v57 = vadd.f32 %v591_v2, %v590_v0  ;;  %v646_v4 = vrot.slane %v645_v3, 1 }
 0x115   : > { %594 = vst.msk [vmem:[%s264_s9] sm:$0x1] %vm593_vm4, %v592_v57  ;;  %v647_v5 = vadd.f32 %v646_v4, %v645_v3 }
 0x117   : > { %648 = vst.msk [vmem:[%s270_s12] sm:$0x1] %vm593_vm4, %v647_v5 }
 0x118 PF: > { %s15_s17 = sadd.s32 1, %s970_s17   ;;  %s1174_s15 = smov %s966_s16 }
 0x119   : > { %p12_p6 = scmp.ge.s32.totalorder %s15_s17, 6   ;;  %s1175_s16 = smov %s1177_s18 }
 0x11b   :  { %14 = sbr.rel (!%p12_p6) target bundleno = 2 (0x2), region = 85 }

// kernel: decoder_forward.10
= control target key start
LH: loop header
LB: loop body
LE: loop exit
PB: predicated region body
PF: predicated region fallthrough
CT: control target
= control target key end

     0   :  { %s2113_s15 = smov 0   ;;  %s2115_s16 = smov 0   ;;  %s2715_s0 = inlined_call_operand.vmem [shape: bf16[2048,4], index: 0, kind: input, shape index: {}]   ;;  %s2716_s1 = inlined_call_operand.vmem [shape: bf16[4,4], index: 1, kind: input, shape index: {}]   ;;  %s2717_s2 = inlined_call_operand.vmem [shape: bf16[2048,4], index: 2, kind: output, shape index: {0}]   ;;  %s2718_s3 = inlined_call_operand.vmem [shape: f32[4,1,4], index: 3, kind: output, shape index: {1}]   ;;  %s2719_s4 = inlined_call_operand.vmem [shape: f32[4,1,4], index: 4, kind: output, shape index: {2}]  }
   0x1   :  { %s2117_s17 = smov 0  }
   0x2 LB: > { %s27_s18 = sadd.s32 1, %s2082_s16  ;;  %p1706_p0 = scmp.ge.s32.totalorder %s2086_s17, 1  ;;  %s2086_s17 = sphi %s2117_s17, %s15_s17   ;;  %s2082_s16 = sphi %s2115_s16, %s2721_s16   ;;  %s2078_s15 = sphi %s2113_s15, %s2720_s15  }
   0x3   : > { %p29_p1 = scmp.ge.s32.totalorder %s27_s18, 4  ;;  %p195_p2 = scmp.lt.s32.totalorder %s2086_s17, 5 }
   0x5   : > { %s2723_s18 = smov (%p29_p1, %s27_s18), 0  ;;  %p196_p3 = pnand %p1706_p0, %p195_p2 }
   0x6   : > { %v336_v0 = vld [vmem:[%s2716_s1] sm:$0x3] (!%p196_p3)  ;;  %vm594_vm0 = vcmask (!%p196_p3), 1041408   ;;  %s1707_s21 = sshll.u32 (!%p196_p3), %s2078_s15, 6  ;;  %vm497_vm1 = vcmask (!%p196_p3), 31744   ;;  %vm1143_vm2 = vcmask (!%p196_p3), 27648  }
   0x7   : > { %199 = sbr.rel (%p196_p3) target bundleno = 376 (0x178), region = 28  ;;  %2006 = vmatprep.subr.msk.bf16.mxu0 (!%p196_p3), %vm594_vm0, %v336_v0  ;;  %v596_v1 = vsel (!%p196_p3), %vm594_vm0, %v336_v0, 0  ;;  %p241_p4 = scmp.lt.s32.totalorder (!%p196_p3), %s1707_s21, 255  ;;  %2007 = vmatprep.subr.msk.bf16.mxu1 (!%p196_p3), %vm594_vm0, %v336_v0  ;;  %vm1341_vm3 = vcmask (!%p196_p3), 24576  }
   0x8   : > { %1939 = vmatpush3.bf16.msra.mxu0 (!%p196_p3), %v596_v1  ;;  %2005 = vmatpush3.bf16.msra.mxu1 (!%p196_p3), %v596_v1  ;;  %p259_p5 = scmp.lt.s32.totalorder (!%p196_p3), %s2078_s15, 3 }
   0xe   : > { %s2725_s21 = smov (!%p241_p4, %s1707_s21), 255  ;;  %s2727_s15 = smov (!%p259_p5, %s2078_s15), 3 }
   0xf   : > { %s1708_s22 = sshll.u32 %s2725_s21, 2  ;;  %s264_s5 = scalar_lea.vmem %s2718_s3, %s2727_s15 }
  0x10   : > { %s2145_s25 = scalar_lea.vmem %s2715_s0, %s1708_s22  ;;  %s2216_s28 = scalar_lea.vmem %s2717_s2, %s1708_s22 }
  0x11   : > { %v2032_v2 = vld [vmem:[%s2145_s25] sm:$0xff]   ;;  %v2033_v3 = vld [vmem:[%s2145_s25 + $0x8] sm:$0xff]   ;;  %v2034_v4 = vld [vmem:[%s2145_s25 + $0x10] sm:$0xff]   ;;  %s270_s8 = scalar_lea.vmem %s2719_s4, %s2727_s15 }
  0x12   : > { %1940 = vmatprep.mubr.msk.bf16.mxu0 %vm497_vm1, %v2032_v2  ;;  %v2035_v5 = vld [vmem:[%s2145_s25 + $0x18] sm:$0xff]   ;;  %v2036_v6 = vld [vmem:[%s2145_s25 + $0x20] sm:$0xff]   ;;  %v2037_v7 = vld [vmem:[%s2145_s25 + $0x28] sm:$0xff]  }
  0x13   : > { %1941 = vmatmul.mubr.msk.bf16.vlgmr.msra.gmra.mrb[0].mxu0 %vm497_vm1, %v2033_v3  ;;  %v2038_v8 = vld [vmem:[%s2145_s25 + $0x30] sm:$0xff]   ;;  %v2048_v9 = vld [vmem:[%s2145_s25 + $0x80] sm:$0xff]   ;;  %v2049_v10 = vld [vmem:[%s2145_s25 + $0x88] sm:$0xff]  }
  0x14   : > { %1944 = vmatprep.mubr.msk.bf16.mxu0 %vm497_vm1, %v2034_v4  ;;  %1972 = vmatprep.mubr.msk.bf16.mxu1 %vm497_vm1, %v2048_v9  ;;  %v2050_v11 = vld [vmem:[%s2145_s25 + $0x90] sm:$0xff]   ;;  %v2039_v12 = vld [vmem:[%s2145_s25 + $0x38] sm:$0xff]   ;;  %v2040_v13 = vld [vmem:[%s2145_s25 + $0x40] sm:$0xff]  }
  0x15   : > { %1973 = vmatmul.mubr.msk.bf16.vlgmr.msra.gmra.mrb[0].mxu1 %vm497_vm1, %v2049_v10  ;;  %v2051_v14 = vld [vmem:[%s2145_s25 + $0x98] sm:$0xff]   ;;  %v2052_v15 = vld [vmem:[%s2145_s25 + $0xa0] sm:$0xff]   ;;  %v2041_v16 = vld [vmem:[%s2145_s25 + $0x48] sm:$0xff]  }
  0x16   : > { %1976 = vmatprep.mubr.msk.bf16.mxu1 %vm497_vm1, %v2050_v11  ;;  %v2053_v17 = vld [vmem:[%s2145_s25 + $0xa8] sm:$0xff]   ;;  %v2042_v18 = vld [vmem:[%s2145_s25 + $0x50] sm:$0xff]   ;;  %v2043_v20 = vld [vmem:[%s2145_s25 + $0x58] sm:$0xff]  }
  0x17   : > { %v2054_v19 = vld [vmem:[%s2145_s25 + $0xb0] sm:$0xff]   ;;  %v2055_v21 = vld [vmem:[%s2145_s25 + $0xb8] sm:$0xff]   ;;  %v2044_v22 = vld [vmem:[%s2145_s25 + $0x60] sm:$0xff]  }
  0x18   : > { %v2056_v23 = vld [vmem:[%s2145_s25 + $0xc0] sm:$0xff]   ;;  %v2045_v24 = vld [vmem:[%s2145_s25 + $0x68] sm:$0xff]   ;;  %v2046_v26 = vld [vmem:[%s2145_s25 + $0x70] sm:$0xff]  }
  0x19   : > { %v2057_v25 = vld [vmem:[%s2145_s25 + $0xc8] sm:$0xff]   ;;  %v2058_v27 = vld [vmem:[%s2145_s25 + $0xd0] sm:$0xff]   ;;  %v2047_v28 = vld [vmem:[%s2145_s25 + $0x78] sm:$0xff]  }
  0x1a   : > { %v2059_v29 = vld [vmem:[%s2145_s25 + $0xd8] sm:$0xff]   ;;  %v2060_v30 = vld [vmem:[%s2145_s25 + $0xe0] sm:$0xff]   ;;  %v2061_v31 = vld [vmem:[%s2145_s25 + $0xe8] sm:$0xff]  }
  0x1b   : > { %1945 = vmatmul.mubr.msk.bf16.gmra.mrb[4].mxu0 %vm497_vm1, %v2035_v5  ;;  %v2062_v32 = vld [vmem:[%s2145_s25 + $0xf0] sm:$0xff]   ;;  %v2063_v33 = vld [vmem:[%s2145_s25 + $0xf8] sm:$0xff]  }
  0x1c   : > { %1948 = vmatprep.mubr.msk.bf16.mxu0 %vm497_vm1, %v2036_v6 }
  0x1d   : > { %1977 = vmatmul.mubr.msk.bf16.gmra.mrb[4].mxu1 %vm497_vm1, %v2051_v14 }
  0x1e   : > { %1980 = vmatprep.mubr.msk.bf16.mxu1 %vm497_vm1, %v2052_v15 }
  0x23   : > { %1949 = vmatmul.mubr.msk.bf16.gmra.mrb[8].mxu0 %vm497_vm1, %v2037_v7 }
  0x24   : > { %1952 = vmatprep.mubr.msk.bf16.mxu0 %vm497_vm1, %v2038_v8 }
  0x25   : > { %1981 = vmatmul.mubr.msk.bf16.gmra.mrb[8].mxu1 %vm497_vm1, %v2053_v17 }
  0x26   : > { %1984 = vmatprep.mubr.msk.bf16.mxu1 %vm497_vm1, %v2054_v19 }
  0x2b   : > { %1953 = vmatmul.mubr.msk.bf16.gmra.mrb[12].mxu0 %vm497_vm1, %v2039_v12 }
  0x2c   : > { %1956 = vmatprep.mubr.msk.bf16.mxu0 %vm497_vm1, %v2040_v13 }
  0x2d   : > { %1985 = vmatmul.mubr.msk.bf16.gmra.mrb[12].mxu1 %vm497_vm1, %v2055_v21 }
  0x2e   : > { %1988 = vmatprep.mubr.msk.bf16.mxu1 %vm497_vm1, %v2056_v23 }
  0x33   : > { %1957 = vmatmul.mubr.msk.bf16.gmra.mrb[16].mxu0 %vm497_vm1, %v2041_v16 }
  0x34   : > { %1960 = vmatprep.mubr.msk.bf16.mxu0 %vm497_vm1, %v2042_v18 }
  0x35   : > { %1989 = vmatmul.mubr.msk.bf16.gmra.mrb[16].mxu1 %vm497_vm1, %v2057_v25 }
  0x36   : > { %1992 = vmatprep.mubr.msk.bf16.mxu1 %vm497_vm1, %v2058_v27 }
  0x3b   : > { %1961 = vmatmul.mubr.msk.bf16.gmra.mrb[20].mxu0 %vm497_vm1, %v2043_v20 }
  0x3c   : > { %1964 = vmatprep.mubr.msk.bf16.mxu0 %vm497_vm1, %v2044_v22 }
  0x3d   : > { %1993 = vmatmul.mubr.msk.bf16.gmra.mrb[20].mxu1 %vm497_vm1, %v2059_v29 }
  0x3e   : > { %1996 = vmatprep.mubr.msk.bf16.mxu1 %vm497_vm1, %v2060_v30 }
  0x43   : > { %1965 = vmatmul.mubr.msk.bf16.gmra.mrb[24].mxu0 %vm497_vm1, %v2045_v24 }
  0x44   : > { %1968 = vmatprep.mubr.msk.bf16.mxu0 %vm497_vm1, %v2046_v26 }
  0x45   : > { %1997 = vmatmul.mubr.msk.bf16.gmra.mrb[24].mxu1 %vm497_vm1, %v2061_v31 }
  0x46   : > { %2000 = vmatprep.mubr.msk.bf16.mxu1 %vm497_vm1, %v2062_v32 }
  0x4b   : > { %1969 = vmatmul.mubr.msk.bf16.gmra.mrb[28].mxu0 %vm497_vm1, %v2047_v28 }
  0x4d   : > { %2001 = vmatmul.mubr.msk.bf16.gmra.mrb[28].mxu1 %vm497_vm1, %v2063_v33 }
  0xe6   : > { %v1942_v34 = vpop.f32.mrb[0].mxu0 }
  0xe7   : > { %v1843_v35 = vpack.c.bf16 %v1942_v34, %v1942_v34  ;;  %v632_v36 = vpop.f32.mrb[1].mxu0  ;;  %v1345_v40 = vmul.f32 %v1942_v34, %v1942_v34  ;;  %v1211_v49 = vsel %vm497_vm1, %v1942_v34, 0.0 }
  0xe8   : > { %v1841_v37 = vpack.c.bf16 %v632_v36, %v632_v36  ;;  %v1343_v38 = vmul.f32 %v632_v36, %v632_v36  ;;  %v1943_v39 = vpop.f32.mrb[2].mxu0  ;;  %v1208_v43 = vsel %vm497_vm1, %v632_v36, 0.0  ;;  %v2247_v19 = vpop.f32.mrb[0].mxu1 }
  0xe9   : > { %1146 = vst.msk [vmem:[%s2216_s28 + $0x8] sm:$0xf] %vm1143_vm2, %v1843_v35  ;;  %v1844_v41 = vpack.c.bf16 %v1943_v39, %v1943_v39  ;;  %v635_v42 = vpop.f32.mrb[3].mxu0  ;;  %v1346_v47 = vmul.f32 %v1943_v39, %v1943_v39  ;;  %v1410_v54 = vsel %vm497_vm1, %v1345_v40, 0.0  ;;  %v1213_v56 = vsel %vm497_vm1, %v1943_v39, 0.0  ;;  %v2253_v25 = vpop.f32.mrb[1].mxu1 }
  0xea   : > { %1144 = vst.msk [vmem:[%s2216_s28] sm:$0xf] %vm1143_vm2, %v1841_v37  ;;  %v1842_v44 = vpack.c.bf16 %v635_v42, %v635_v42  ;;  %v1209_v45 = vsel %vm497_vm1, %v635_v42, 0.0  ;;  %v1344_v46 = vmul.f32 %v635_v42, %v635_v42  ;;  %v1407_v50 = vsel %vm497_vm1, %v1343_v38, 0.0  ;;  %v2256_v31 = vpop.f32.mrb[2].mxu1 }
  0xeb   : > { %1147 = vst.msk [vmem:[%s2216_s28 + $0xc] sm:$0xf] %vm1143_vm2, %v1844_v41  ;;  %v1210_v48 = vadd.f32 %v1209_v45, %v1208_v43  ;;  %v1412_v57 = vsel %vm497_vm1, %v1346_v47, 0.0  ;;  %v1875_v24 = vpack.c.bf16 %v2247_v19, %v2247_v19  ;;  %v2263_v36 = vpop.f32.mrb[3].mxu1 }
  0xec   : > { %1145 = vst.msk [vmem:[%s2216_s28 + $0x4] sm:$0xf] %vm1143_vm2, %v1842_v44  ;;  %v1408_v51 = vsel %vm497_vm1, %v1344_v46, 0.0 }
  0xed   : > { %v1212_v52 = vadd.f32 %v1211_v49, %v1210_v48  ;;  %v1409_v53 = vadd.f32 %v1408_v51, %v1407_v50  ;;  %1178 = vst.msk [vmem:[%s2216_s28 + $0x88] sm:$0xf] %vm1143_vm2, %v1875_v24  ;;  %v1873_v49 = vpack.c.bf16 %v2253_v25, %v2253_v25 }
  0xee   : > { %v1946_v55 = vpop.f32.mrb[4].mxu0 }
  0xef   : > { %v1411_v58 = vadd.f32 %v1410_v54, %v1409_v53  ;;  %v1847_v59 = vpack.c.bf16 %v1946_v55, %v1946_v55  ;;  %v648_v60 = vpop.f32.mrb[5].mxu0  ;;  %v1214_v62 = vadd.f32 %v1213_v56, %v1212_v52  ;;  %v1349_v8 = vmul.f32 %v1946_v55, %v1946_v55  ;;  %1176 = vst.msk [vmem:[%s2216_s28 + $0x80] sm:$0xf] %vm1143_vm2, %v1873_v49 }
  0xf0   : > { %v1845_v61 = vpack.c.bf16 %v648_v60, %v648_v60  ;;  %v1215_v63 = vsel %vm497_vm1, %v648_v60, 0.0  ;;  %v1347_v0 = vmul.f32 %v648_v60, %v648_v60  ;;  %v1947_v1 = vpop.f32.mrb[6].mxu0  ;;  %v1219_v13 = vsel %vm497_vm1, %v1946_v55, 0.0  ;;  %v2279_v54 = vpop.f32.mrb[4].mxu1 }
  0xf1   : > { %1150 = vst.msk [vmem:[%s2216_s28 + $0x18] sm:$0xf] %vm1143_vm2, %v1847_v59  ;;  %v1413_v2 = vadd.f32 %v1412_v57, %v1411_v58  ;;  %v1848_v3 = vpack.c.bf16 %v1947_v1, %v1947_v1  ;;  %v651_v4 = vpop.f32.mrb[7].mxu0  ;;  %v1216_v5 = vadd.f32 %v1215_v63, %v1214_v62  ;;  %v1350_v14 = vmul.f32 %v1947_v1, %v1947_v1  ;;  %v2285_v59 = vpop.f32.mrb[5].mxu1 }
  0xf2   : > { %1148 = vst.msk [vmem:[%s2216_s28 + $0x10] sm:$0xf] %vm1143_vm2, %v1845_v61  ;;  %v1414_v6 = vsel %vm497_vm1, %v1347_v0, 0.0  ;;  %v1846_v7 = vpack.c.bf16 %v651_v4, %v651_v4  ;;  %v1217_v10 = vsel %vm497_vm1, %v651_v4, 0.0  ;;  %v1348_v11 = vmul.f32 %v651_v4, %v651_v4 }
  0xf3   : > { %v1415_v9 = vadd.f32 %v1414_v6, %v1413_v2  ;;  %1151 = vst.msk [vmem:[%s2216_s28 + $0x1c] sm:$0xf] %vm1143_vm2, %v1848_v3  ;;  %v1218_v12 = vadd.f32 %v1217_v10, %v1216_v5  ;;  %v1418_v20 = vsel %vm497_vm1, %v1349_v8, 0.0  ;;  %v1221_v21 = vsel %vm497_vm1, %v1947_v1, 0.0  ;;  %v2290_v1 = vpop.f32.mrb[6].mxu1 }
  0xf4   : > { %1149 = vst.msk [vmem:[%s2216_s28 + $0x14] sm:$0xf] %vm1143_vm2, %v1846_v7  ;;  %v1416_v15 = vsel %vm497_vm1, %v1348_v11, 0.0  ;;  %v1420_v32 = vsel %vm497_vm1, %v1350_v14, 0.0  ;;  %v1876_v53 = vpack.c.bf16 %v2256_v31, %v2256_v31  ;;  %v2295_v6 = vpop.f32.mrb[7].mxu1  ;;  %v1879_v24 = vpack.c.bf16 %v2279_v54, %v2279_v54 }
  0xf5   : > { %v1220_v16 = vadd.f32 %v1219_v13, %v1218_v12  ;;  %v1417_v17 = vadd.f32 %v1416_v15, %v1415_v9 }
  0xf6   : > { %v1950_v18 = vpop.f32.mrb[8].mxu0  ;;  %1179 = vst.msk [vmem:[%s2216_s28 + $0x8c] sm:$0xf] %vm1143_vm2, %v1876_v53  ;;  %1182 = vst.msk [vmem:[%s2216_s28 + $0x98] sm:$0xf] %vm1143_vm2, %v1879_v24 }
  0xf7   : > { %v1851_v22 = vpack.c.bf16 %v1950_v18, %v1950_v18  ;;  %v664_v23 = vpop.f32.mrb[9].mxu0  ;;  %v1419_v26 = vadd.f32 %v1418_v20, %v1417_v17  ;;  %v1222_v28 = vadd.f32 %v1221_v21, %v1220_v16  ;;  %v1353_v40 = vmul.f32 %v1950_v18, %v1950_v18 }
  0xf8   : > { %v1849_v27 = vpack.c.bf16 %v664_v23, %v664_v23  ;;  %v1223_v29 = vsel %vm497_vm1, %v664_v23, 0.0  ;;  %v1951_v30 = vpop.f32.mrb[10].mxu0  ;;  %v1351_v33 = vmul.f32 %v664_v23, %v664_v23  ;;  %v1227_v46 = vsel %vm497_vm1, %v1950_v18, 0.0 }
  0xf9   : > { %1154 = vst.msk [vmem:[%s2216_s28 + $0x28] sm:$0xf] %vm1143_vm2, %v1851_v22  ;;  %v1852_v34 = vpack.c.bf16 %v1951_v30, %v1951_v30  ;;  %v667_v35 = vpop.f32.mrb[11].mxu0  ;;  %v1224_v37 = vadd.f32 %v1223_v29, %v1222_v28  ;;  %v1421_v38 = vadd.f32 %v1420_v32, %v1419_v26  ;;  %v1354_v47 = vmul.f32 %v1951_v30, %v1951_v30  ;;  %v2311_v26 = vpop.f32.mrb[8].mxu1 }
  0xfa   : > { %1152 = vst.msk [vmem:[%s2216_s28 + $0x20] sm:$0xf] %vm1143_vm2, %v1849_v27  ;;  %v1850_v39 = vpack.c.bf16 %v667_v35, %v667_v35  ;;  %v1422_v41 = vsel %vm497_vm1, %v1351_v33, 0.0  ;;  %v1225_v42 = vsel %vm497_vm1, %v667_v35, 0.0  ;;  %v1352_v43 = vmul.f32 %v667_v35, %v667_v35  ;;  %v2317_v32 = vpop.f32.mrb[9].mxu1 }
  0xfb   : > { %1155 = vst.msk [vmem:[%s2216_s28 + $0x2c] sm:$0xf] %vm1143_vm2, %v1852_v34  ;;  %v1423_v44 = vadd.f32 %v1422_v41, %v1421_v38  ;;  %v1226_v45 = vadd.f32 %v1225_v42, %v1224_v37  ;;  %v1426_v55 = vsel %vm497_vm1, %v1353_v40, 0.0  ;;  %v1229_v56 = vsel %vm497_vm1, %v1951_v30, 0.0 }
  0xfc   : > { %1153 = vst.msk [vmem:[%s2216_s28 + $0x24] sm:$0xf] %vm1143_vm2, %v1850_v39  ;;  %v1424_v48 = vsel %vm497_vm1, %v1352_v43, 0.0  ;;  %v1428_v2 = vsel %vm497_vm1, %v1354_v47, 0.0  ;;  %v1874_v20 = vpack.c.bf16 %v2263_v36, %v2263_v36  ;;  %v2322_v39 = vpop.f32.mrb[10].mxu1 }
  0xfd   : > { %v1228_v50 = vadd.f32 %v1227_v46, %v1226_v45  ;;  %v1425_v51 = vadd.f32 %v1424_v48, %v1423_v44  ;;  %v2327_v44 = vpop.f32.mrb[11].mxu1 }
  0xfe   : > { %v1954_v52 = vpop.f32.mrb[12].mxu0  ;;  %1177 = vst.msk [vmem:[%s2216_s28 + $0x84] sm:$0xf] %vm1143_vm2, %v1874_v20 }
  0xff   : > { %v1855_v57 = vpack.c.bf16 %v1954_v52, %v1954_v52  ;;  %v680_v58 = vpop.f32.mrb[13].mxu0  ;;  %v1427_v60 = vadd.f32 %v1426_v55, %v1425_v51  ;;  %v1230_v62 = vadd.f32 %v1229_v56, %v1228_v50  ;;  %v1357_v10 = vmul.f32 %v1954_v52, %v1954_v52 }
 0x100   : > { %v1853_v61 = vpack.c.bf16 %v680_v58, %v680_v58  ;;  %v1231_v63 = vsel %vm497_vm1, %v680_v58, 0.0  ;;  %v1955_v0 = vpop.f32.mrb[14].mxu0  ;;  %v1355_v3 = vmul.f32 %v680_v58, %v680_v58  ;;  %v1235_v16 = vsel %vm497_vm1, %v1954_v52, 0.0 }
 0x101   : > { %1158 = vst.msk [vmem:[%s2216_s28 + $0x38] sm:$0xf] %vm1143_vm2, %v1855_v57  ;;  %v1856_v4 = vpack.c.bf16 %v1955_v0, %v1955_v0  ;;  %v683_v5 = vpop.f32.mrb[15].mxu0  ;;  %v1232_v7 = vadd.f32 %v1231_v63, %v1230_v62  ;;  %v1429_v8 = vadd.f32 %v1428_v2, %v1427_v60  ;;  %v1358_v17 = vmul.f32 %v1955_v0, %v1955_v0 }
 0x102   : > { %1156 = vst.msk [vmem:[%s2216_s28 + $0x30] sm:$0xf] %vm1143_vm2, %v1853_v61  ;;  %v1854_v9 = vpack.c.bf16 %v683_v5, %v683_v5  ;;  %v1430_v11 = vsel %vm497_vm1, %v1355_v3, 0.0  ;;  %v1233_v12 = vsel %vm497_vm1, %v683_v5, 0.0  ;;  %v1356_v13 = vmul.f32 %v683_v5, %v683_v5 }
 0x103   : > { %1159 = vst.msk [vmem:[%s2216_s28 + $0x3c] sm:$0xf] %vm1143_vm2, %v1856_v4  ;;  %v1431_v14 = vadd.f32 %v1430_v11, %v1429_v8  ;;  %v1234_v15 = vadd.f32 %v1233_v12, %v1232_v7  ;;  %v1434_v27 = vsel %vm497_vm1, %v1357_v10, 0.0  ;;  %v1237_v28 = vsel %vm497_vm1, %v1955_v0, 0.0  ;;  %v2343_v0 = vpop.f32.mrb[12].mxu1 }
 0x104   : > { %1157 = vst.msk [vmem:[%s2216_s28 + $0x34] sm:$0xf] %vm1143_vm2, %v1854_v9  ;;  %v1432_v18 = vsel %vm497_vm1, %v1356_v13, 0.0  ;;  %v1436_v40 = vsel %vm497_vm1, %v1358_v17, 0.0  ;;  %v1877_v58 = vpack.c.bf16 %v2285_v59, %v2285_v59  ;;  %v1880_v63 = vpack.c.bf16 %v2290_v1, %v2290_v1  ;;  %v2349_v7 = vpop.f32.mrb[13].mxu1 }
 0x105   : > { %v1236_v21 = vadd.f32 %v1235_v16, %v1234_v15  ;;  %v1433_v22 = vadd.f32 %v1432_v18, %v1431_v14  ;;  %v2354_v13 = vpop.f32.mrb[14].mxu1 }
 0x106   : > { %v1958_v23 = vpop.f32.mrb[16].mxu0  ;;  %1180 = vst.msk [vmem:[%s2216_s28 + $0x90] sm:$0xf] %vm1143_vm2, %v1877_v58  ;;  %1183 = vst.msk [vmem:[%s2216_s28 + $0x9c] sm:$0xf] %vm1143_vm2, %v1880_v63  ;;  %v2359_v18 = vpop.f32.mrb[15].mxu1 }
 0x107   : > { %v1859_v29 = vpack.c.bf16 %v1958_v23, %v1958_v23  ;;  %v696_v30 = vpop.f32.mrb[17].mxu0  ;;  %v1435_v33 = vadd.f32 %v1434_v27, %v1433_v22  ;;  %v1238_v35 = vadd.f32 %v1237_v28, %v1236_v21  ;;  %v1361_v48 = vmul.f32 %v1958_v23, %v1958_v23 }
 0x108   : > { %v1857_v34 = vpack.c.bf16 %v696_v30, %v696_v30  ;;  %v1239_v37 = vsel %vm497_vm1, %v696_v30, 0.0  ;;  %v1959_v38 = vpop.f32.mrb[18].mxu0  ;;  %v1359_v41 = vmul.f32 %v696_v30, %v696_v30  ;;  %v1243_v55 = vsel %vm497_vm1, %v1958_v23, 0.0 }
 0x109   : > { %1162 = vst.msk [vmem:[%s2216_s28 + $0x48] sm:$0xf] %vm1143_vm2, %v1859_v29  ;;  %v1860_v42 = vpack.c.bf16 %v1959_v38, %v1959_v38  ;;  %v699_v43 = vpop.f32.mrb[19].mxu0  ;;  %v1240_v45 = vadd.f32 %v1239_v37, %v1238_v35  ;;  %v1437_v46 = vadd.f32 %v1436_v40, %v1435_v33  ;;  %v1362_v56 = vmul.f32 %v1959_v38, %v1959_v38 }
 0x10a   : > { %1160 = vst.msk [vmem:[%s2216_s28 + $0x40] sm:$0xf] %vm1143_vm2, %v1857_v34  ;;  %v1858_v47 = vpack.c.bf16 %v699_v43, %v699_v43  ;;  %v1438_v49 = vsel %vm497_vm1, %v1359_v41, 0.0  ;;  %v1241_v50 = vsel %vm497_vm1, %v699_v43, 0.0  ;;  %v1360_v51 = vmul.f32 %v699_v43, %v699_v43  ;;  %v2375_v43 = vpop.f32.mrb[16].mxu1 }
 0x10b   : > { %1163 = vst.msk [vmem:[%s2216_s28 + $0x4c] sm:$0xf] %vm1143_vm2, %v1860_v42  ;;  %v1439_v52 = vadd.f32 %v1438_v49, %v1437_v46  ;;  %v1242_v53 = vadd.f32 %v1241_v50, %v1240_v45  ;;  %v1442_v2 = vsel %vm497_vm1, %v1361_v48, 0.0  ;;  %v1245_v3 = vsel %vm497_vm1, %v1959_v38, 0.0  ;;  %v2381_v49 = vpop.f32.mrb[17].mxu1 }
 0x10c   : > { %1161 = vst.msk [vmem:[%s2216_s28 + $0x44] sm:$0xf] %vm1143_vm2, %v1858_v47  ;;  %v1440_v57 = vsel %vm497_vm1, %v1360_v51, 0.0  ;;  %v1444_v14 = vsel %vm497_vm1, %v1362_v56, 0.0  ;;  %v1878_v37 = vpack.c.bf16 %v2295_v6, %v2295_v6  ;;  %v1883_v42 = vpack.c.bf16 %v2311_v26, %v2311_v26  ;;  %v2386_v56 = vpop.f32.mrb[18].mxu1 }
 0x10d   : > { %v1244_v60 = vadd.f32 %v1243_v55, %v1242_v53  ;;  %v1441_v61 = vadd.f32 %v1440_v57, %v1439_v52 }
 0x10e   : > { %v1962_v62 = vpop.f32.mrb[20].mxu0  ;;  %1181 = vst.msk [vmem:[%s2216_s28 + $0x94] sm:$0xf] %vm1143_vm2, %v1878_v37  ;;  %1186 = vst.msk [vmem:[%s2216_s28 + $0xa8] sm:$0xf] %vm1143_vm2, %v1883_v42 }
 0x10f   : > { %v1863_v4 = vpack.c.bf16 %v1962_v62, %v1962_v62  ;;  %v712_v5 = vpop.f32.mrb[21].mxu0  ;;  %v1443_v8 = vadd.f32 %v1442_v2, %v1441_v61  ;;  %v1246_v10 = vadd.f32 %v1245_v3, %v1244_v60  ;;  %v1365_v23 = vmul.f32 %v1962_v62, %v1962_v62 }
 0x110   : > { %v1861_v9 = vpack.c.bf16 %v712_v5, %v712_v5  ;;  %v1247_v11 = vsel %vm497_vm1, %v712_v5, 0.0  ;;  %v1963_v12 = vpop.f32.mrb[22].mxu0  ;;  %v1363_v15 = vmul.f32 %v712_v5, %v712_v5  ;;  %v1251_v33 = vsel %vm497_vm1, %v1962_v62, 0.0  ;;  %v2391_v62 = vpop.f32.mrb[19].mxu1 }
 0x111   : > { %1166 = vst.msk [vmem:[%s2216_s28 + $0x58] sm:$0xf] %vm1143_vm2, %v1863_v4  ;;  %v1864_v16 = vpack.c.bf16 %v1963_v12, %v1963_v12  ;;  %v715_v17 = vpop.f32.mrb[23].mxu0  ;;  %v1248_v20 = vadd.f32 %v1247_v11, %v1246_v10  ;;  %v1445_v21 = vadd.f32 %v1444_v14, %v1443_v8  ;;  %v1366_v34 = vmul.f32 %v1963_v12, %v1963_v12 }
 0x112   : > { %1164 = vst.msk [vmem:[%s2216_s28 + $0x50] sm:$0xf] %vm1143_vm2, %v1861_v9  ;;  %v1862_v22 = vpack.c.bf16 %v715_v17, %v715_v17  ;;  %v1446_v24 = vsel %vm497_vm1, %v1363_v15, 0.0  ;;  %v1249_v27 = vsel %vm497_vm1, %v715_v17, 0.0  ;;  %v1364_v28 = vmul.f32 %v715_v17, %v715_v17 }
 0x113   : > { %1167 = vst.msk [vmem:[%s2216_s28 + $0x5c] sm:$0xf] %vm1143_vm2, %v1864_v16  ;;  %v1447_v29 = vadd.f32 %v1446_v24, %v1445_v21  ;;  %v1250_v30 = vadd.f32 %v1249_v27, %v1248_v20  ;;  %v1450_v45 = vsel %vm497_vm1, %v1365_v23, 0.0  ;;  %v1253_v46 = vsel %vm497_vm1, %v1963_v12, 0.0  ;;  %v2407_v23 = vpop.f32.mrb[20].mxu1 }
 0x114   : > { %1165 = vst.msk [vmem:[%s2216_s28 + $0x54] sm:$0xf] %vm1143_vm2, %v1862_v22  ;;  %v1448_v35 = vsel %vm497_vm1, %v1364_v28, 0.0  ;;  %v1452_v57 = vsel %vm497_vm1, %v1366_v34, 0.0  ;;  %v1881_v16 = vpack.c.bf16 %v2317_v32, %v2317_v32  ;;  %v1884_v22 = vpack.c.bf16 %v2322_v39, %v2322_v39 }
 0x115   : > { %v1252_v38 = vadd.f32 %v1251_v33, %v1250_v30  ;;  %v1449_v40 = vadd.f32 %v1448_v35, %v1447_v29  ;;  %v2413_v30 = vpop.f32.mrb[21].mxu1 }
 0x116   : > { %v1966_v41 = vpop.f32.mrb[24].mxu0  ;;  %1184 = vst.msk [vmem:[%s2216_s28 + $0xa0] sm:$0xf] %vm1143_vm2, %v1881_v16  ;;  %1187 = vst.msk [vmem:[%s2216_s28 + $0xac] sm:$0xf] %vm1143_vm2, %v1884_v22 }
 0x117   : > { %v1867_v47 = vpack.c.bf16 %v1966_v41, %v1966_v41  ;;  %v728_v48 = vpop.f32.mrb[25].mxu0  ;;  %v1451_v50 = vadd.f32 %v1450_v45, %v1449_v40  ;;  %v1254_v52 = vadd.f32 %v1253_v46, %v1252_v38  ;;  %v1369_v4 = vmul.f32 %v1966_v41, %v1966_v41  ;;  %v2418_v40 = vpop.f32.mrb[22].mxu1 }
 0x118   : > { %v1865_v51 = vpack.c.bf16 %v728_v48, %v728_v48  ;;  %v1255_v53 = vsel %vm497_vm1, %v728_v48, 0.0  ;;  %v1967_v55 = vpop.f32.mrb[26].mxu0  ;;  %v1367_v58 = vmul.f32 %v728_v48, %v728_v48  ;;  %v1259_v12 = vsel %vm497_vm1, %v1966_v41, 0.0 }
 0x119   : > { %1170 = vst.msk [vmem:[%s2216_s28 + $0x68] sm:$0xf] %vm1143_vm2, %v1867_v47  ;;  %v1868_v60 = vpack.c.bf16 %v1967_v55, %v1967_v55  ;;  %v731_v61 = vpop.f32.mrb[27].mxu0  ;;  %v1256_v63 = vadd.f32 %v1255_v53, %v1254_v52  ;;  %v1453_v2 = vadd.f32 %v1452_v57, %v1451_v50  ;;  %v1370_v14 = vmul.f32 %v1967_v55, %v1967_v55  ;;  %v2423_v47 = vpop.f32.mrb[23].mxu1 }
 0x11a   : > { %1168 = vst.msk [vmem:[%s2216_s28 + $0x60] sm:$0xf] %vm1143_vm2, %v1865_v51  ;;  %v1866_v3 = vpack.c.bf16 %v731_v61, %v731_v61  ;;  %v1454_v5 = vsel %vm497_vm1, %v1367_v58, 0.0  ;;  %v1257_v8 = vsel %vm497_vm1, %v731_v61, 0.0  ;;  %v1368_v9 = vmul.f32 %v731_v61, %v731_v61 }
 0x11b   : > { %1171 = vst.msk [vmem:[%s2216_s28 + $0x6c] sm:$0xf] %vm1143_vm2, %v1868_v60  ;;  %v1455_v10 = vadd.f32 %v1454_v5, %v1453_v2  ;;  %v1258_v11 = vadd.f32 %v1257_v8, %v1256_v63  ;;  %v1458_v24 = vsel %vm497_vm1, %v1369_v4, 0.0  ;;  %v1261_v27 = vsel %vm497_vm1, %v1967_v55, 0.0 }
 0x11c   : > { %1169 = vst.msk [vmem:[%s2216_s28 + $0x64] sm:$0xf] %vm1143_vm2, %v1866_v3  ;;  %v1456_v15 = vsel %vm497_vm1, %v1368_v9, 0.0  ;;  %v1460_v41 = vsel %vm497_vm1, %v1370_v14, 0.0  ;;  %v1375_v61 = vmul.f32 %v2253_v25, %v2253_v25  ;;  %v1882_v4 = vpack.c.bf16 %v2327_v44, %v2327_v44 }
 0x11d   : > { %v1260_v17 = vadd.f32 %v1259_v12, %v1258_v11  ;;  %v1457_v20 = vadd.f32 %v1456_v15, %v1455_v10  ;;  %v1887_v9 = vpack.c.bf16 %v2343_v0, %v2343_v0  ;;  %v2441_v10 = vpop.f32.mrb[24].mxu1  ;;  %v1271_v14 = vsel %vm497_vm1, %v2253_v25, 0.0 }
 0x11e   : > { %v1970_v21 = vpop.f32.mrb[28].mxu0  ;;  %1185 = vst.msk [vmem:[%s2216_s28 + $0xa4] sm:$0xf] %vm1143_vm2, %v1882_v4  ;;  %v1885_v15 = vpack.c.bf16 %v2349_v7, %v2349_v7  ;;  %v2451_v16 = vpop.f32.mrb[25].mxu1  ;;  %v1376_v25 = vmul.f32 %v2263_v36, %v2263_v36 }
 0x11f   : > { %v1871_v28 = vpack.c.bf16 %v1970_v21, %v1970_v21  ;;  %v744_v29 = vpop.f32.mrb[29].mxu0  ;;  %v1459_v33 = vadd.f32 %v1458_v24, %v1457_v20  ;;  %v1262_v35 = vadd.f32 %v1261_v27, %v1260_v17  ;;  %v1373_v52 = vmul.f32 %v1970_v21, %v1970_v21  ;;  %1190 = vst.msk [vmem:[%s2216_s28 + $0xb8] sm:$0xf] %vm1143_vm2, %v1887_v9 }
 0x120   : > { %v1869_v34 = vpack.c.bf16 %v744_v29, %v744_v29  ;;  %v1263_v37 = vsel %vm497_vm1, %v744_v29, 0.0  ;;  %v1971_v38 = vpop.f32.mrb[30].mxu0  ;;  %v1371_v42 = vmul.f32 %v744_v29, %v744_v29  ;;  %v1267_v63 = vsel %vm497_vm1, %v1970_v21, 0.0  ;;  %v2455_v21 = vpop.f32.mrb[26].mxu1  ;;  %1188 = vst.msk [vmem:[%s2216_s28 + $0xb0] sm:$0xf] %vm1143_vm2, %v1885_v15 }
 0x121   : > { %1174 = vst.msk [vmem:[%s2216_s28 + $0x78] sm:$0xf] %vm1143_vm2, %v1871_v28  ;;  %v1872_v45 = vpack.c.bf16 %v1971_v38, %v1971_v38  ;;  %v747_v46 = vpop.f32.mrb[31].mxu0  ;;  %v1264_v48 = vadd.f32 %v1263_v37, %v1262_v35  ;;  %v1461_v50 = vadd.f32 %v1460_v41, %v1459_v33  ;;  %v1374_v2 = vmul.f32 %v1971_v38, %v1971_v38  ;;  %v2465_v28 = vpop.f32.mrb[27].mxu1 }
 0x122   : > { %1172 = vst.msk [vmem:[%s2216_s28 + $0x70] sm:$0xf] %vm1143_vm2, %v1869_v34  ;;  %v1870_v51 = vpack.c.bf16 %v747_v46, %v747_v46  ;;  %v1462_v53 = vsel %vm497_vm1, %v1371_v42, 0.0  ;;  %v1265_v55 = vsel %vm497_vm1, %v747_v46, 0.0  ;;  %v1372_v57 = vmul.f32 %v747_v46, %v747_v46 }
 0x123   : > { %1175 = vst.msk [vmem:[%s2216_s28 + $0x7c] sm:$0xf] %vm1143_vm2, %v1872_v45  ;;  %v1463_v58 = vadd.f32 %v1462_v53, %v1461_v50  ;;  %v1266_v60 = vadd.f32 %v1265_v55, %v1264_v48  ;;  %v1466_v11 = vsel %vm497_vm1, %v1373_v52, 0.0  ;;  %v1269_v12 = vsel %vm497_vm1, %v1971_v38, 0.0  ;;  %v2492_v53 = vpop.f32.mrb[28].mxu1 }
 0x124   : > { %1173 = vst.msk [vmem:[%s2216_s28 + $0x74] sm:$0xf] %vm1143_vm2, %v1870_v51  ;;  %v1464_v3 = vsel %vm497_vm1, %v1372_v57, 0.0  ;;  %v1468_v22 = vsel %vm497_vm1, %v1374_v2, 0.0  ;;  %v1470_v24 = vsel %vm497_vm1, %v1375_v61, 0.0  ;;  %v1888_v27 = vpack.c.bf16 %v2354_v13, %v2354_v13  ;;  %v2503_v61 = vpop.f32.mrb[29].mxu1 }
 0x125   : > { %v1268_v5 = vadd.f32 %v1267_v63, %v1266_v60  ;;  %v1465_v8 = vadd.f32 %v1464_v3, %v1463_v58  ;;  %v1886_v34 = vpack.c.bf16 %v2359_v18, %v2359_v18  ;;  %v1377_v35 = vmul.f32 %v2247_v19, %v2247_v19  ;;  %v2507_v3 = vpop.f32.mrb[30].mxu1 }
 0x126   : > { %v1273_v37 = vsel %vm497_vm1, %v2263_v36, 0.0  ;;  %1191 = vst.msk [vmem:[%s2216_s28 + $0xbc] sm:$0xf] %vm1143_vm2, %v1888_v27  ;;  %v1891_v38 = vpack.c.bf16 %v2375_v43, %v2375_v43  ;;  %v1275_v41 = vsel %vm497_vm1, %v2247_v19, 0.0  ;;  %v1378_v46 = vmul.f32 %v2256_v31, %v2256_v31 }
 0x127   : > { %v1467_v17 = vadd.f32 %v1466_v11, %v1465_v8  ;;  %v1270_v20 = vadd.f32 %v1269_v12, %v1268_v5  ;;  %1189 = vst.msk [vmem:[%s2216_s28 + $0xb4] sm:$0xf] %vm1143_vm2, %v1886_v34  ;;  %v1472_v48 = vsel %vm497_vm1, %v1376_v25, 0.0  ;;  %v1379_v36 = vmul.f32 %v2285_v59, %v2285_v59  ;;  %v2517_v8 = vpop.f32.mrb[31].mxu1 }
 0x128   : > { %1194 = vst.msk [vmem:[%s2216_s28 + $0xc8] sm:$0xf] %vm1143_vm2, %v1891_v38  ;;  %v1889_v50 = vpack.c.bf16 %v2381_v49, %v2381_v49  ;;  %v1892_v52 = vpack.c.bf16 %v2386_v56, %v2386_v56  ;;  %v1474_v55 = vsel %vm497_vm1, %v1377_v35, 0.0  ;;  %v1277_v57 = vsel %vm497_vm1, %v2256_v31, 0.0 }
 0x129   : > { %v1272_v29 = vadd.f32 %v1271_v14, %v1270_v20  ;;  %v1469_v33 = vadd.f32 %v1468_v22, %v1467_v17  ;;  %v1279_v58 = vsel %vm497_vm1, %v2285_v59, 0.0  ;;  %v1890_v60 = vpack.c.bf16 %v2391_v62, %v2391_v62 }
 0x12a   : > { %1192 = vst.msk [vmem:[%s2216_s28 + $0xc0] sm:$0xf] %vm1143_vm2, %v1889_v50  ;;  %1195 = vst.msk [vmem:[%s2216_s28 + $0xcc] sm:$0xf] %vm1143_vm2, %v1892_v52  ;;  %v1476_v4 = vsel %vm497_vm1, %v1378_v46, 0.0  ;;  %v1478_v31 = vsel %vm497_vm1, %v1379_v36, 0.0  ;;  %v1380_v59 = vmul.f32 %v2295_v6, %v2295_v6  ;;  %v1895_v5 = vpack.c.bf16 %v2407_v23, %v2407_v23 }
 0x12b   : > { %v1471_v42 = vadd.f32 %v1470_v24, %v1469_v33  ;;  %v1274_v45 = vadd.f32 %v1273_v37, %v1272_v29  ;;  %1193 = vst.msk [vmem:[%s2216_s28 + $0xc4] sm:$0xf] %vm1143_vm2, %v1890_v60  ;;  %v1893_v12 = vpack.c.bf16 %v2413_v30, %v2413_v30  ;;  %v1381_v14 = vmul.f32 %v2279_v54, %v2279_v54 }
 0x12c   : > { %v1281_v15 = vsel %vm497_vm1, %v2295_v6, 0.0  ;;  %1198 = vst.msk [vmem:[%s2216_s28 + $0xd8] sm:$0xf] %vm1143_vm2, %v1895_v5  ;;  %v1896_v17 = vpack.c.bf16 %v2418_v40, %v2418_v40  ;;  %v1283_v20 = vsel %vm497_vm1, %v2279_v54, 0.0  ;;  %v1382_v25 = vmul.f32 %v2290_v1, %v2290_v1 }
 0x12d   : > { %v1276_v19 = vadd.f32 %v1275_v41, %v1274_v45  ;;  %v1473_v51 = vadd.f32 %v1472_v48, %v1471_v42  ;;  %1196 = vst.msk [vmem:[%s2216_s28 + $0xd0] sm:$0xf] %vm1143_vm2, %v1893_v12  ;;  %v1480_v27 = vsel %vm497_vm1, %v1380_v59, 0.0  ;;  %v1383_v6 = vmul.f32 %v2317_v32, %v2317_v32 }
 0x12e   : > { %1199 = vst.msk [vmem:[%s2216_s28 + $0xdc] sm:$0xf] %vm1143_vm2, %v1896_v17  ;;  %v1894_v29 = vpack.c.bf16 %v2423_v47, %v2423_v47  ;;  %v1899_v34 = vpack.c.bf16 %v2441_v10, %v2441_v10  ;;  %v1482_v35 = vsel %vm497_vm1, %v1381_v14, 0.0  ;;  %v1285_v37 = vsel %vm497_vm1, %v2290_v1, 0.0 }
 0x12f   : > { %v1475_v63 = vadd.f32 %v1474_v55, %v1473_v51  ;;  %v1278_v2 = vadd.f32 %v1277_v57, %v1276_v19  ;;  %v1287_v38 = vsel %vm497_vm1, %v2317_v32, 0.0  ;;  %v1897_v41 = vpack.c.bf16 %v2451_v16, %v2451_v16 }
 0x130   : > { %1197 = vst.msk [vmem:[%s2216_s28 + $0xd4] sm:$0xf] %vm1143_vm2, %v1894_v29  ;;  %1202 = vst.msk [vmem:[%s2216_s28 + $0xe8] sm:$0xf] %vm1143_vm2, %v1899_v34  ;;  %v1484_v46 = vsel %vm497_vm1, %v1382_v25, 0.0  ;;  %v1486_v48 = vsel %vm497_vm1, %v1383_v6, 0.0  ;;  %v1384_v1 = vmul.f32 %v2327_v44, %v2327_v44  ;;  %v1900_v32 = vpack.c.bf16 %v2455_v21, %v2455_v21 }
 0x131   : > { %v1280_v9 = vadd.f32 %v1279_v58, %v1278_v2  ;;  %v1477_v11 = vadd.f32 %v1476_v4, %v1475_v63  ;;  %1200 = vst.msk [vmem:[%s2216_s28 + $0xe0] sm:$0xf] %vm1143_vm2, %v1897_v41  ;;  %v1898_v19 = vpack.c.bf16 %v2465_v28, %v2465_v28  ;;  %v1385_v51 = vmul.f32 %v2311_v26, %v2311_v26 }
 0x132   : > { %v1289_v52 = vsel %vm497_vm1, %v2327_v44, 0.0  ;;  %1203 = vst.msk [vmem:[%s2216_s28 + $0xec] sm:$0xf] %vm1143_vm2, %v1900_v32  ;;  %v1903_v55 = vpack.c.bf16 %v2492_v53, %v2492_v53  ;;  %v1291_v57 = vsel %vm497_vm1, %v2311_v26, 0.0  ;;  %v1386_v63 = vmul.f32 %v2322_v39, %v2322_v39 }
 0x133   : > { %v1479_v22 = vadd.f32 %v1478_v31, %v1477_v11  ;;  %v1282_v24 = vadd.f32 %v1281_v15, %v1280_v9  ;;  %1201 = vst.msk [vmem:[%s2216_s28 + $0xe4] sm:$0xf] %vm1143_vm2, %v1898_v19  ;;  %v1488_v2 = vsel %vm497_vm1, %v1384_v1, 0.0  ;;  %v1387_v44 = vmul.f32 %v2349_v7, %v2349_v7 }
 0x134   : > { %1206 = vst.msk [vmem:[%s2216_s28 + $0xf8] sm:$0xf] %vm1143_vm2, %v1903_v55  ;;  %v1901_v4 = vpack.c.bf16 %v2503_v61, %v2503_v61  ;;  %v1904_v59 = vpack.c.bf16 %v2507_v3, %v2507_v3  ;;  %v1490_v5 = vsel %vm497_vm1, %v1385_v51, 0.0  ;;  %v1293_v9 = vsel %vm497_vm1, %v2322_v39, 0.0 }
 0x135   : > { %v1284_v54 = vadd.f32 %v1283_v20, %v1282_v24  ;;  %v1481_v33 = vadd.f32 %v1480_v27, %v1479_v22  ;;  %v1295_v11 = vsel %vm497_vm1, %v2349_v7, 0.0  ;;  %v1902_v12 = vpack.c.bf16 %v2517_v8, %v2517_v8 }
 0x136   : > { %1204 = vst.msk [vmem:[%s2216_s28 + $0xf0] sm:$0xf] %vm1143_vm2, %v1901_v4  ;;  %1207 = vst.msk [vmem:[%s2216_s28 + $0xfc] sm:$0xf] %vm1143_vm2, %v1904_v59  ;;  %v1492_v17 = vsel %vm497_vm1, %v1386_v63, 0.0  ;;  %v1494_v20 = vsel %vm497_vm1, %v1387_v44, 0.0  ;;  %v1388_v22 = vmul.f32 %v2359_v18, %v2359_v18  ;;  %v1389_v24 = vmul.f32 %v2343_v0, %v2343_v0 }
 0x137   : > { %v1483_v42 = vadd.f32 %v1482_v35, %v1481_v33  ;;  %v1286_v45 = vadd.f32 %v1285_v37, %v1284_v54  ;;  %1205 = vst.msk [vmem:[%s2216_s28 + $0xf4] sm:$0xf] %vm1143_vm2, %v1902_v12  ;;  %v1297_v25 = vsel %vm497_vm1, %v2359_v18, 0.0  ;;  %v1299_v29 = vsel %vm497_vm1, %v2343_v0, 0.0 }
 0x138   : > { %v1390_v54 = vmul.f32 %v2354_v13, %v2354_v13  ;;  %v1496_v33 = vsel %vm497_vm1, %v1388_v22, 0.0  ;;  %v1391_v34 = vmul.f32 %v2381_v49, %v2381_v49  ;;  %v1301_v18 = vsel %vm497_vm1, %v2354_v13, 0.0 }
 0x139   : > { %v1288_v36 = vadd.f32 %v1287_v38, %v1286_v45  ;;  %v1485_v50 = vadd.f32 %v1484_v46, %v1483_v42  ;;  %v1498_v38 = vsel %vm497_vm1, %v1389_v24, 0.0  ;;  %v1303_v41 = vsel %vm497_vm1, %v2381_v49, 0.0 }
 0x13a   : > { %v1500_v45 = vsel %vm497_vm1, %v1390_v54, 0.0  ;;  %v1502_v46 = vsel %vm497_vm1, %v1391_v34, 0.0  ;;  %v1305_v13 = vsel %vm497_vm1, %v2391_v62, 0.0  ;;  %v1307_v49 = vsel %vm497_vm1, %v2375_v43, 0.0 }
 0x13b   : > { %v1487_v58 = vadd.f32 %v1486_v48, %v1485_v50  ;;  %v1290_v60 = vadd.f32 %v1289_v52, %v1288_v36  ;;  %v1392_v48 = vmul.f32 %v2391_v62, %v2391_v62  ;;  %v1393_v36 = vmul.f32 %v2375_v43, %v2375_v43 }
 0x13c   : > { %v1394_v51 = vmul.f32 %v2386_v56, %v2386_v56  ;;  %v1395_v55 = vmul.f32 %v2413_v30, %v2413_v30  ;;  %v1309_v62 = vsel %vm497_vm1, %v2386_v56, 0.0  ;;  %v1311_v63 = vsel %vm497_vm1, %v2413_v30, 0.0 }
 0x13d   : > { %v1292_v26 = vadd.f32 %v1291_v57, %v1290_v60  ;;  %v1489_v31 = vadd.f32 %v1488_v2, %v1487_v58  ;;  %v1504_v52 = vsel %vm497_vm1, %v1392_v48, 0.0  ;;  %v1506_v60 = vsel %vm497_vm1, %v1393_v36, 0.0 }
 0x13e   : > { %v1508_v44 = vsel %vm497_vm1, %v1394_v51, 0.0  ;;  %v1510_v4 = vsel %vm497_vm1, %v1395_v55, 0.0  ;;  %v1313_v56 = vsel %vm497_vm1, %v2423_v47, 0.0  ;;  %v1315_v30 = vsel %vm497_vm1, %v2407_v23, 0.0 }
 0x13f   : > { %v1491_v14 = vadd.f32 %v1490_v5, %v1489_v31  ;;  %v1294_v15 = vadd.f32 %v1293_v9, %v1292_v26  ;;  %v1396_v26 = vmul.f32 %v2423_v47, %v2423_v47  ;;  %v1397_v5 = vmul.f32 %v2407_v23, %v2407_v23 }
 0x140   : > { %v1398_v12 = vmul.f32 %v2418_v40, %v2418_v40  ;;  %v1317_v47 = vsel %vm497_vm1, %v2418_v40, 0.0  ;;  %v1401_v54 = vmul.f32 %v2441_v10, %v2441_v10  ;;  %v1321_v40 = vsel %vm497_vm1, %v2465_v28, 0.0 }
 0x141   : > { %v1296_v39 = vadd.f32 %v1295_v11, %v1294_v15  ;;  %v1493_v7 = vadd.f32 %v1492_v17, %v1491_v14  ;;  %v1512_v14 = vsel %vm497_vm1, %v1396_v26, 0.0  ;;  %v1399_v15 = vmul.f32 %v2451_v16, %v2451_v16 }
 0x142   : > { %v1514_v22 = vsel %vm497_vm1, %v1397_v5, 0.0  ;;  %v1516_v24 = vsel %vm497_vm1, %v1398_v12, 0.0 }
 0x143   : > { %v1495_v27 = vadd.f32 %v1494_v20, %v1493_v7  ;;  %v1298_v6 = vadd.f32 %v1297_v25, %v1296_v39  ;;  %v1319_v39 = vsel %vm497_vm1, %v2451_v16, 0.0  ;;  %v1518_v25 = vsel %vm497_vm1, %v1399_v15, 0.0 }
 0x144   : > { %v1323_v16 = vsel %vm497_vm1, %v2441_v10, 0.0 }
 0x145   : > { %v1300_v35 = vadd.f32 %v1299_v29, %v1298_v6  ;;  %v1497_v37 = vadd.f32 %v1496_v33, %v1495_v27  ;;  %v1400_v27 = vmul.f32 %v2465_v28, %v2465_v28  ;;  %v1325_v28 = vsel %vm497_vm1, %v2455_v21, 0.0 }
 0x147   : > { %v1499_v42 = vadd.f32 %v1498_v38, %v1497_v37  ;;  %v1302_v0 = vadd.f32 %v1301_v18, %v1300_v35  ;;  %v1402_v35 = vmul.f32 %v2455_v21, %v2455_v21  ;;  %v1520_v37 = vsel %vm497_vm1, %v1400_v27, 0.0 }
 0x148   : > { %v1403_v38 = vmul.f32 %v2503_v61, %v2503_v61  ;;  %v1329_v21 = vsel %vm497_vm1, %v2517_v8, 0.0 }
 0x149   : > { %v1304_v1 = vadd.f32 %v1303_v41, %v1302_v0  ;;  %v1501_v32 = vadd.f32 %v1500_v45, %v1499_v42  ;;  %v1522_v42 = vsel %vm497_vm1, %v1401_v54, 0.0  ;;  %v1327_v0 = vsel %vm497_vm1, %v2503_v61, 0.0 }
 0x14a   : > { %v1526_v48 = vsel %vm497_vm1, %v1403_v38, 0.0 }
 0x14b   : > { %v1503_v50 = vadd.f32 %v1502_v46, %v1501_v32  ;;  %v1306_v19 = vadd.f32 %v1305_v13, %v1304_v1  ;;  %v1524_v46 = vsel %vm497_vm1, %v1402_v35, 0.0  ;;  %v1404_v1 = vmul.f32 %v2517_v8, %v2517_v8 }
 0x14c   : > { %v1405_v13 = vmul.f32 %v2492_v53, %v2492_v53 }
 0x14d   : > { %v1308_v57 = vadd.f32 %v1307_v49, %v1306_v19  ;;  %v1505_v58 = vadd.f32 %v1504_v52, %v1503_v50  ;;  %v1331_v19 = vsel %vm497_vm1, %v2492_v53, 0.0  ;;  %v1406_v49 = vmul.f32 %v2507_v3, %v2507_v3 }
 0x14e   : > { %v1528_v51 = vsel %vm497_vm1, %v1404_v1, 0.0 }
 0x14f   : > { %v1507_v2 = vadd.f32 %v1506_v60, %v1505_v58  ;;  %v1310_v43 = vadd.f32 %v1309_v62, %v1308_v57  ;;  %v1530_v57 = vsel %vm497_vm1, %v1405_v13, 0.0  ;;  %v1333_v58 = vsel %vm497_vm1, %v2507_v3, 0.0 }
 0x150   : > { %v1532_v62 = vsel %vm497_vm1, %v1406_v49, 0.0 }
 0x151   : > { %v1312_v31 = vadd.f32 %v1311_v63, %v1310_v43  ;;  %v1509_v59 = vadd.f32 %v1508_v44, %v1507_v2 }
 0x153   : > { %v1511_v9 = vadd.f32 %v1510_v4, %v1509_v59  ;;  %v1314_v11 = vadd.f32 %v1313_v56, %v1312_v31 }
 0x155   : > { %v1316_v17 = vadd.f32 %v1315_v30, %v1314_v11  ;;  %v1513_v20 = vadd.f32 %v1512_v14, %v1511_v9 }
 0x157   : > { %v1515_v7 = vadd.f32 %v1514_v22, %v1513_v20  ;;  %v1318_v23 = vadd.f32 %v1317_v47, %v1316_v17 }
 0x159   : > { %v1320_v6 = vadd.f32 %v1319_v39, %v1318_v23  ;;  %v1517_v29 = vadd.f32 %v1516_v24, %v1515_v7 }
 0x15b   : > { %v1519_v33 = vadd.f32 %v1518_v25, %v1517_v29  ;;  %v1322_v34 = vadd.f32 %v1321_v40, %v1320_v6 }
 0x15d   : > { %v1324_v18 = vadd.f32 %v1323_v16, %v1322_v34  ;;  %v1521_v41 = vadd.f32 %v1520_v37, %v1519_v33 }
 0x15f   : > { %v1523_v45 = vadd.f32 %v1522_v42, %v1521_v41  ;;  %v1326_v10 = vadd.f32 %v1325_v28, %v1324_v18 }
 0x161   : > { %v1328_v32 = vadd.f32 %v1327_v0, %v1326_v10  ;;  %v1525_v36 = vadd.f32 %v1524_v46, %v1523_v45 }
 0x163   : > { %v1527_v50 = vadd.f32 %v1526_v48, %v1525_v36  ;;  %v1330_v61 = vadd.f32 %v1329_v21, %v1328_v32 }
 0x165   : > { %v1332_v52 = vadd.f32 %v1331_v19, %v1330_v61  ;;  %v1529_v55 = vadd.f32 %v1528_v51, %v1527_v50 }
 0x167   : > { %v1334_v60 = vadd.f32 %v1333_v58, %v1332_v52  ;;  %v1531_v8 = vadd.f32 %v1530_v57, %v1529_v55 }
 0x169   : > { %v1335_v63 = vrot.slane %v1334_v60, 4  ;;  %v1533_v2 = vadd.f32 %v1532_v62, %v1531_v8 }
 0x16b   : > { %v1336_v53 = vadd.f32 %v1335_v63, %v1334_v60  ;;  %v1534_v43 = vrot.slane %v1533_v2, 4 }
 0x16d   : > { %v1337_v44 = vrot.slane %v1336_v53, 2  ;;  %v1535_v4 = vadd.f32 %v1534_v43, %v1533_v2 }
 0x16f   : > { %v1338_v26 = vadd.f32 %v1337_v44, %v1336_v53  ;;  %v1536_v31 = vrot.slane %v1535_v4, 2 }
 0x171   : > { %v1339_v59 = vrot.slane %v1338_v26, 1  ;;  %v1537_v5 = vadd.f32 %v1536_v31, %v1535_v4 }
 0x173   : > { %v1340_v3 = vadd.f32 %v1339_v59, %v1338_v26  ;;  %v1538_v56 = vrot.slane %v1537_v5, 1 }
 0x175   : > { %1342 = vst.msk [vmem:[%s264_s5] sm:$0x1] %vm1341_vm3, %v1340_v3  ;;  %v1539_v9 = vadd.f32 %v1538_v56, %v1537_v5 }
 0x177   : > { %1540 = vst.msk [vmem:[%s270_s8] sm:$0x1] %vm1341_vm3, %v1539_v9 }
 0x178 PF: > { %s15_s17 = sadd.s32 1, %s2086_s17   ;;  %s2720_s15 = smov %s2082_s16 }
 0x179   : > { %p12_p6 = scmp.ge.s32.totalorder %s15_s17, 6   ;;  %s2721_s16 = smov %s2723_s18 }
 0x17b   :  { %14 = sbr.rel (!%p12_p6) target bundleno = 2 (0x2), region = 85 }

// kernel: decoder_forward.11
= control target key start
LH: loop header
LB: loop body
LE: loop exit
PB: predicated region body
PF: predicated region fallthrough
CT: control target
= control target key end

     0   :  { %s2542_s9 = smov 0   ;;  %s2544_s10 = smov 0   ;;  %s2832_s0 = inlined_call_operand.vmem [shape: bf16[2048,36], index: 0, kind: input, shape index: {}]   ;;  %s2833_s1 = inlined_call_operand.vmem [shape: bf16[36,128], index: 1, kind: input, shape index: {}]   ;;  %s2834_s2 = inlined_call_operand.vmem [shape: bf16[2048,128], index: 2, kind: output, shape index: {}]  }
   0x1   :  { %s2546_s11 = smov 0  }
   0x2 LB: > { %s24_s12 = sadd.s32 1, %s2521_s10  ;;  %p1618_p0 = scmp.ge.s32.totalorder %s2525_s11, 1  ;;  %s2525_s11 = sphi %s2546_s11, %s12_s11   ;;  %s2521_s10 = sphi %s2544_s10, %s2836_s10   ;;  %s2517_s9 = sphi %s2542_s9, %s2835_s9  }
   0x3   : > { %p26_p1 = scmp.ge.s32.totalorder %s24_s12, 4  ;;  %p136_p2 = scmp.lt.s32.totalorder %s2525_s11, 5 }
   0x5   : > { %s2838_s12 = smov (%p26_p1, %s24_s12), 0  ;;  %p137_p3 = pnand %p1618_p0, %p136_p2 }
   0x6   : > { %v2212_v0 = vld [vmem:[%s2833_s1] sm:$0xff] (!%p137_p3)   ;;  %v2213_v1 = vld [vmem:[%s2833_s1 + $0x8] sm:$0xff] (!%p137_p3)   ;;  %s1619_s17 = sshll.u32 (!%p137_p3), %s2517_s9, 6  ;;  %v2214_v2 = vld [vmem:[%s2833_s1 + $0x10] ss:$0 sps:$4 sm:$0x33] (!%p137_p3)  }
   0x7   : > { %140 = sbr.rel (%p137_p3) target bundleno = 377 (0x179), region = 28  ;;  %2110 = vmatprep.subr.bf16.mxu0 (!%p137_p3), %v2212_v0  ;;  %2180 = vmatprep.subr.bf16.mxu1 (!%p137_p3), %v2212_v0  ;;  %p166_p4 = scmp.lt.s32.totalorder (!%p137_p3), %s1619_s17, 255  ;;  %vm526_vm0 = vcmask (!%p137_p3), 1041408   ;;  %vm429_vm1 = vcmask (!%p137_p3), 293888  }
   0x8   : > { %2111 = vmatpush3.bf16.msra.mxu0 (!%p137_p3), %v2212_v0  ;;  %2183 = vmatpush3.bf16.msra.mxu1 (!%p137_p3), %v2212_v0  ;;  %v528_v3 = vsel (!%p137_p3), %vm526_vm0, %v2214_v2, 0 }
   0x9   : > { %2112 = vmatprep.subr.bf16.mxu0 (!%p137_p3), %v2213_v1  ;;  %2181 = vmatprep.subr.bf16.mxu1 (!%p137_p3), %v2213_v1 }
   0xc   : > { %2113 = vmatpush3.bf16.msra.mxu0 (!%p137_p3), %v2213_v1  ;;  %2184 = vmatpush3.bf16.msra.mxu1 (!%p137_p3), %v2213_v1 }
   0xd   : > { %2186 = vmatprep.subr.msk.bf16.mxu0 (!%p137_p3), %vm526_vm0, %v2214_v2  ;;  %2187 = vmatprep.subr.msk.bf16.mxu1 (!%p137_p3), %vm526_vm0, %v2214_v2 }
   0xe   : > { %s2840_s17 = smov (!%p166_p4, %s1619_s17), 255 }
   0xf   : > { %s1620_s20 = sshll.u32 %s2840_s17, 2 }
  0x10   : > { %s2577_s23 = scalar_lea.vmem %s2832_s0, %s1620_s20  ;;  %2115 = vmatpush3.bf16.msra.mxu0 %v528_v3  ;;  %2185 = vmatpush3.bf16.msra.mxu1 %v528_v3  ;;  %s2666_s26 = scalar_lea.vmem %s2834_s2, %s1620_s20 }
  0x11   : > { %v2215_v4 = vld [vmem:[%s2577_s23] sm:$0xff]   ;;  %v2217_v6 = vld [vmem:[%s2577_s23 + $0x8] sm:$0xff]   ;;  %v2219_v8 = vld [vmem:[%s2577_s23 + $0x10] sm:$0xff]  }
  0x12   : > { %v2216_v5 = vld [vmem:[%s2577_s23 + $0x80] sm:$0xff]   ;;  %2116 = vmatprep.mubr.msk.bf16.mxu0 %vm429_vm1, %v2215_v4  ;;  %v2218_v7 = vld [vmem:[%s2577_s23 + $0x88] sm:$0xff]   ;;  %v2220_v9 = vld [vmem:[%s2577_s23 + $0x90] sm:$0xff]  }
  0x13   : > { %2148 = vmatprep.mubr.msk.bf16.mxu1 %vm429_vm1, %v2216_v5  ;;  %2117 = vmatmul.mubr.msk.bf16.vlgmr.msra.gmra.mrb[0].mxu0 %vm429_vm1, %v2217_v6  ;;  %v2221_v10 = vld [vmem:[%s2577_s23 + $0x18] sm:$0xff]   ;;  %v2223_v12 = vld [vmem:[%s2577_s23 + $0x20] sm:$0xff]   ;;  %v2225_v14 = vld [vmem:[%s2577_s23 + $0x28] sm:$0xff]  }
  0x14   : > { %2149 = vmatmul.mubr.msk.bf16.vlgmr.msra.gmra.mrb[0].mxu1 %vm429_vm1, %v2218_v7  ;;  %2120 = vmatprep.mubr.msk.bf16.mxu0 %vm429_vm1, %v2219_v8  ;;  %v2222_v11 = vld [vmem:[%s2577_s23 + $0x98] sm:$0xff]   ;;  %v2224_v13 = vld [vmem:[%s2577_s23 + $0xa0] sm:$0xff]   ;;  %v2226_v15 = vld [vmem:[%s2577_s23 + $0xa8] sm:$0xff]  }
  0x15   : > { %2152 = vmatprep.mubr.msk.bf16.mxu1 %vm429_vm1, %v2220_v9  ;;  %v2227_v16 = vld [vmem:[%s2577_s23 + $0x30] sm:$0xff]   ;;  %v2229_v18 = vld [vmem:[%s2577_s23 + $0x38] sm:$0xff]   ;;  %v2231_v20 = vld [vmem:[%s2577_s23 + $0x40] sm:$0xff]  }
  0x16   : > { %v2228_v17 = vld [vmem:[%s2577_s23 + $0xb0] sm:$0xff]   ;;  %v2230_v19 = vld [vmem:[%s2577_s23 + $0xb8] sm:$0xff]   ;;  %v2232_v21 = vld [vmem:[%s2577_s23 + $0xc0] sm:$0xff]  }
  0x17   : > { %v2233_v22 = vld [vmem:[%s2577_s23 + $0x48] sm:$0xff]   ;;  %v2235_v24 = vld [vmem:[%s2577_s23 + $0x50] sm:$0xff]   ;;  %v2237_v26 = vld [vmem:[%s2577_s23 + $0x58] sm:$0xff]  }
  0x18   : > { %v2234_v23 = vld [vmem:[%s2577_s23 + $0xc8] sm:$0xff]   ;;  %v2236_v25 = vld [vmem:[%s2577_s23 + $0xd0] sm:$0xff]   ;;  %v2238_v27 = vld [vmem:[%s2577_s23 + $0xd8] sm:$0xff]  }
  0x19   : > { %v2239_v28 = vld [vmem:[%s2577_s23 + $0x60] sm:$0xff]   ;;  %v2241_v30 = vld [vmem:[%s2577_s23 + $0x68] sm:$0xff]   ;;  %v2243_v32 = vld [vmem:[%s2577_s23 + $0x70] sm:$0xff]  }
  0x1a   : > { %v2240_v29 = vld [vmem:[%s2577_s23 + $0xe0] sm:$0xff]   ;;  %v2242_v31 = vld [vmem:[%s2577_s23 + $0xe8] sm:$0xff]   ;;  %v2244_v33 = vld [vmem:[%s2577_s23 + $0xf0] sm:$0xff]  }
  0x1b   : > { %2121 = vmatmul.mubr.msk.bf16.gmra.mrb[4].mxu0 %vm429_vm1, %v2221_v10  ;;  %v2245_v34 = vld [vmem:[%s2577_s23 + $0x78] sm:$0xff]  }
  0x1c   : > { %2153 = vmatmul.mubr.msk.bf16.gmra.mrb[4].mxu1 %vm429_vm1, %v2222_v11  ;;  %2124 = vmatprep.mubr.msk.bf16.mxu0 %vm429_vm1, %v2223_v12  ;;  %v2246_v35 = vld [vmem:[%s2577_s23 + $0xf8] sm:$0xff]  }
  0x1d   : > { %2156 = vmatprep.mubr.msk.bf16.mxu1 %vm429_vm1, %v2224_v13 }
  0x23   : > { %2125 = vmatmul.mubr.msk.bf16.gmra.mrb[8].mxu0 %vm429_vm1, %v2225_v14 }
  0x24   : > { %2157 = vmatmul.mubr.msk.bf16.gmra.mrb[8].mxu1 %vm429_vm1, %v2226_v15  ;;  %2128 = vmatprep.mubr.msk.bf16.mxu0 %vm429_vm1, %v2227_v16 }
  0x25   : > { %2160 = vmatprep.mubr.msk.bf16.mxu1 %vm429_vm1, %v2228_v17 }
  0x2b   : > { %2129 = vmatmul.mubr.msk.bf16.gmra.mrb[12].mxu0 %vm429_vm1, %v2229_v18 }
  0x2c   : > { %2161 = vmatmul.mubr.msk.bf16.gmra.mrb[12].mxu1 %vm429_vm1, %v2230_v19  ;;  %2132 = vmatprep.mubr.msk.bf16.mxu0 %vm429_vm1, %v2231_v20 }
  0x2d   : > { %2164 = vmatprep.mubr.msk.bf16.mxu1 %vm429_vm1, %v2232_v21 }
  0x33   : > { %2133 = vmatmul.mubr.msk.bf16.gmra.mrb[16].mxu0 %vm429_vm1, %v2233_v22 }
  0x34   : > { %2165 = vmatmul.mubr.msk.bf16.gmra.mrb[16].mxu1 %vm429_vm1, %v2234_v23  ;;  %2136 = vmatprep.mubr.msk.bf16.mxu0 %vm429_vm1, %v2235_v24 }
  0x35   : > { %2168 = vmatprep.mubr.msk.bf16.mxu1 %vm429_vm1, %v2236_v25 }
  0x3b   : > { %2137 = vmatmul.mubr.msk.bf16.gmra.mrb[20].mxu0 %vm429_vm1, %v2237_v26 }
  0x3c   : > { %2169 = vmatmul.mubr.msk.bf16.gmra.mrb[20].mxu1 %vm429_vm1, %v2238_v27  ;;  %2140 = vmatprep.mubr.msk.bf16.mxu0 %vm429_vm1, %v2239_v28 }
  0x3d   : > { %2172 = vmatprep.mubr.msk.bf16.mxu1 %vm429_vm1, %v2240_v29 }
  0x43   : > { %2141 = vmatmul.mubr.msk.bf16.gmra.mrb[24].mxu0 %vm429_vm1, %v2241_v30 }
  0x44   : > { %2173 = vmatmul.mubr.msk.bf16.gmra.mrb[24].mxu1 %vm429_vm1, %v2242_v31  ;;  %2144 = vmatprep.mubr.msk.bf16.mxu0 %vm429_vm1, %v2243_v32 }
  0x45   : > { %2176 = vmatprep.mubr.msk.bf16.mxu1 %vm429_vm1, %v2244_v33 }
  0x4b   : > { %2145 = vmatmul.mubr.msk.bf16.gmra.mrb[28].mxu0 %vm429_vm1, %v2245_v34 }
  0x4c   : > { %2177 = vmatmul.mubr.msk.bf16.gmra.mrb[28].mxu1 %vm429_vm1, %v2246_v35 }
  0xe6   : > { %v2118_v36 = vpop.f32.mrb[0].mxu0 }
  0xe7   : > { %v2150_v37 = vpop.f32.mrb[0].mxu1  ;;  %v1692_v38 = vmul.f32 -1.442695, %v2118_v36  ;;  %v564_v40 = vpop.f32.mrb[1].mxu0 }
  0xe8   : > { %v1724_v39 = vmul.f32 -1.442695, %v2150_v37  ;;  %v692_v41 = vpop.f32.mrb[1].mxu1  ;;  %v1690_v42 = vmul.f32 -1.442695, %v564_v40  ;;  %v2119_v44 = vpop.f32.mrb[2].mxu0 }
  0xe9   : > { %v1722_v43 = vmul.f32 -1.442695, %v692_v41  ;;  %v2151_v45 = vpop.f32.mrb[2].mxu1  ;;  %2247 = vpow2.f32 %v1692_v38  ;;  %v1693_v46 = vmul.f32 -1.442695, %v2119_v44  ;;  %v567_v47 = vpop.f32.mrb[3].mxu0 }
  0xea   : > { %v695_v48 = vpop.f32.mrb[3].mxu1  ;;  %2249 = vpow2.f32 %v1724_v39  ;;  %v1725_v49 = vmul.f32 -1.442695, %v2151_v45  ;;  %v1691_v50 = vmul.f32 -1.442695, %v567_v47 }
  0xeb   : > { %2251 = vpow2.f32 %v1690_v42  ;;  %v1723_v51 = vmul.f32 -1.442695, %v695_v48 }
  0xec   : > { %2253 = vpow2.f32 %v1722_v43 }
  0xed   : > { %2255 = vpow2.f32 %v1693_v46 }
  0xee   : > { %2257 = vpow2.f32 %v1725_v49  ;;  %v2122_v52 = vpop.f32.mrb[4].mxu0 }
  0xef   : > { %v2154_v53 = vpop.f32.mrb[4].mxu1  ;;  %2259 = vpow2.f32 %v1691_v50  ;;  %v1696_v54 = vmul.f32 -1.442695, %v2122_v52  ;;  %v580_v56 = vpop.f32.mrb[5].mxu0 }
  0xf0   : > { %v1728_v55 = vmul.f32 -1.442695, %v2154_v53  ;;  %v708_v57 = vpop.f32.mrb[5].mxu1  ;;  %2261 = vpow2.f32 %v1723_v51  ;;  %v1694_v58 = vmul.f32 -1.442695, %v580_v56  ;;  %v2123_v60 = vpop.f32.mrb[6].mxu0 }
  0xf1   : > { %v1726_v59 = vmul.f32 -1.442695, %v708_v57  ;;  %v2155_v61 = vpop.f32.mrb[6].mxu1  ;;  %2263 = vpow2.f32 %v1696_v54  ;;  %v1697_v62 = vmul.f32 -1.442695, %v2123_v60  ;;  %v583_v63 = vpop.f32.mrb[7].mxu0 }
  0xf2   : > { %v711_v0 = vpop.f32.mrb[7].mxu1  ;;  %2265 = vpow2.f32 %v1728_v55  ;;  %v1729_v36 = vmul.f32 -1.442695, %v2155_v61  ;;  %v1695_v40 = vmul.f32 -1.442695, %v583_v63 }
  0xf3   : > { %v2248_v1 = vpop.eup %2247  ;;  %2267 = vpow2.f32 %v1694_v58  ;;  %v1727_v44 = vmul.f32 -1.442695, %v711_v0 }
  0xf4   : > { %v2250_v2 = vpop.eup %2249  ;;  %v1013_v3 = vadd.f32 1.0, %v2248_v1  ;;  %2269 = vpow2.f32 %v1726_v59 }
  0xf5   : > { %v2252_v4 = vpop.eup %2251  ;;  %v1045_v5 = vadd.f32 1.0, %v2250_v2  ;;  %2271 = vpow2.f32 %v1697_v62 }
  0xf6   : > { %v2254_v6 = vpop.eup %2253  ;;  %2273 = vrcp.f32 %v1013_v3  ;;  %v1011_v7 = vadd.f32 1.0, %v2252_v4  ;;  %v2126_v8 = vpop.f32.mrb[8].mxu0 }
  0xf7   : > { %v2158_v9 = vpop.f32.mrb[8].mxu1  ;;  %v2256_v10 = vpop.eup %2255  ;;  %2275 = vrcp.f32 %v1045_v5  ;;  %v1043_v11 = vadd.f32 1.0, %v2254_v6  ;;  %v1700_v48 = vmul.f32 -1.442695, %v2126_v8 }
  0xf8   : > { %v596_v12 = vpop.f32.mrb[9].mxu0  ;;  %v2258_v13 = vpop.eup %2257  ;;  %2277 = vrcp.f32 %v1011_v7  ;;  %v1014_v14 = vadd.f32 1.0, %v2256_v10  ;;  %v1732_v51 = vmul.f32 -1.442695, %v2158_v9 }
  0xf9   : > { %v724_v15 = vpop.f32.mrb[9].mxu1  ;;  %v2127_v16 = vpop.f32.mrb[10].mxu0  ;;  %2279 = vrcp.f32 %v1043_v11  ;;  %v1046_v18 = vadd.f32 1.0, %v2258_v13  ;;  %v1698_v53 = vmul.f32 -1.442695, %v596_v12 }
  0xfa   : > { %v2260_v17 = vpop.eup %2259  ;;  %v2159_v19 = vpop.f32.mrb[10].mxu1  ;;  %2281 = vrcp.f32 %v1014_v14  ;;  %v1730_v56 = vmul.f32 -1.442695, %v724_v15  ;;  %v1701_v59 = vmul.f32 -1.442695, %v2127_v16 }
  0xfb   : > { %v2262_v20 = vpop.eup %2261  ;;  %v1012_v21 = vadd.f32 1.0, %v2260_v17  ;;  %v2643_v22 = vpop.f32.mrb[11].mxu0  ;;  %2283 = vrcp.f32 %v1046_v18  ;;  %v1733_v0 = vmul.f32 -1.442695, %v2159_v19 }
  0xfc   : > { %v2645_v23 = vpop.f32.mrb[11].mxu1  ;;  %v2264_v24 = vpop.eup %2263  ;;  %v1044_v25 = vadd.f32 1.0, %v2262_v20  ;;  %v1699_v5 = vmul.f32 -1.442695, %v2643_v22 }
  0xfd   : > { %v2266_v26 = vpop.eup %2265  ;;  %2285 = vrcp.f32 %v1012_v21  ;;  %v1017_v27 = vadd.f32 1.0, %v2264_v24  ;;  %v1731_v9 = vmul.f32 -1.442695, %v2645_v23 }
  0xfe   : > { %v2268_v28 = vpop.eup %2267  ;;  %2287 = vrcp.f32 %v1044_v25  ;;  %v1049_v29 = vadd.f32 1.0, %v2266_v26  ;;  %v2130_v32 = vpop.f32.mrb[12].mxu0 }
  0xff   : > { %v2270_v30 = vpop.eup %2269  ;;  %2289 = vrcp.f32 %v1017_v27  ;;  %v1015_v31 = vadd.f32 1.0, %v2268_v28  ;;  %v2647_v33 = vpop.f32.mrb[12].mxu1  ;;  %v1704_v13 = vmul.f32 -1.442695, %v2130_v32 }
 0x100   : > { %v2272_v34 = vpop.eup %2271  ;;  %2291 = vrcp.f32 %v1049_v29  ;;  %v1047_v35 = vadd.f32 1.0, %v2270_v30  ;;  %v2649_v37 = vpop.f32.mrb[13].mxu0  ;;  %v1736_v15 = vmul.f32 -1.442695, %v2647_v33 }
 0x101   : > { %v2274_v38 = vpop.eup %2273  ;;  %2293 = vrcp.f32 %v1015_v31  ;;  %v1018_v39 = vadd.f32 1.0, %v2272_v34  ;;  %v2651_v41 = vpop.f32.mrb[13].mxu1 }
 0x102   : > { %v2653_v42 = vpop.f32.mrb[14].mxu0  ;;  %v2276_v43 = vpop.eup %2275  ;;  %2295 = vrcp.f32 %v1047_v35 }
 0x103   : > { %v2655_v45 = vpop.f32.mrb[14].mxu1  ;;  %v2657_v46 = vpop.f32.mrb[15].mxu0  ;;  %2297 = vrcp.f32 %v1018_v39 }
 0x104   : > { %v2278_v47 = vpop.eup %2277  ;;  %v2659_v49 = vpop.f32.mrb[15].mxu1  ;;  %2299 = vpow2.f32 %v1729_v36 }
 0x105   : > { %v2280_v50 = vpop.eup %2279  ;;  %2301 = vpow2.f32 %v1695_v40 }
 0x106   : > { %v2282_v52 = vpop.eup %2281  ;;  %2303 = vpow2.f32 %v1727_v44  ;;  %v2668_v60 = vpop.f32.mrb[16].mxu0 }
 0x107   : > { %v2284_v54 = vpop.eup %2283  ;;  %v1892_v55 = vpack.c.bf16 %v2282_v52, %v2274_v38  ;;  %2305 = vpow2.f32 %v1700_v48  ;;  %v2670_v61 = vpop.f32.mrb[16].mxu1 }
 0x108   : > { %v2286_v57 = vpop.eup %2285  ;;  %v1972_v58 = vpack.c.bf16 %v2284_v54, %v2276_v43  ;;  %2307 = vpow2.f32 %v1732_v51  ;;  %v2673_v1 = vpop.f32.mrb[17].mxu0 }
 0x109   : > { %v2288_v62 = vpop.eup %2287  ;;  %2044 = vst [vmem:[%s2666_s26 + $0x8] sm:$0xff] %v1892_v55   ;;  %v1887_v63 = vpack.c.bf16 %v2286_v57, %v2278_v47  ;;  %v2675_v2 = vpop.f32.mrb[17].mxu1  ;;  %2309 = vpow2.f32 %v1698_v53 }
 0x10a   : > { %v2290_v3 = vpop.eup %2289  ;;  %2060 = vst [vmem:[%s2666_s26 + $0x88] sm:$0xff] %v1972_v58   ;;  %v1967_v4 = vpack.c.bf16 %v2288_v62, %v2280_v50  ;;  %v2679_v6 = vpop.f32.mrb[18].mxu0  ;;  %2311 = vpow2.f32 %v1730_v56 }
 0x10b   : > { %v2681_v7 = vpop.f32.mrb[18].mxu1  ;;  %v2683_v8 = vpop.eup %2291  ;;  %1888 = vst [vmem:[%s2666_s26] sm:$0xff] %v1887_v63   ;;  %2313 = vpow2.f32 %v1701_v59 }
 0x10c   : > { %v2687_v10 = vpop.f32.mrb[19].mxu0  ;;  %v2689_v11 = vpop.f32.mrb[19].mxu1  ;;  %2059 = vst [vmem:[%s2666_s26 + $0x80] sm:$0xff] %v1967_v4   ;;  %2315 = vpow2.f32 %v1733_v0  ;;  %v1702_v0 = vmul.f32 -1.442695, %v2649_v37 }
 0x10d   : > { %v2691_v12 = vpop.eup %2293  ;;  %2317 = vpow2.f32 %v1699_v5 }
 0x10e   : > { %v2694_v14 = vpop.eup %2295  ;;  %2319 = vpow2.f32 %v1731_v9  ;;  %v2697_v21 = vpop.f32.mrb[20].mxu0  ;;  %v1734_v9 = vmul.f32 -1.442695, %v2651_v41 }
 0x10f   : > { %v2298_v16 = vpop.eup %2297  ;;  %2321 = vpow2.f32 %v1704_v13  ;;  %v2699_v22 = vpop.f32.mrb[20].mxu1 }
 0x110   : > { %v2300_v17 = vpop.eup %2299  ;;  %v1902_v18 = vpack.c.bf16 %v2298_v16, %v2290_v3  ;;  %2323 = vpow2.f32 %v1736_v15  ;;  %v2702_v25 = vpop.f32.mrb[21].mxu0 }
 0x111   : > { %v2302_v19 = vpop.eup %2301  ;;  %v1050_v20 = vadd.f32 1.0, %v2300_v17  ;;  %v2704_v28 = vpop.f32.mrb[21].mxu1 }
 0x112   : > { %v2304_v23 = vpop.eup %2303  ;;  %2046 = vst [vmem:[%s2666_s26 + $0x18] sm:$0xff] %v1902_v18   ;;  %v1016_v24 = vadd.f32 1.0, %v2302_v19  ;;  %v2706_v29 = vpop.f32.mrb[22].mxu0  ;;  %v1705_v18 = vmul.f32 -1.442695, %v2653_v42 }
 0x113   : > { %v2306_v26 = vpop.eup %2305  ;;  %2325 = vrcp.f32 %v1050_v20  ;;  %v1048_v27 = vadd.f32 1.0, %v2304_v23  ;;  %v2708_v32 = vpop.f32.mrb[22].mxu1  ;;  %v1737_v20 = vmul.f32 -1.442695, %v2655_v45  ;;  %v1708_v45 = vmul.f32 -1.442695, %v2668_v60 }
 0x114   : > { %v2308_v30 = vpop.eup %2307  ;;  %2327 = vrcp.f32 %v1016_v24  ;;  %v1021_v31 = vadd.f32 1.0, %v2306_v26  ;;  %v2710_v35 = vpop.f32.mrb[23].mxu0  ;;  %v1703_v24 = vmul.f32 -1.442695, %v2657_v46  ;;  %v1740_v46 = vmul.f32 -1.442695, %v2670_v61 }
 0x115   : > { %v2310_v33 = vpop.eup %2309  ;;  %2329 = vrcp.f32 %v1048_v27  ;;  %v1053_v34 = vadd.f32 1.0, %v2308_v30  ;;  %v2712_v36 = vpop.f32.mrb[23].mxu1 }
 0x116   : > { %v2312_v38 = vpop.eup %2311  ;;  %2331 = vrcp.f32 %v1021_v31  ;;  %v1019_v39 = vadd.f32 1.0, %v2310_v33  ;;  %v2714_v51 = vpop.f32.mrb[24].mxu0 }
 0x117   : > { %v2314_v40 = vpop.eup %2313  ;;  %2333 = vrcp.f32 %v1053_v34  ;;  %v1051_v43 = vadd.f32 1.0, %v2312_v38  ;;  %v2716_v52 = vpop.f32.mrb[24].mxu1  ;;  %v1706_v38 = vmul.f32 -1.442695, %v2673_v1 }
 0x118   : > { %v2316_v44 = vpop.eup %2315  ;;  %2335 = vrcp.f32 %v1019_v39  ;;  %v1022_v47 = vadd.f32 1.0, %v2314_v40  ;;  %v2718_v55 = vpop.f32.mrb[25].mxu0 }
 0x119   : > { %v2318_v48 = vpop.eup %2317  ;;  %2337 = vrcp.f32 %v1051_v43  ;;  %v1054_v50 = vadd.f32 1.0, %v2316_v44  ;;  %v2720_v58 = vpop.f32.mrb[25].mxu1  ;;  %v1738_v44 = vmul.f32 -1.442695, %v2675_v2  ;;  %v1707_v2 = vmul.f32 -1.442695, %v2687_v10 }
 0x11a   : > { %v2320_v53 = vpop.eup %2319  ;;  %2339 = vrcp.f32 %v1022_v47  ;;  %v1020_v54 = vadd.f32 1.0, %v2318_v48  ;;  %v2722_v59 = vpop.f32.mrb[26].mxu0  ;;  %v1709_v48 = vmul.f32 -1.442695, %v2679_v6 }
 0x11b   : > { %v2322_v56 = vpop.eup %2321  ;;  %2341 = vrcp.f32 %v1054_v50  ;;  %v1052_v57 = vadd.f32 1.0, %v2320_v53  ;;  %v2725_v3 = vpop.f32.mrb[26].mxu1  ;;  %v1741_v53 = vmul.f32 -1.442695, %v2681_v7 }
 0x11c   : > { %v2324_v62 = vpop.eup %2323  ;;  %2343 = vrcp.f32 %v1020_v54  ;;  %v1025_v63 = vadd.f32 1.0, %v2322_v56  ;;  %v2728_v13 = vpop.f32.mrb[27].mxu0 }
 0x11d   : > { %v2326_v4 = vpop.eup %2325  ;;  %2345 = vrcp.f32 %v1052_v57  ;;  %v1057_v5 = vadd.f32 1.0, %v2324_v62  ;;  %v2730_v15 = vpop.f32.mrb[27].mxu1 }
 0x11e   : > { %v2328_v16 = vpop.eup %2327  ;;  %v1982_v17 = vpack.c.bf16 %v2326_v4, %v2683_v8  ;;  %2347 = vrcp.f32 %v1025_v63  ;;  %v1735_v8 = vmul.f32 -1.442695, %v2659_v49  ;;  %v2741_v42 = vpop.f32.mrb[28].mxu0 }
 0x11f   : > { %v2330_v37 = vpop.eup %2329  ;;  %v1897_v19 = vpack.c.bf16 %v2328_v16, %v2691_v12  ;;  %2349 = vrcp.f32 %v1057_v5  ;;  %v2743_v27 = vpop.f32.mrb[28].mxu1 }
 0x120   : > { %v2332_v23 = vpop.eup %2331  ;;  %2062 = vst [vmem:[%s2666_s26 + $0x98] sm:$0xff] %v1982_v17   ;;  %v1977_v41 = vpack.c.bf16 %v2330_v37, %v2694_v14  ;;  %2351 = vpow2.f32 %v1702_v0  ;;  %v2747_v30 = vpop.f32.mrb[29].mxu0 }
 0x121   : > { %v2334_v26 = vpop.eup %2333  ;;  %2045 = vst [vmem:[%s2666_s26 + $0x10] sm:$0xff] %v1897_v19   ;;  %2353 = vpow2.f32 %v1734_v9  ;;  %v2749_v14 = vpop.f32.mrb[29].mxu1 }
 0x122   : > { %v2336_v12 = vpop.eup %2335  ;;  %2061 = vst [vmem:[%s2666_s26 + $0x90] sm:$0xff] %v1977_v41   ;;  %2355 = vpow2.f32 %v1705_v18  ;;  %v2752_v33 = vpop.f32.mrb[30].mxu0 }
 0x123   : > { %v2338_v31 = vpop.eup %2337  ;;  %2357 = vpow2.f32 %v1737_v20  ;;  %v2754_v49 = vpop.f32.mrb[30].mxu1 }
 0x124   : > { %v2340_v34 = vpop.eup %2339  ;;  %2359 = vpow2.f32 %v1703_v24  ;;  %v2757_v39 = vpop.f32.mrb[31].mxu0 }
 0x125   : > { %v2759_v60 = vpop.f32.mrb[31].mxu1  ;;  %v2342_v40 = vpop.eup %2341  ;;  %v1912_v43 = vpack.c.bf16 %v2340_v34, %v2332_v23  ;;  %2361 = vpow2.f32 %v1735_v8 }
 0x126   : > { %v2344_v61 = vpop.eup %2343  ;;  %v1992_v47 = vpack.c.bf16 %v2342_v40, %v2334_v26  ;;  %2363 = vpow2.f32 %v1708_v45 }
 0x127   : > { %v2346_v50 = vpop.eup %2345  ;;  %2048 = vst [vmem:[%s2666_s26 + $0x28] sm:$0xff] %v1912_v43   ;;  %v1907_v1 = vpack.c.bf16 %v2344_v61, %v2336_v12  ;;  %2365 = vpow2.f32 %v1740_v46 }
 0x128   : > { %v2765_v54 = vpop.eup %2347  ;;  %2064 = vst [vmem:[%s2666_s26 + $0xa8] sm:$0xff] %v1992_v47   ;;  %v1987_v56 = vpack.c.bf16 %v2346_v50, %v2338_v31  ;;  %2367 = vpow2.f32 %v1706_v38  ;;  %v1739_v38 = vmul.f32 -1.442695, %v2689_v11  ;;  %v1744_v47 = vmul.f32 -1.442695, %v2699_v22 }
 0x129   : > { %v2769_v57 = vpop.eup %2349  ;;  %2047 = vst [vmem:[%s2666_s26 + $0x20] sm:$0xff] %v1907_v1   ;;  %2369 = vpow2.f32 %v1738_v44  ;;  %v1712_v44 = vmul.f32 -1.442695, %v2697_v21  ;;  %v1710_v50 = vmul.f32 -1.442695, %v2702_v25 }
 0x12a   : > { %v2352_v62 = vpop.eup %2351  ;;  %2063 = vst [vmem:[%s2666_s26 + $0xa0] sm:$0xff] %v1987_v56   ;;  %2371 = vpow2.f32 %v1709_v48  ;;  %v1742_v11 = vmul.f32 -1.442695, %v2704_v28  ;;  %v1745_v25 = vmul.f32 -1.442695, %v2708_v32 }
 0x12b   : > { %v2354_v6 = vpop.eup %2353  ;;  %v1023_v63 = vadd.f32 1.0, %v2352_v62  ;;  %2373 = vpow2.f32 %v1741_v53  ;;  %v1711_v28 = vmul.f32 -1.442695, %v2710_v35  ;;  %v1748_v32 = vmul.f32 -1.442695, %v2716_v52 }
 0x12c   : > { %v2356_v0 = vpop.eup %2355  ;;  %v1055_v4 = vadd.f32 1.0, %v2354_v6  ;;  %2375 = vpow2.f32 %v1707_v2  ;;  %v1713_v2 = vmul.f32 -1.442695, %v2706_v29  ;;  %v1716_v29 = vmul.f32 -1.442695, %v2714_v51 }
 0x12d   : > { %v2358_v7 = vpop.eup %2357  ;;  %2377 = vrcp.f32 %v1023_v63  ;;  %v1026_v5 = vadd.f32 1.0, %v2356_v0  ;;  %v1714_v35 = vmul.f32 -1.442695, %v2718_v55 }
 0x12e   : > { %v2360_v9 = vpop.eup %2359  ;;  %2379 = vrcp.f32 %v1055_v4  ;;  %v1058_v16 = vadd.f32 1.0, %v2358_v7 }
 0x12f   : > { %v2362_v10 = vpop.eup %2361  ;;  %2381 = vrcp.f32 %v1026_v5  ;;  %v1024_v17 = vadd.f32 1.0, %v2360_v9 }
 0x130   : > { %v2364_v18 = vpop.eup %2363  ;;  %2383 = vrcp.f32 %v1058_v16  ;;  %v1056_v37 = vadd.f32 1.0, %v2362_v10 }
 0x131   : > { %v2366_v19 = vpop.eup %2365  ;;  %2385 = vrcp.f32 %v1024_v17  ;;  %v1029_v20 = vadd.f32 1.0, %v2364_v18 }
 0x132   : > { %v2368_v23 = vpop.eup %2367  ;;  %2387 = vrcp.f32 %v1056_v37  ;;  %v1061_v41 = vadd.f32 1.0, %v2366_v19 }
 0x133   : > { %v2370_v24 = vpop.eup %2369  ;;  %2389 = vrcp.f32 %v1029_v20  ;;  %v1027_v26 = vadd.f32 1.0, %v2368_v23 }
 0x134   : > { %v2372_v8 = vpop.eup %2371  ;;  %2391 = vrcp.f32 %v1061_v41  ;;  %v1059_v12 = vadd.f32 1.0, %v2370_v24 }
 0x135   : > { %v2374_v45 = vpop.eup %2373  ;;  %2393 = vrcp.f32 %v1027_v26  ;;  %v1030_v31 = vadd.f32 1.0, %v2372_v8 }
 0x136   : > { %v2376_v46 = vpop.eup %2375  ;;  %2395 = vrcp.f32 %v1059_v12  ;;  %v1062_v34 = vadd.f32 1.0, %v2374_v45 }
 0x137   : > { %v2378_v40 = vpop.eup %2377  ;;  %2397 = vrcp.f32 %v1030_v31  ;;  %v1028_v43 = vadd.f32 1.0, %v2376_v46 }
 0x138   : > { %v2380_v61 = vpop.eup %2379  ;;  %2399 = vrcp.f32 %v1062_v34 }
 0x139   : > { %v2382_v48 = vpop.eup %2381  ;;  %2401 = vrcp.f32 %v1028_v43 }
 0x13a   : > { %v2384_v1 = vpop.eup %2383  ;;  %v1922_v53 = vpack.c.bf16 %v2382_v48, %v2765_v54  ;;  %2403 = vpow2.f32 %v1739_v38 }
 0x13b   : > { %v2386_v56 = vpop.eup %2385  ;;  %v2002_v21 = vpack.c.bf16 %v2384_v1, %v2769_v57  ;;  %2405 = vpow2.f32 %v1712_v44  ;;  %v1743_v57 = vmul.f32 -1.442695, %v2712_v36  ;;  %v1746_v36 = vmul.f32 -1.442695, %v2720_v58 }
 0x13c   : > { %v2388_v22 = vpop.eup %2387  ;;  %2050 = vst [vmem:[%s2666_s26 + $0x38] sm:$0xff] %v1922_v53   ;;  %v1917_v62 = vpack.c.bf16 %v2386_v56, %v2378_v40  ;;  %2407 = vpow2.f32 %v1744_v47  ;;  %v1749_v53 = vmul.f32 -1.442695, %v2725_v3  ;;  %v1752_v3 = vmul.f32 -1.442695, %v2743_v27 }
 0x13d   : > { %v2390_v6 = vpop.eup %2389  ;;  %2066 = vst [vmem:[%s2666_s26 + $0xb8] sm:$0xff] %v2002_v21   ;;  %v1997_v54 = vpack.c.bf16 %v2388_v22, %v2380_v61  ;;  %2409 = vpow2.f32 %v1710_v50  ;;  %v1717_v50 = vmul.f32 -1.442695, %v2722_v59  ;;  %v1715_v21 = vmul.f32 -1.442695, %v2728_v13 }
 0x13e   : > { %v2392_v63 = vpop.eup %2391  ;;  %2049 = vst [vmem:[%s2666_s26 + $0x30] sm:$0xff] %v1917_v62   ;;  %2411 = vpow2.f32 %v1742_v11  ;;  %v1747_v22 = vmul.f32 -1.442695, %v2730_v15  ;;  %v1750_v15 = vmul.f32 -1.442695, %v2749_v14 }
 0x13f   : > { %v2394_v0 = vpop.eup %2393  ;;  %2065 = vst [vmem:[%s2666_s26 + $0xb0] sm:$0xff] %v1997_v54   ;;  %2413 = vpow2.f32 %v1713_v2  ;;  %v1718_v54 = vmul.f32 -1.442695, %v2747_v30  ;;  %v1751_v14 = vmul.f32 -1.442695, %v2759_v60 }
 0x140   : > { %v2789_v4 = vpop.eup %2395  ;;  %2415 = vpow2.f32 %v1745_v25  ;;  %v1720_v25 = vmul.f32 -1.442695, %v2741_v42  ;;  %v1721_v42 = vmul.f32 -1.442695, %v2752_v33 }
 0x141   : > { %v2398_v7 = vpop.eup %2397  ;;  %2417 = vpow2.f32 %v1711_v28 }
 0x142   : > { %v2400_v5 = vpop.eup %2399  ;;  %v1932_v9 = vpack.c.bf16 %v2398_v7, %v2390_v6  ;;  %2419 = vpow2.f32 %v1743_v57 }
 0x143   : > { %v2402_v16 = vpop.eup %2401  ;;  %v2012_v10 = vpack.c.bf16 %v2400_v5, %v2392_v63  ;;  %2421 = vpow2.f32 %v1716_v29  ;;  %v1753_v29 = vmul.f32 -1.442695, %v2754_v49 }
 0x144   : > { %v2404_v51 = vpop.eup %2403  ;;  %2052 = vst [vmem:[%s2666_s26 + $0x48] sm:$0xff] %v1932_v9   ;;  %v1927_v17 = vpack.c.bf16 %v2402_v16, %v2394_v0  ;;  %2423 = vpow2.f32 %v1748_v32 }
 0x145   : > { %v2406_v18 = vpop.eup %2405  ;;  %2068 = vst [vmem:[%s2666_s26 + $0xc8] sm:$0xff] %v2012_v10   ;;  %v1060_v52 = vadd.f32 1.0, %v2404_v51  ;;  %2425 = vpow2.f32 %v1714_v35 }
 0x146   : > { %v2408_v37 = vpop.eup %2407  ;;  %2051 = vst [vmem:[%s2666_s26 + $0x40] sm:$0xff] %v1927_v17   ;;  %v1033_v55 = vadd.f32 1.0, %v2406_v18  ;;  %2427 = vpow2.f32 %v1746_v36 }
 0x147   : > { %v2410_v19 = vpop.eup %2409  ;;  %2429 = vrcp.f32 %v1060_v52  ;;  %v1065_v20 = vadd.f32 1.0, %v2408_v37 }
 0x148   : > { %v2412_v23 = vpop.eup %2411  ;;  %2431 = vrcp.f32 %v1033_v55  ;;  %v1031_v58 = vadd.f32 1.0, %v2410_v19 }
 0x149   : > { %v2414_v41 = vpop.eup %2413  ;;  %2433 = vrcp.f32 %v1065_v20  ;;  %v1063_v24 = vadd.f32 1.0, %v2412_v23 }
 0x14a   : > { %v2416_v26 = vpop.eup %2415  ;;  %2435 = vrcp.f32 %v1031_v58  ;;  %v1034_v8 = vadd.f32 1.0, %v2414_v41 }
 0x14b   : > { %v2418_v12 = vpop.eup %2417  ;;  %2437 = vrcp.f32 %v1063_v24  ;;  %v1066_v45 = vadd.f32 1.0, %v2416_v26 }
 0x14c   : > { %v2420_v31 = vpop.eup %2419  ;;  %2439 = vrcp.f32 %v1034_v8  ;;  %v1032_v46 = vadd.f32 1.0, %v2418_v12 }
 0x14d   : > { %v2422_v34 = vpop.eup %2421  ;;  %2441 = vrcp.f32 %v1066_v45  ;;  %v1064_v38 = vadd.f32 1.0, %v2420_v31 }
 0x14e   : > { %v2424_v40 = vpop.eup %2423  ;;  %2443 = vrcp.f32 %v1032_v46  ;;  %v1037_v43 = vadd.f32 1.0, %v2422_v34 }
 0x14f   : > { %v2426_v44 = vpop.eup %2425  ;;  %2445 = vrcp.f32 %v1064_v38  ;;  %v1069_v61 = vadd.f32 1.0, %v2424_v40 }
 0x150   : > { %v2428_v47 = vpop.eup %2427  ;;  %v1035_v48 = vadd.f32 1.0, %v2426_v44  ;;  %2447 = vrcp.f32 %v1037_v43 }
 0x151   : > { %v2430_v1 = vpop.eup %2429  ;;  %2449 = vrcp.f32 %v1069_v61  ;;  %v1067_v35 = vadd.f32 1.0, %v2428_v47 }
 0x152   : > { %v2432_v11 = vpop.eup %2431  ;;  %v2007_v56 = vpack.c.bf16 %v2430_v1, %v2789_v4  ;;  %2451 = vrcp.f32 %v1035_v48  ;;  %v1719_v4 = vmul.f32 -1.442695, %v2757_v39 }
 0x153   : > { %v2434_v2 = vpop.eup %2433  ;;  %2453 = vpow2.f32 %v1717_v50 }
 0x154   : > { %v2436_v62 = vpop.eup %2435  ;;  %2067 = vst [vmem:[%s2666_s26 + $0xc0] sm:$0xff] %v2007_v56   ;;  %2455 = vpow2.f32 %v1749_v53 }
 0x155   : > { %v2438_v59 = vpop.eup %2437  ;;  %2457 = vpow2.f32 %v1715_v21 }
 0x156   : > { %v2440_v6 = vpop.eup %2439  ;;  %2459 = vpow2.f32 %v1747_v22 }
 0x157   : > { %v2442_v13 = vpop.eup %2441  ;;  %v1942_v28 = vpack.c.bf16 %v2440_v6, %v2432_v11  ;;  %2461 = vpow2.f32 %v1720_v25 }
 0x158   : > { %v2444_v63 = vpop.eup %2443  ;;  %v2022_v57 = vpack.c.bf16 %v2442_v13, %v2434_v2  ;;  %2463 = vpow2.f32 %v1752_v3 }
 0x159   : > { %v2446_v0 = vpop.eup %2445  ;;  %2054 = vst [vmem:[%s2666_s26 + $0x58] sm:$0xff] %v1942_v28   ;;  %v1937_v27 = vpack.c.bf16 %v2444_v63, %v2436_v62  ;;  %2465 = vpow2.f32 %v1718_v54 }
 0x15a   : > { %2070 = vst [vmem:[%s2666_s26 + $0xd8] sm:$0xff] %v2022_v57   ;;  %v2017_v30 = vpack.c.bf16 %v2446_v0, %v2438_v59  ;;  %v2448_v32 = vpop.eup %2447  ;;  %2467 = vpow2.f32 %v1750_v15 }
 0x15b   : > { %2053 = vst [vmem:[%s2666_s26 + $0x50] sm:$0xff] %v1937_v27   ;;  %v2450_v7 = vpop.eup %2449  ;;  %2469 = vpow2.f32 %v1721_v42 }
 0x15c   : > { %2069 = vst [vmem:[%s2666_s26 + $0xd0] sm:$0xff] %v2017_v30   ;;  %v2452_v33 = vpop.eup %2451  ;;  %2471 = vpow2.f32 %v1753_v29 }
 0x15d   : > { %v2454_v5 = vpop.eup %2453  ;;  %2473 = vpow2.f32 %v1719_v4 }
 0x15e   : > { %v2456_v9 = vpop.eup %2455  ;;  %v1038_v49 = vadd.f32 1.0, %v2454_v5  ;;  %2475 = vpow2.f32 %v1751_v14 }
 0x15f   : > { %v2458_v36 = vpop.eup %2457  ;;  %2477 = vrcp.f32 %v1067_v35  ;;  %v1070_v16 = vadd.f32 1.0, %v2456_v9 }
 0x160   : > { %v2460_v39 = vpop.eup %2459  ;;  %2479 = vrcp.f32 %v1038_v49  ;;  %v1036_v10 = vadd.f32 1.0, %v2458_v36 }
 0x161   : > { %v2462_v51 = vpop.eup %2461  ;;  %2481 = vrcp.f32 %v1070_v16  ;;  %v1068_v60 = vadd.f32 1.0, %v2460_v39 }
 0x162   : > { %v2464_v17 = vpop.eup %2463  ;;  %2483 = vrcp.f32 %v1036_v10  ;;  %v1041_v18 = vadd.f32 1.0, %v2462_v51 }
 0x163   : > { %v2466_v52 = vpop.eup %2465  ;;  %2485 = vrcp.f32 %v1068_v60  ;;  %v1073_v37 = vadd.f32 1.0, %v2464_v17 }
 0x164   : > { %v2468_v55 = vpop.eup %2467  ;;  %2487 = vrcp.f32 %v1041_v18  ;;  %v1039_v19 = vadd.f32 1.0, %v2466_v52 }
 0x165   : > { %v2470_v20 = vpop.eup %2469  ;;  %2489 = vrcp.f32 %v1073_v37  ;;  %v1071_v23 = vadd.f32 1.0, %v2468_v55 }
 0x166   : > { %v2472_v58 = vpop.eup %2471  ;;  %2491 = vrcp.f32 %v1039_v19  ;;  %v1042_v41 = vadd.f32 1.0, %v2470_v20 }
 0x167   : > { %v2474_v24 = vpop.eup %2473  ;;  %2493 = vrcp.f32 %v1071_v23  ;;  %v1074_v26 = vadd.f32 1.0, %v2472_v58 }
 0x168   : > { %v2476_v8 = vpop.eup %2475  ;;  %2495 = vrcp.f32 %v1042_v41  ;;  %v1040_v12 = vadd.f32 1.0, %v2474_v24 }
 0x169   : > { %v2478_v45 = vpop.eup %2477  ;;  %2497 = vrcp.f32 %v1074_v26  ;;  %v1072_v31 = vadd.f32 1.0, %v2476_v8 }
 0x16a   : > { %v2480_v46 = vpop.eup %2479  ;;  %2499 = vrcp.f32 %v1040_v12 }
 0x16b   : > { %v2482_v34 = vpop.eup %2481  ;;  %v1952_v38 = vpack.c.bf16 %v2480_v46, %v2448_v32  ;;  %2501 = vrcp.f32 %v1072_v31 }
 0x16c   : > { %v2484_v40 = vpop.eup %2483  ;;  %v2032_v43 = vpack.c.bf16 %v2482_v34, %v2450_v7 }
 0x16d   : > { %v2486_v44 = vpop.eup %2485  ;;  %2056 = vst [vmem:[%s2666_s26 + $0x68] sm:$0xff] %v1952_v38   ;;  %v1947_v61 = vpack.c.bf16 %v2484_v40, %v2452_v33 }
 0x16e   : > { %v2488_v47 = vpop.eup %2487  ;;  %2072 = vst [vmem:[%s2666_s26 + $0xe8] sm:$0xff] %v2032_v43   ;;  %v2027_v48 = vpack.c.bf16 %v2486_v44, %v2478_v45 }
 0x16f   : > { %v2490_v50 = vpop.eup %2489  ;;  %2055 = vst [vmem:[%s2666_s26 + $0x60] sm:$0xff] %v1947_v61  }
 0x170   : > { %v2492_v1 = vpop.eup %2491  ;;  %2071 = vst [vmem:[%s2666_s26 + $0xe0] sm:$0xff] %v2027_v48  }
 0x171   : > { %v2494_v53 = vpop.eup %2493 }
 0x172   : > { %v2496_v11 = vpop.eup %2495 }
 0x173   : > { %v2498_v56 = vpop.eup %2497  ;;  %v1962_v21 = vpack.c.bf16 %v2496_v11, %v2488_v47 }
 0x174   : > { %v2500_v2 = vpop.eup %2499  ;;  %v2042_v22 = vpack.c.bf16 %v2498_v56, %v2490_v50 }
 0x175   : > { %v2502_v62 = vpop.eup %2501  ;;  %2058 = vst [vmem:[%s2666_s26 + $0x78] sm:$0xff] %v1962_v21   ;;  %v1957_v25 = vpack.c.bf16 %v2500_v2, %v2492_v1 }
 0x176   : > { %2074 = vst [vmem:[%s2666_s26 + $0xf8] sm:$0xff] %v2042_v22   ;;  %v2037_v59 = vpack.c.bf16 %v2502_v62, %v2494_v53 }
 0x177   : > { %2057 = vst [vmem:[%s2666_s26 + $0x70] sm:$0xff] %v1957_v25  }
 0x178   : > { %2073 = vst [vmem:[%s2666_s26 + $0xf0] sm:$0xff] %v2037_v59  }
 0x179 PF: > { %s12_s11 = sadd.s32 1, %s2525_s11   ;;  %s2835_s9 = smov %s2521_s10 }
 0x17a   : > { %p9_p5 = scmp.ge.s32.totalorder %s12_s11, 6   ;;  %s2836_s10 = smov %s2838_s12 }
 0x17c   :  { %11 = sbr.rel (!%p9_p5) target bundleno = 2 (0x2), region = 61 }

</bundles_post_ra>
